<compile_context>
chip_gen: v6e
topology: v6e:2x2x1
jax: 0.10.0
libtpu: 0.0.40
codegen_flags: <defaults>
</compile_context>

<pallas_src>
import math

import numpy as np
import jax
import jax.numpy as jnp
from jax import lax
from jax.experimental import pallas as pl
from jax.experimental.pallas import tpu as pltpu


VMEM_SPEC = pl.BlockSpec(memory_space=pltpu.MemorySpace.VMEM)
SMEM_SPEC = pl.BlockSpec(memory_space=pltpu.MemorySpace.SMEM)


# --------------------------------------------------------------------------
# The single fused kernel
# --------------------------------------------------------------------------
def _make_fused_kernel(S, E, Np):
    G = 3 * E

    def kernel(seq_ref, pw1_ref, pb1_ref, pw2_ref,
               wih_ref, whh_ref, grub_ref, qw_ref,
               embd_ref, embp_ref, embm_ref,
               adjd_ref, adjp_ref,
               hgsd_ref, hgsp_ref, hgm_ref,
               awq_ref, akvd_ref, akvp_ref,
               rowse_ref, rows2e_ref,
               clsw_ref, clsb_ref, cc_ref, ddi_ref,
               scal_ref, out_ref):
        f32 = jnp.float32
        seq = seq_ref[...]                                           # (S, 3E)

        # ---- Aggregation ("poly") gate + on-device visit keep-mask ----
        ph = jnp.maximum(
            jnp.dot(seq[:, :2 * E], pw1_ref[...], preferred_element_type=f32)
            + pb1_ref[...], 0.0)
        poly = jax.nn.sigmoid(
            jnp.dot(ph, pw2_ref[...], preferred_element_type=f32) + scal_ref[6])
        keep = (jnp.abs(poly[0:1, :] - poly) <= 0.05).astype(f32)    # (S, 1)

        # ---- fused 3-GRU recurrence: one (1,3E)@(3E,9E) push per step ----
        gx = jnp.dot(seq, wih_ref[...], preferred_element_type=f32) + grub_ref[0:1, :]
        bhh = grub_ref[1:2, :]
        whh = whh_ref[...]
        h = jnp.zeros((1, G), f32)                                   # [h_diag|h_proc|h_med]
        for t in range(S):                                           # static unroll, S small
            gh = jnp.dot(h, whh, preferred_element_type=f32) + bhh
            gxt = gx[t:t + 1, :]
            r = jax.nn.sigmoid(gxt[:, 0:G] + gh[:, 0:G])
            z = jax.nn.sigmoid(gxt[:, G:2 * G] + gh[:, G:2 * G])
            n = jnp.tanh(gxt[:, 2 * G:3 * G] + r * gh[:, 2 * G:3 * G])
            h_new = (1.0 - z) * n + z * h
            kt = keep[t:t + 1, :]                                    # skip unselected visits
            h = kt * h_new + (1.0 - kt) * h

        h_m = h[:, 2 * E:3 * E]

        # ---- query heads: Linear(2E,E) on [h,h] folded, both heads block-diag fused ----
        q_cat = jnp.dot(jnp.maximum(h[:, :2 * E], 0.0), qw_ref[...],
                        preferred_element_type=f32) + rows2e_ref[0:1, :]   # [q_dia|q_pro]
        q_dia = q_cat[:, :E]
        q_pro = q_cat[:, E:]

        # ---- hetero effect graphs ----
        # TODO(synk): hetero_effect_graph source is not part of the provided
        # module; implemented as a degree-normalised bipartite message-passing
        # surrogate (adjacency-averaged source features + transformed med features).
        med_h = jnp.dot(embm_ref[...], hgm_ref[...],
                        preferred_element_type=f32) + rows2e_ref[1:2, :]   # (Nm, 2E)

        def hetero(emb_src, adj_t, wsrc, bsrc, med_part):
            src_h = jnp.dot(emb_src, wsrc, preferred_element_type=f32) + bsrc
            denom = jnp.sum(adj_t, axis=-1, keepdims=True) + 1e-8
            msg = jnp.dot(adj_t, src_h, preferred_element_type=f32) / denom
            return jnp.maximum(msg + med_part, 0.0)

        drug_dia = hetero(embd_ref[...], adjd_ref[...], hgsd_ref[...],
                          rowse_ref[0:1, :], med_h[:, :E])
        drug_pro = hetero(embp_ref[...], adjp_ref[...], hgsp_ref[...],
                          rowse_ref[1:2, :], med_h[:, E:])

        # ---- drug attention (Q projections fused, 1/sqrt(131) pre-folded) ----
        q_att = jnp.dot(q_cat, awq_ref[...], preferred_element_type=f32) + rows2e_ref[2:3, :]

        def attend(q_scaled, drug, wkv, bkv):
            kv = jnp.dot(drug, wkv, preferred_element_type=f32) + bkv      # (Nm, 2E)
            s = lax.dot_general(q_scaled, kv[:, :E], (((1,), (1,)), ((), ())),
                                preferred_element_type=f32)                # (1, Nm)
            w = jax.nn.softmax(s, axis=-1)
            return jnp.dot(w, kv[:, E:], preferred_element_type=f32)       # (1, E)

        med_dia = attend(q_att[:, :E], drug_dia, akvd_ref[...], rows2e_ref[3:4, :])
        med_pro = attend(q_att[:, E:], drug_pro, akvp_ref[...], rows2e_ref[4:5, :])

        # ---- layernorms ----
        def layernorm(x, g, b):
            mu = jnp.mean(x, axis=-1, keepdims=True)
            var = jnp.mean((x - mu) ** 2, axis=-1, keepdims=True)
            return (x - mu) * lax.rsqrt(var + 1e-5) * g + b

        ln_dia = layernorm(q_dia, rowse_ref[2:3, :], rowse_ref[3:4, :])
        ln_pro = layernorm(q_pro, rowse_ref[4:5, :], rowse_ref[5:6, :])

        # ---- classifier: single (1,6E)@(6E,Np) push on an in-register concat ----
        feat = jnp.concatenate([ln_dia, med_dia, ln_pro, med_pro, h_m, h_m], axis=-1)
        score = jnp.dot(jnp.maximum(feat, 0.0), clsw_ref[...],
                        preferred_element_type=f32) + clsb_ref[...]        # (1, Np)

        # ---- causality review (vectorised over meds) ----
        cdm = cc_ref[0:1, :]
        cpm = cc_ref[1:2, :]
        minus = jnp.logical_and(cdm < scal_ref[0], cpm < scal_ref[1])
        plus = jnp.logical_and(jnp.logical_not(minus),
                               jnp.logical_or(cdm > scal_ref[2], cpm > scal_ref[3]))
        score = score - scal_ref[4] * minus.astype(f32) + scal_ref[5] * plus.astype(f32)

        # ---- DDI regulariser: 0.0005 * sum_ij p_i p_j ddi_ij ----
        p = jax.nn.sigmoid(score)
        t = jnp.dot(p, ddi_ref[...], preferred_element_type=f32)
        neg = 0.0005 * jnp.sum(t * p, keepdims=True)                       # (1, 1)

        # batch_neg packed into the last (padding) lane -> one lane-dense store
        col = lax.broadcasted_iota(jnp.int32, (1, Np), 1)
        out_ref[...] = jnp.where(col == Np - 1, neg, score)

    return kernel


def _pallas_forward(seq_cat, cc, b):
    S = seq_cat.shape[0]
    E = b["emb_diag"].shape[1]
    Np = b["cls_w"].shape[1]
    kernel = _make_fused_kernel(S, E, Np)
    return pl.pallas_call(
        kernel,
        out_shape=jax.ShapeDtypeStruct((1, Np), jnp.float32),
        in_specs=[VMEM_SPEC] * 25 + [SMEM_SPEC],
        out_specs=VMEM_SPEC,
    )(seq_cat, b["poly_w1"], b["poly_b1"], b["poly_w2"],
      b["gru_wih"], b["gru_whh"], b["gru_b"], b["q_w"],
      b["emb_diag"], b["emb_proc"], b["emb_med"],
      b["adj_dia_t"], b["adj_pro_t"],
      b["hg_wsrc_dia"], b["hg_wsrc_pro"], b["hg_wmed"],
      b["att_wq"], b["att_wkv_dia"], b["att_wkv_pro"],
      b["rows_e"], b["rows_2e"],
      b["cls_w"], b["cls_b"], cc, b["ddi_pad"],
      b["scalars"])


# --------------------------------------------------------------------------
# Device-side forward (jitted): fixed-shape gathers + the fused kernel
# --------------------------------------------------------------------------
@jax.jit
def _device_forward(bundle, diag_idx, diag_msk, proc_idx, proc_msk,
                    med_idx, med_msk, perm, last_diag, last_proc):
    # batched gather + masked sum: (T, L, E) -> (T, E), one op per branch
    seq_diag = jnp.sum(bundle["emb_diag"][diag_idx] * diag_msk[:, :, None], axis=1)
    seq_proc = jnp.sum(bundle["emb_proc"][proc_idx] * proc_msk[:, :, None], axis=1)
    seq_med = jnp.sum(bundle["emb_med"][med_idx] * med_msk[:, :, None], axis=1)
    seq_cat = jnp.concatenate([seq_diag, seq_proc, seq_med], axis=-1)[perm]  # (S, 3E)

    # causality-review tables for the last admission (max over its codes)
    cdm = jnp.maximum(jnp.max(bundle["eff_diag_pad"][last_diag], axis=0), 0.0)
    cpm = jnp.maximum(jnp.max(bundle["eff_proc_pad"][last_proc], axis=0), 0.0)
    cc = jnp.stack([cdm, cpm], axis=0)                                      # (2, Np)

    return _pallas_forward(seq_cat, cc, bundle)


# --------------------------------------------------------------------------
# Parameters and fused/packed bundle
# --------------------------------------------------------------------------
def init_params(key, emb_dim, voc_size):
    n_diag, n_proc, n_med = voc_size[0], voc_size[1], voc_size[2]
    keys = iter(jax.random.split(key, 64))

    def lin(k, fan_in, fan_out):
        k1, k2 = jax.random.split(k)
        bound = 1.0 / math.sqrt(float(fan_in))
        w = jax.random.uniform(k1, (fan_in, fan_out), jnp.float32, -bound, bound)
        b = jax.random.uniform(k2, (fan_out,), jnp.float32, -bound, bound)
        return w, b

    p = {}
    # embeddings (init_weights: uniform(-0.1, 0.1))
    p["emb_diag"] = jax.random.uniform(next(keys), (n_diag, emb_dim), jnp.float32, -0.1, 0.1)
    p["emb_proc"] = jax.random.uniform(next(keys), (n_proc, emb_dim), jnp.float32, -0.1, 0.1)
    p["emb_med"] = jax.random.uniform(next(keys), (n_med, emb_dim), jnp.float32, -0.1, 0.1)

    # Aggregation (poly): Linear(2E,32)+ReLU, Linear(32,1)+sigmoid
    p["poly_w1"], p["poly_b1"] = lin(next(keys), emb_dim * 2, 32)
    p["poly_w2"], p["poly_b2"] = lin(next(keys), 32, 1)

    # three GRUs (gate order r, z, n; weights stored transposed, (E, 3E))
    for name in ("diag", "proc", "med"):
        p[f"gru_{name}_wih"], p[f"gru_{name}_bih"] = lin(next(keys), emb_dim, 3 * emb_dim)
        p[f"gru_{name}_whh"], p[f"gru_{name}_bhh"] = lin(next(keys), emb_dim, 3 * emb_dim)

    # query heads (ReLU then Linear(2E,E))
    p["qdia_w"], p["qdia_b"] = lin(next(keys), emb_dim * 2, emb_dim)
    p["qpro_w"], p["qpro_b"] = lin(next(keys), emb_dim * 2, emb_dim)

    # hetero-graph surrogate weights
    for name in ("dia", "pro"):
        p[f"hg_{name}_wsrc"], p[f"hg_{name}_bsrc"] = lin(next(keys), emb_dim, emb_dim)
        p[f"hg_{name}_wmed"], p[f"hg_{name}_bmed"] = lin(next(keys), emb_dim, emb_dim)

    # drug attention (Q/K/V) for diag and proc branches
    for name in ("dia", "pro"):
        for proj in ("q", "k", "v"):
            p[f"att_{name}_w{proj}"], p[f"att_{name}_b{proj}"] = lin(next(keys), emb_dim, emb_dim)

    # layernorms
    for name in ("dia", "pro"):
        p[f"ln_{name}_g"] = jnp.ones((emb_dim,), jnp.float32)
        p[f"ln_{name}_b"] = jnp.zeros((emb_dim,), jnp.float32)

    # classification: ReLU then Linear(6E, n_med)
    p["cls_w"], p["cls_b"] = lin(next(keys), emb_dim * 6, n_med)

    # CausaltyReview learnable scalars
    p["c1_minus_weight"] = jnp.float32(0.05)
    p["c1_plus_weight"] = jnp.float32(0.05)
    return p


def prepare_bundle(params, emb_dim, diag_adj, proc_adj, ddi_adj,
                   diag_med_effect, proc_med_effect, limits):
    """Fused / pre-folded / packed weights for the single kernel (done once)."""
    E = emb_dim
    f32 = jnp.float32
    n_med = ddi_adj.shape[0]
    Np = (n_med // 128 + 1) * 128      # lane-dense classifier width, strictly > n_med
    assert Np > n_med

    def bd(*ms):                       # block-diagonal of square (E,E) matrices
        k = len(ms)
        rows = []
        for i, m in enumerate(ms):
            row = [m if j == i else jnp.zeros((m.shape[0], ms[j].shape[1]), f32)
                   for j in range(k)]
            rows.append(jnp.concatenate(row, axis=1))
        return jnp.concatenate(rows, axis=0)

    b = {}
    b["emb_diag"] = params["emb_diag"]
    b["emb_proc"] = params["emb_proc"]
    b["emb_med"] = params["emb_med"]

    # ---- 3 GRUs fused: per-gate block-diag, gates concatenated on columns ----
    wih_g, whh_g, bih_g, bhh_g = [], [], [], []
    for g in range(3):                 # gate order r, z, n
        sl = slice(g * E, (g + 1) * E)
        wih_g.append(bd(params["gru_diag_wih"][:, sl],
                        params["gru_proc_wih"][:, sl],
                        params["gru_med_wih"][:, sl]))
        whh_g.append(bd(params["gru_diag_whh"][:, sl],
                        params["gru_proc_whh"][:, sl],
                        params["gru_med_whh"][:, sl]))
        bih_g.append(jnp.concatenate([params["gru_diag_bih"][sl],
                                      params["gru_proc_bih"][sl],
                                      params["gru_med_bih"][sl]]))
        bhh_g.append(jnp.concatenate([params["gru_diag_bhh"][sl],
                                      params["gru_proc_bhh"][sl],
                                      params["gru_med_bhh"][sl]]))
    b["gru_wih"] = jnp.concatenate(wih_g, axis=1)                        # (3E, 9E)
    b["gru_whh"] = jnp.concatenate(whh_g, axis=1)                        # (3E, 9E)
    b["gru_b"] = jnp.stack([jnp.concatenate(bih_g), jnp.concatenate(bhh_g)])  # (2, 9E)

    # ---- query heads: [h,h] input folded, both heads block-diag fused ----
    qdw = params["qdia_w"][:E] + params["qdia_w"][E:2 * E]
    qpw = params["qpro_w"][:E] + params["qpro_w"][E:2 * E]
    b["q_w"] = bd(qdw, qpw)                                              # (2E, 2E)
    q_b = jnp.concatenate([params["qdia_b"], params["qpro_b"]])          # (2E,)

    # ---- hetero graph surrogate: med projections for both branches fused ----
    b["hg_wsrc_dia"] = params["hg_dia_wsrc"]
    b["hg_wsrc_pro"] = params["hg_pro_wsrc"]
    b["hg_wmed"] = jnp.concatenate([params["hg_dia_wmed"], params["hg_pro_wmed"]], axis=1)
    hg_bmed = jnp.concatenate([params["hg_dia_bmed"], params["hg_pro_bmed"]])

    # ---- drug attention: Q projections block-diag fused, scale folded; K|V fused ----
    inv_scale = 1.0 / math.sqrt(131.0)   # reference hard-codes sqrt(FloatTensor([131]))
    b["att_wq"] = bd(params["att_dia_wq"], params["att_pro_wq"]) * inv_scale
    att_bq = jnp.concatenate([params["att_dia_bq"], params["att_pro_bq"]]) * inv_scale
    b["att_wkv_dia"] = jnp.concatenate([params["att_dia_wk"], params["att_dia_wv"]], axis=1)
    b["att_wkv_pro"] = jnp.concatenate([params["att_pro_wk"], params["att_pro_wv"]], axis=1)
    bkv_dia = jnp.concatenate([params["att_dia_bk"], params["att_dia_bv"]])
    bkv_pro = jnp.concatenate([params["att_pro_bk"], params["att_pro_bv"]])

    # ---- packed bias / gamma slabs (fewer operand DMAs) ----
    b["rows_e"] = jnp.stack([params["hg_dia_bsrc"], params["hg_pro_bsrc"],
                             params["ln_dia_g"], params["ln_dia_b"],
                             params["ln_pro_g"], params["ln_pro_b"]])    # (6, E)
    b["rows_2e"] = jnp.stack([q_b, hg_bmed, att_bq, bkv_dia, bkv_pro])   # (5, 2E)

    # ---- classifier / review / DDI padded to lane-dense width Np ----
    pad = Np - n_med
    b["cls_w"] = jnp.pad(params["cls_w"], ((0, 0), (0, pad)))
    b["cls_b"] = jnp.pad(params["cls_b"], (0, pad)).reshape(1, Np)
    b["ddi_pad"] = jnp.pad(ddi_adj, ((0, pad), (0, pad)))
    b["eff_diag_pad"] = jnp.pad(diag_med_effect, ((0, 0), (0, pad)))
    b["eff_proc_pad"] = jnp.pad(proc_med_effect, ((0, 0), (0, pad)))

    b["adj_dia_t"] = diag_adj.T
    b["adj_pro_t"] = proc_adj.T

    b["poly_w1"] = params["poly_w1"]
    b["poly_b1"] = params["poly_b1"].reshape(1, -1)
    b["poly_w2"] = params["poly_w2"]

    # [low_diag, low_proc, high_diag, high_proc, minus_w, plus_w, poly_b2, pad]
    b["scalars"] = jnp.concatenate([
        limits.reshape(-1).astype(f32),
        jnp.stack([params["c1_minus_weight"], params["c1_plus_weight"]]).astype(f32),
        params["poly_b2"].reshape(-1).astype(f32),
        jnp.zeros((1,), f32)])
    return b, n_med, Np


# --------------------------------------------------------------------------
# Forward wrapper (host-side data prep only; no mid-forward device_get)
# --------------------------------------------------------------------------
def chgrec_forward(bundle, n_med, Np, patient_data):
    T = len(patient_data)

    # med history: previous admission's meds; zeros for the first admission and
    # for ANY admission content-equal to the first (reference quirk).
    med_lists = []
    for adm_id, adm in enumerate(patient_data):
        if adm == patient_data[0]:
            med_lists.append([])
        else:
            med_lists.append(list(patient_data[adm_id - 1][2]))

    Ld = max(1, max(len(a[0]) for a in patient_data))
    Lp = max(1, max(len(a[1]) for a in patient_data))
    Lm = max(1, max(len(m) for m in med_lists))

    def pad_idx(lists, L):
        idx = np.zeros((T, L), np.int32)
        msk = np.zeros((T, L), np.float32)
        for i, lst in enumerate(lists):
            idx[i, :len(lst)] = lst
            msk[i, :len(lst)] = 1.0
        return jnp.asarray(idx), jnp.asarray(msk)

    diag_idx, diag_msk = pad_idx([a[0] for a in patient_data], Ld)
    proc_idx, proc_msk = pad_idx([a[1] for a in patient_data], Lp)
    med_idx, med_msk = pad_idx(med_lists, Lm)

    # static processing order [last, 0..T-2, last]; selection of the middle
    # steps happens on-device via the poly keep-mask (last visit always kept).
    if T >= 2:
        perm = np.array([T - 1] + list(range(T - 1)) + [T - 1], np.int32)
    else:
        perm = np.arange(T, dtype=np.int32)
    perm = jnp.asarray(perm)

    last_diag = jnp.asarray(patient_data[-1][0], jnp.int32)
    last_proc = jnp.asarray(patient_data[-1][1], jnp.int32)

    packed = _device_forward(bundle, diag_idx, diag_msk, proc_idx, proc_msk,
                             med_idx, med_msk, perm, last_diag, last_proc)
    score = packed[:, :n_med]
    batch_neg = packed[0, Np - 1]
    return score, batch_neg


# --------------------------------------------------------------------------
if __name__ == "__main__":
    emb_dim = 32
    voc_size = (16, 12, 24, 10)   # (diag, proc, med, mole) — 4th embedding unused in forward
    n_diag, n_proc, n_med = voc_size[:3]

    key = jax.random.PRNGKey(0)
    k_param, k_dadj, k_padj, k_ddi, k_eff_d, k_eff_p = jax.random.split(key, 6)

    params = init_params(k_param, emb_dim, voc_size)

    # synthetic relevance / DDI adjacencies
    diag_adj = (jax.random.uniform(k_dadj, (n_diag, n_med)) < 0.3).astype(jnp.float32)
    proc_adj = (jax.random.uniform(k_padj, (n_proc, n_med)) < 0.3).astype(jnp.float32)
    ddi_raw = (jax.random.uniform(k_ddi, (n_med, n_med)) < 0.2).astype(jnp.float32)
    ddi_adj = jnp.maximum(ddi_raw, ddi_raw.T) * (1.0 - jnp.eye(n_med, dtype=jnp.float32))

    # synthetic causal-effect tables (stand-in for casual_graph.get_effect)
    diag_med_effect = jax.random.uniform(k_eff_d, (n_diag, n_med), jnp.float32)
    proc_med_effect = jax.random.uniform(k_eff_p, (n_proc, n_med), jnp.float32)
    limits = jnp.stack([
        jnp.quantile(diag_med_effect, 0.9),   # c1_low_limit[0]
        jnp.quantile(proc_med_effect, 0.9),   # c1_low_limit[1]
        jnp.quantile(diag_med_effect, 0.97),  # c1_high_limit[0]
        jnp.quantile(proc_med_effect, 0.97),  # c1_high_limit[1]
    ]).astype(jnp.float32)

    bundle, n_med_b, Np = prepare_bundle(params, emb_dim, diag_adj, proc_adj, ddi_adj,
                                         diag_med_effect, proc_med_effect, limits)

    # patient_data: list of admissions, each [diag_ids, proc_ids, med_ids]
    patient_data = [
        [[0, 3, 5], [1, 2], [0, 4, 7]],
        [[2, 6, 9], [0, 3, 5], [1, 5, 9, 11]],
        [[1, 4, 8], [2, 5], [3, 6]],
    ]

    score, batch_neg = chgrec_forward(bundle, n_med_b, Np, patient_data)
    jax.block_until_ready((score, batch_neg))
    assert score.shape == (1, n_med)
    print("KERNEL_OK")
</pallas_src>

<mosaic_0001>
module attributes {stable_mosaic.version = 11 : i64} {
  func.func @kernel(%arg0: memref<4x96xf32, #tpu.memory_space<vmem>>, %arg1: memref<64x32xf32, #tpu.memory_space<vmem>>, %arg2: memref<1x32xf32, #tpu.memory_space<vmem>>, %arg3: memref<32x1xf32, #tpu.memory_space<vmem>>, %arg4: memref<96x288xf32, #tpu.memory_space<vmem>>, %arg5: memref<96x288xf32, #tpu.memory_space<vmem>>, %arg6: memref<2x288xf32, #tpu.memory_space<vmem>>, %arg7: memref<64x64xf32, #tpu.memory_space<vmem>>, %arg8: memref<16x32xf32, #tpu.memory_space<vmem>>, %arg9: memref<12x32xf32, #tpu.memory_space<vmem>>, %arg10: memref<24x32xf32, #tpu.memory_space<vmem>>, %arg11: memref<24x16xf32, #tpu.memory_space<vmem>>, %arg12: memref<24x12xf32, #tpu.memory_space<vmem>>, %arg13: memref<32x32xf32, #tpu.memory_space<vmem>>, %arg14: memref<32x32xf32, #tpu.memory_space<vmem>>, %arg15: memref<32x64xf32, #tpu.memory_space<vmem>>, %arg16: memref<64x64xf32, #tpu.memory_space<vmem>>, %arg17: memref<32x64xf32, #tpu.memory_space<vmem>>, %arg18: memref<32x64xf32, #tpu.memory_space<vmem>>, %arg19: memref<6x32xf32, #tpu.memory_space<vmem>>, %arg20: memref<5x64xf32, #tpu.memory_space<vmem>>, %arg21: memref<192x128xf32, #tpu.memory_space<vmem>>, %arg22: memref<1x128xf32, #tpu.memory_space<vmem>>, %arg23: memref<2x128xf32, #tpu.memory_space<vmem>>, %arg24: memref<128x128xf32, #tpu.memory_space<vmem>>, %arg25: memref<8xf32, #tpu.memory_space<smem>>, %arg26: memref<1x128xf32, #tpu.memory_space<vmem>>) attributes {dimension_semantics = [], scalar_prefetch = 0 : i64, scratch_operands = 0 : i64, tpu.core_type = #tpu.core_type<tc>} {
    %c0 = arith.constant 0 : index
    %c0_0 = arith.constant 0 : index
    %0 = vector.load %arg0[%c0, %c0_0] : memref<4x96xf32, #tpu.memory_space<vmem>>, vector<4x96xf32>
    %1 = vector.extract_strided_slice %0 {offsets = [0, 0], sizes = [4, 64], strides = [1, 1]} : vector<4x96xf32> to vector<4x64xf32>
    %c0_1 = arith.constant 0 : index
    %c0_2 = arith.constant 0 : index
    %2 = vector.load %arg1[%c0_1, %c0_2] : memref<64x32xf32, #tpu.memory_space<vmem>>, vector<64x32xf32>
    %cst = arith.constant dense<0.000000e+00> : vector<4x32xf32>
    %3 = tpu.matmul %1, %2, %cst {dimension_numbers = #tpu.dot_dimension_numbers<[1], [0], [0], [1], [0, 0, 1, 1], [], []>} : vector<4x64xf32>, vector<64x32xf32>, vector<4x32xf32> -> vector<4x32xf32>
    %c0_3 = arith.constant 0 : index
    %c0_4 = arith.constant 0 : index
    %4 = vector.load %arg2[%c0_3, %c0_4] : memref<1x32xf32, #tpu.memory_space<vmem>>, vector<1x32xf32>
    %5 = vector.broadcast %4 : vector<1x32xf32> to vector<4x32xf32>
    %6 = arith.addf %3, %5 : vector<4x32xf32>
    %cst_5 = arith.constant 0.000000e+00 : f32
    %7 = vector.broadcast %cst_5 : f32 to vector<4x32xf32>
    %8 = arith.maximumf %6, %7 : vector<4x32xf32>
    %c0_6 = arith.constant 0 : index
    %c0_7 = arith.constant 0 : index
    %9 = vector.load %arg3[%c0_6, %c0_7] : memref<32x1xf32, #tpu.memory_space<vmem>>, vector<32x1xf32>
    %cst_8 = arith.constant dense<0.000000e+00> : vector<4x1xf32>
    %10 = tpu.matmul %8, %9, %cst_8 {dimension_numbers = #tpu.dot_dimension_numbers<[1], [0], [0], [1], [0, 0, 1, 1], [], []>} : vector<4x32xf32>, vector<32x1xf32>, vector<4x1xf32> -> vector<4x1xf32>
    %c6 = arith.constant 6 : index
    %11 = memref.load %arg25[%c6] : memref<8xf32, #tpu.memory_space<smem>>
    %12 = vector.broadcast %11 : f32 to vector<4x1xf32>
    %13 = arith.addf %10, %12 : vector<4x1xf32>
    %14 = arith.negf %13 : vector<4x1xf32>
    %15 = math.exp %14 : vector<4x1xf32>
    %cst_9 = arith.constant 1.000000e+00 : f32
    %16 = vector.broadcast %cst_9 : f32 to vector<4x1xf32>
    %17 = arith.addf %16, %15 : vector<4x1xf32>
    %18 = arith.divf %16, %17 : vector<4x1xf32>
    %19 = vector.extract_strided_slice %18 {offsets = [0, 0], sizes = [1, 1], strides = [1, 1]} : vector<4x1xf32> to vector<1x1xf32>
    %20 = vector.broadcast %19 : vector<1x1xf32> to vector<4x1xf32>
    %21 = arith.subf %20, %18 : vector<4x1xf32>
    %22 = math.absf %21 : vector<4x1xf32>
    %cst_10 = arith.constant 5.000000e-02 : f32
    %23 = vector.broadcast %cst_10 : f32 to vector<4x1xf32>
    %24 = arith.cmpf ole, %22, %23 : vector<4x1xf32>
    %25 = arith.extui %24 : vector<4x1xi1> to vector<4x1xi32>
    %26 = arith.sitofp %25 : vector<4x1xi32> to vector<4x1xf32>
    %c0_11 = arith.constant 0 : index
    %c0_12 = arith.constant 0 : index
    %27 = vector.load %arg4[%c0_11, %c0_12] : memref<96x288xf32, #tpu.memory_space<vmem>>, vector<96x288xf32>
    %cst_13 = arith.constant dense<0.000000e+00> : vector<4x288xf32>
    %28 = tpu.matmul %0, %27, %cst_13 {dimension_numbers = #tpu.dot_dimension_numbers<[1], [0], [0], [1], [0, 0, 1, 1], [], []>} : vector<4x96xf32>, vector<96x288xf32>, vector<4x288xf32> -> vector<4x288xf32>
    %c0_14 = arith.constant 0 : index
    %c0_15 = arith.constant 0 : index
    %29 = vector.load %arg6[%c0_14, %c0_15] : memref<2x288xf32, #tpu.memory_space<vmem>>, vector<1x288xf32>
    %30 = vector.broadcast %29 : vector<1x288xf32> to vector<4x288xf32>
    %31 = arith.addf %28, %30 : vector<4x288xf32>
    %c1 = arith.constant 1 : index
    %c0_16 = arith.constant 0 : index
    %32 = vector.load %arg6[%c1, %c0_16] : memref<2x288xf32, #tpu.memory_space<vmem>>, vector<1x288xf32>
    %c0_17 = arith.constant 0 : index
    %c0_18 = arith.constant 0 : index
    %33 = vector.load %arg5[%c0_17, %c0_18] : memref<96x288xf32, #tpu.memory_space<vmem>>, vector<96x288xf32>
    %cst_19 = arith.constant 0.000000e+00 : f32
    %34 = vector.broadcast %cst_19 : f32 to vector<1x96xf32>
    %cst_20 = arith.constant dense<0.000000e+00> : vector<1x288xf32>
    %35 = tpu.matmul %34, %33, %cst_20 {dimension_numbers = #tpu.dot_dimension_numbers<[1], [0], [0], [1], [0, 0, 1, 1], [], []>} : vector<1x96xf32>, vector<96x288xf32>, vector<1x288xf32> -> vector<1x288xf32>
    %36 = arith.addf %35, %32 : vector<1x288xf32>
    %37 = vector.extract_strided_slice %31 {offsets = [0, 0], sizes = [1, 288], strides = [1, 1]} : vector<4x288xf32> to vector<1x288xf32>
    %38 = vector.extract_strided_slice %37 {offsets = [0, 0], sizes = [1, 96], strides = [1, 1]} : vector<1x288xf32> to vector<1x96xf32>
    %39 = vector.extract_strided_slice %36 {offsets = [0, 0], sizes = [1, 96], strides = [1, 1]} : vector<1x288xf32> to vector<1x96xf32>
    %40 = arith.addf %38, %39 : vector<1x96xf32>
    %41 = arith.negf %40 : vector<1x96xf32>
    %42 = math.exp %41 : vector<1x96xf32>
    %cst_21 = arith.constant 1.000000e+00 : f32
    %43 = vector.broadcast %cst_21 : f32 to vector<1x96xf32>
    %44 = arith.addf %43, %42 : vector<1x96xf32>
    %45 = arith.divf %43, %44 : vector<1x96xf32>
    %46 = vector.extract_strided_slice %37 {offsets = [0, 96], sizes = [1, 96], strides = [1, 1]} : vector<1x288xf32> to vector<1x96xf32>
    %47 = vector.extract_strided_slice %36 {offsets = [0, 96], sizes = [1, 96], strides = [1, 1]} : vector<1x288xf32> to vector<1x96xf32>
    %48 = arith.addf %46, %47 : vector<1x96xf32>
    %49 = arith.negf %48 : vector<1x96xf32>
    %50 = math.exp %49 : vector<1x96xf32>
    %cst_22 = arith.constant 1.000000e+00 : f32
    %51 = vector.broadcast %cst_22 : f32 to vector<1x96xf32>
    %52 = arith.addf %51, %50 : vector<1x96xf32>
    %53 = arith.divf %51, %52 : vector<1x96xf32>
    %54 = vector.extract_strided_slice %37 {offsets = [0, 192], sizes = [1, 96], strides = [1, 1]} : vector<1x288xf32> to vector<1x96xf32>
    %55 = vector.extract_strided_slice %36 {offsets = [0, 192], sizes = [1, 96], strides = [1, 1]} : vector<1x288xf32> to vector<1x96xf32>
    %56 = arith.mulf %45, %55 : vector<1x96xf32>
    %57 = arith.addf %54, %56 : vector<1x96xf32>
    %58 = math.tanh %57 : vector<1x96xf32>
    %cst_23 = arith.constant 1.000000e+00 : f32
    %59 = vector.broadcast %cst_23 : f32 to vector<1x96xf32>
    %60 = arith.subf %59, %53 : vector<1x96xf32>
    %61 = arith.mulf %60, %58 : vector<1x96xf32>
    %62 = arith.mulf %53, %34 : vector<1x96xf32>
    %63 = arith.addf %61, %62 : vector<1x96xf32>
    %64 = vector.extract_strided_slice %26 {offsets = [0, 0], sizes = [1, 1], strides = [1, 1]} : vector<4x1xf32> to vector<1x1xf32>
    %65 = vector.broadcast %64 : vector<1x1xf32> to vector<1x96xf32>
    %66 = arith.mulf %65, %63 : vector<1x96xf32>
    %cst_24 = arith.constant 1.000000e+00 : f32
    %67 = vector.broadcast %cst_24 : f32 to vector<1x1xf32>
    %68 = arith.subf %67, %64 : vector<1x1xf32>
    %69 = vector.broadcast %68 : vector<1x1xf32> to vector<1x96xf32>
    %70 = arith.mulf %69, %34 : vector<1x96xf32>
    %71 = arith.addf %66, %70 : vector<1x96xf32>
    %cst_25 = arith.constant dense<0.000000e+00> : vector<1x288xf32>
    %72 = tpu.matmul %71, %33, %cst_25 {dimension_numbers = #tpu.dot_dimension_numbers<[1], [0], [0], [1], [0, 0, 1, 1], [], []>} : vector<1x96xf32>, vector<96x288xf32>, vector<1x288xf32> -> vector<1x288xf32>
    %73 = arith.addf %72, %32 : vector<1x288xf32>
    %74 = vector.extract_strided_slice %31 {offsets = [1, 0], sizes = [1, 288], strides = [1, 1]} : vector<4x288xf32> to vector<1x288xf32>
    %75 = vector.extract_strided_slice %74 {offsets = [0, 0], sizes = [1, 96], strides = [1, 1]} : vector<1x288xf32> to vector<1x96xf32>
    %76 = vector.extract_strided_slice %73 {offsets = [0, 0], sizes = [1, 96], strides = [1, 1]} : vector<1x288xf32> to vector<1x96xf32>
    %77 = arith.addf %75, %76 : vector<1x96xf32>
    %78 = arith.negf %77 : vector<1x96xf32>
    %79 = math.exp %78 : vector<1x96xf32>
    %cst_26 = arith.constant 1.000000e+00 : f32
    %80 = vector.broadcast %cst_26 : f32 to vector<1x96xf32>
    %81 = arith.addf %80, %79 : vector<1x96xf32>
    %82 = arith.divf %80, %81 : vector<1x96xf32>
    %83 = vector.extract_strided_slice %74 {offsets = [0, 96], sizes = [1, 96], strides = [1, 1]} : vector<1x288xf32> to vector<1x96xf32>
    %84 = vector.extract_strided_slice %73 {offsets = [0, 96], sizes = [1, 96], strides = [1, 1]} : vector<1x288xf32> to vector<1x96xf32>
    %85 = arith.addf %83, %84 : vector<1x96xf32>
    %86 = arith.negf %85 : vector<1x96xf32>
    %87 = math.exp %86 : vector<1x96xf32>
    %cst_27 = arith.constant 1.000000e+00 : f32
    %88 = vector.broadcast %cst_27 : f32 to vector<1x96xf32>
    %89 = arith.addf %88, %87 : vector<1x96xf32>
    %90 = arith.divf %88, %89 : vector<1x96xf32>
    %91 = vector.extract_strided_slice %74 {offsets = [0, 192], sizes = [1, 96], strides = [1, 1]} : vector<1x288xf32> to vector<1x96xf32>
    %92 = vector.extract_strided_slice %73 {offsets = [0, 192], sizes = [1, 96], strides = [1, 1]} : vector<1x288xf32> to vector<1x96xf32>
    %93 = arith.mulf %82, %92 : vector<1x96xf32>
    %94 = arith.addf %91, %93 : vector<1x96xf32>
    %95 = math.tanh %94 : vector<1x96xf32>
    %cst_28 = arith.constant 1.000000e+00 : f32
    %96 = vector.broadcast %cst_28 : f32 to vector<1x96xf32>
    %97 = arith.subf %96, %90 : vector<1x96xf32>
    %98 = arith.mulf %97, %95 : vector<1x96xf32>
    %99 = arith.mulf %90, %71 : vector<1x96xf32>
    %100 = arith.addf %98, %99 : vector<1x96xf32>
    %101 = vector.extract_strided_slice %26 {offsets = [1, 0], sizes = [1, 1], strides = [1, 1]} : vector<4x1xf32> to vector<1x1xf32>
    %102 = vector.broadcast %101 : vector<1x1xf32> to vector<1x96xf32>
    %103 = arith.mulf %102, %100 : vector<1x96xf32>
    %cst_29 = arith.constant 1.000000e+00 : f32
    %104 = vector.broadcast %cst_29 : f32 to vector<1x1xf32>
    %105 = arith.subf %104, %101 : vector<1x1xf32>
    %106 = vector.broadcast %105 : vector<1x1xf32> to vector<1x96xf32>
    %107 = arith.mulf %106, %71 : vector<1x96xf32>
    %108 = arith.addf %103, %107 : vector<1x96xf32>
    %cst_30 = arith.constant dense<0.000000e+00> : vector<1x288xf32>
    %109 = tpu.matmul %108, %33, %cst_30 {dimension_numbers = #tpu.dot_dimension_numbers<[1], [0], [0], [1], [0, 0, 1, 1], [], []>} : vector<1x96xf32>, vector<96x288xf32>, vector<1x288xf32> -> vector<1x288xf32>
    %110 = arith.addf %109, %32 : vector<1x288xf32>
    %111 = vector.extract_strided_slice %31 {offsets = [2, 0], sizes = [1, 288], strides = [1, 1]} : vector<4x288xf32> to vector<1x288xf32>
    %112 = vector.extract_strided_slice %111 {offsets = [0, 0], sizes = [1, 96], strides = [1, 1]} : vector<1x288xf32> to vector<1x96xf32>
    %113 = vector.extract_strided_slice %110 {offsets = [0, 0], sizes = [1, 96], strides = [1, 1]} : vector<1x288xf32> to vector<1x96xf32>
    %114 = arith.addf %112, %113 : vector<1x96xf32>
    %115 = arith.negf %114 : vector<1x96xf32>
    %116 = math.exp %115 : vector<1x96xf32>
    %cst_31 = arith.constant 1.000000e+00 : f32
    %117 = vector.broadcast %cst_31 : f32 to vector<1x96xf32>
    %118 = arith.addf %117, %116 : vector<1x96xf32>
    %119 = arith.divf %117, %118 : vector<1x96xf32>
    %120 = vector.extract_strided_slice %111 {offsets = [0, 96], sizes = [1, 96], strides = [1, 1]} : vector<1x288xf32> to vector<1x96xf32>
    %121 = vector.extract_strided_slice %110 {offsets = [0, 96], sizes = [1, 96], strides = [1, 1]} : vector<1x288xf32> to vector<1x96xf32>
    %122 = arith.addf %120, %121 : vector<1x96xf32>
    %123 = arith.negf %122 : vector<1x96xf32>
    %124 = math.exp %123 : vector<1x96xf32>
    %cst_32 = arith.constant 1.000000e+00 : f32
    %125 = vector.broadcast %cst_32 : f32 to vector<1x96xf32>
    %126 = arith.addf %125, %124 : vector<1x96xf32>
    %127 = arith.divf %125, %126 : vector<1x96xf32>
    %128 = vector.extract_strided_slice %111 {offsets = [0, 192], sizes = [1, 96], strides = [1, 1]} : vector<1x288xf32> to vector<1x96xf32>
    %129 = vector.extract_strided_slice %110 {offsets = [0, 192], sizes = [1, 96], strides = [1, 1]} : vector<1x288xf32> to vector<1x96xf32>
    %130 = arith.mulf %119, %129 : vector<1x96xf32>
    %131 = arith.addf %128, %130 : vector<1x96xf32>
    %132 = math.tanh %131 : vector<1x96xf32>
    %cst_33 = arith.constant 1.000000e+00 : f32
    %133 = vector.broadcast %cst_33 : f32 to vector<1x96xf32>
    %134 = arith.subf %133, %127 : vector<1x96xf32>
    %135 = arith.mulf %134, %132 : vector<1x96xf32>
    %136 = arith.mulf %127, %108 : vector<1x96xf32>
    %137 = arith.addf %135, %136 : vector<1x96xf32>
    %138 = vector.extract_strided_slice %26 {offsets = [2, 0], sizes = [1, 1], strides = [1, 1]} : vector<4x1xf32> to vector<1x1xf32>
    %139 = vector.broadcast %138 : vector<1x1xf32> to vector<1x96xf32>
    %140 = arith.mulf %139, %137 : vector<1x96xf32>
    %cst_34 = arith.constant 1.000000e+00 : f32
    %141 = vector.broadcast %cst_34 : f32 to vector<1x1xf32>
    %142 = arith.subf %141, %138 : vector<1x1xf32>
    %143 = vector.broadcast %142 : vector<1x1xf32> to vector<1x96xf32>
    %144 = arith.mulf %143, %108 : vector<1x96xf32>
    %145 = arith.addf %140, %144 : vector<1x96xf32>
    %cst_35 = arith.constant dense<0.000000e+00> : vector<1x288xf32>
    %146 = tpu.matmul %145, %33, %cst_35 {dimension_numbers = #tpu.dot_dimension_numbers<[1], [0], [0], [1], [0, 0, 1, 1], [], []>} : vector<1x96xf32>, vector<96x288xf32>, vector<1x288xf32> -> vector<1x288xf32>
    %147 = arith.addf %146, %32 : vector<1x288xf32>
    %148 = vector.extract_strided_slice %31 {offsets = [3, 0], sizes = [1, 288], strides = [1, 1]} : vector<4x288xf32> to vector<1x288xf32>
    %149 = vector.extract_strided_slice %148 {offsets = [0, 0], sizes = [1, 96], strides = [1, 1]} : vector<1x288xf32> to vector<1x96xf32>
    %150 = vector.extract_strided_slice %147 {offsets = [0, 0], sizes = [1, 96], strides = [1, 1]} : vector<1x288xf32> to vector<1x96xf32>
    %151 = arith.addf %149, %150 : vector<1x96xf32>
    %152 = arith.negf %151 : vector<1x96xf32>
    %153 = math.exp %152 : vector<1x96xf32>
    %cst_36 = arith.constant 1.000000e+00 : f32
    %154 = vector.broadcast %cst_36 : f32 to vector<1x96xf32>
    %155 = arith.addf %154, %153 : vector<1x96xf32>
    %156 = arith.divf %154, %155 : vector<1x96xf32>
    %157 = vector.extract_strided_slice %148 {offsets = [0, 96], sizes = [1, 96], strides = [1, 1]} : vector<1x288xf32> to vector<1x96xf32>
    %158 = vector.extract_strided_slice %147 {offsets = [0, 96], sizes = [1, 96], strides = [1, 1]} : vector<1x288xf32> to vector<1x96xf32>
    %159 = arith.addf %157, %158 : vector<1x96xf32>
    %160 = arith.negf %159 : vector<1x96xf32>
    %161 = math.exp %160 : vector<1x96xf32>
    %cst_37 = arith.constant 1.000000e+00 : f32
    %162 = vector.broadcast %cst_37 : f32 to vector<1x96xf32>
    %163 = arith.addf %162, %161 : vector<1x96xf32>
    %164 = arith.divf %162, %163 : vector<1x96xf32>
    %165 = vector.extract_strided_slice %148 {offsets = [0, 192], sizes = [1, 96], strides = [1, 1]} : vector<1x288xf32> to vector<1x96xf32>
    %166 = vector.extract_strided_slice %147 {offsets = [0, 192], sizes = [1, 96], strides = [1, 1]} : vector<1x288xf32> to vector<1x96xf32>
    %167 = arith.mulf %156, %166 : vector<1x96xf32>
    %168 = arith.addf %165, %167 : vector<1x96xf32>
    %169 = math.tanh %168 : vector<1x96xf32>
    %cst_38 = arith.constant 1.000000e+00 : f32
    %170 = vector.broadcast %cst_38 : f32 to vector<1x96xf32>
    %171 = arith.subf %170, %164 : vector<1x96xf32>
    %172 = arith.mulf %171, %169 : vector<1x96xf32>
    %173 = arith.mulf %164, %145 : vector<1x96xf32>
    %174 = arith.addf %172, %173 : vector<1x96xf32>
    %175 = vector.extract_strided_slice %26 {offsets = [3, 0], sizes = [1, 1], strides = [1, 1]} : vector<4x1xf32> to vector<1x1xf32>
    %176 = vector.broadcast %175 : vector<1x1xf32> to vector<1x96xf32>
    %177 = arith.mulf %176, %174 : vector<1x96xf32>
    %cst_39 = arith.constant 1.000000e+00 : f32
    %178 = vector.broadcast %cst_39 : f32 to vector<1x1xf32>
    %179 = arith.subf %178, %175 : vector<1x1xf32>
    %180 = vector.broadcast %179 : vector<1x1xf32> to vector<1x96xf32>
    %181 = arith.mulf %180, %145 : vector<1x96xf32>
    %182 = arith.addf %177, %181 : vector<1x96xf32>
    %183 = vector.extract_strided_slice %182 {offsets = [0, 64], sizes = [1, 32], strides = [1, 1]} : vector<1x96xf32> to vector<1x32xf32>
    %184 = vector.extract_strided_slice %182 {offsets = [0, 0], sizes = [1, 64], strides = [1, 1]} : vector<1x96xf32> to vector<1x64xf32>
    %cst_40 = arith.constant 0.000000e+00 : f32
    %185 = vector.broadcast %cst_40 : f32 to vector<1x64xf32>
    %186 = arith.maximumf %184, %185 : vector<1x64xf32>
    %c0_41 = arith.constant 0 : index
    %c0_42 = arith.constant 0 : index
    %187 = vector.load %arg7[%c0_41, %c0_42] : memref<64x64xf32, #tpu.memory_space<vmem>>, vector<64x64xf32>
    %cst_43 = arith.constant dense<0.000000e+00> : vector<1x64xf32>
    %188 = tpu.matmul %186, %187, %cst_43 {dimension_numbers = #tpu.dot_dimension_numbers<[1], [0], [0], [1], [0, 0, 1, 1], [], []>} : vector<1x64xf32>, vector<64x64xf32>, vector<1x64xf32> -> vector<1x64xf32>
    %c0_44 = arith.constant 0 : index
    %c0_45 = arith.constant 0 : index
    %189 = vector.load %arg20[%c0_44, %c0_45] : memref<5x64xf32, #tpu.memory_space<vmem>>, vector<1x64xf32>
    %190 = arith.addf %188, %189 : vector<1x64xf32>
    %191 = vector.extract_strided_slice %190 {offsets = [0, 0], sizes = [1, 32], strides = [1, 1]} : vector<1x64xf32> to vector<1x32xf32>
    %192 = vector.extract_strided_slice %190 {offsets = [0, 32], sizes = [1, 32], strides = [1, 1]} : vector<1x64xf32> to vector<1x32xf32>
    %c0_46 = arith.constant 0 : index
    %c0_47 = arith.constant 0 : index
    %193 = vector.load %arg10[%c0_46, %c0_47] : memref<24x32xf32, #tpu.memory_space<vmem>>, vector<24x32xf32>
    %c0_48 = arith.constant 0 : index
    %c0_49 = arith.constant 0 : index
    %194 = vector.load %arg15[%c0_48, %c0_49] : memref<32x64xf32, #tpu.memory_space<vmem>>, vector<32x64xf32>
    %cst_50 = arith.constant dense<0.000000e+00> : vector<24x64xf32>
    %195 = tpu.matmul %193, %194, %cst_50 {dimension_numbers = #tpu.dot_dimension_numbers<[1], [0], [0], [1], [0, 0, 1, 1], [], []>} : vector<24x32xf32>, vector<32x64xf32>, vector<24x64xf32> -> vector<24x64xf32>
    %c1_51 = arith.constant 1 : index
    %c0_52 = arith.constant 0 : index
    %196 = vector.load %arg20[%c1_51, %c0_52] : memref<5x64xf32, #tpu.memory_space<vmem>>, vector<1x64xf32>
    %197 = vector.broadcast %196 : vector<1x64xf32> to vector<24x64xf32>
    %198 = arith.addf %195, %197 : vector<24x64xf32>
    %c0_53 = arith.constant 0 : index
    %c0_54 = arith.constant 0 : index
    %199 = vector.load %arg8[%c0_53, %c0_54] : memref<16x32xf32, #tpu.memory_space<vmem>>, vector<16x32xf32>
    %c0_55 = arith.constant 0 : index
    %c0_56 = arith.constant 0 : index
    %200 = vector.load %arg11[%c0_55, %c0_56] : memref<24x16xf32, #tpu.memory_space<vmem>>, vector<24x16xf32>
    %c0_57 = arith.constant 0 : index
    %c0_58 = arith.constant 0 : index
    %201 = vector.load %arg13[%c0_57, %c0_58] : memref<32x32xf32, #tpu.memory_space<vmem>>, vector<32x32xf32>
    %c0_59 = arith.constant 0 : index
    %c0_60 = arith.constant 0 : index
    %202 = vector.load %arg19[%c0_59, %c0_60] : memref<6x32xf32, #tpu.memory_space<vmem>>, vector<1x32xf32>
    %203 = vector.extract_strided_slice %198 {offsets = [0, 0], sizes = [24, 32], strides = [1, 1]} : vector<24x64xf32> to vector<24x32xf32>
    %cst_61 = arith.constant dense<0.000000e+00> : vector<16x32xf32>
    %204 = tpu.matmul %199, %201, %cst_61 {dimension_numbers = #tpu.dot_dimension_numbers<[1], [0], [0], [1], [0, 0, 1, 1], [], []>} : vector<16x32xf32>, vector<32x32xf32>, vector<16x32xf32> -> vector<16x32xf32>
    %205 = vector.broadcast %202 : vector<1x32xf32> to vector<16x32xf32>
    %206 = arith.addf %204, %205 : vector<16x32xf32>
    %cst_62 = arith.constant dense<0.000000e+00> : vector<24xf32>
    %207 = vector.multi_reduction <add>, %200, %cst_62 [1] : vector<24x16xf32> to vector<24xf32>
    %208 = vector.shape_cast %207 : vector<24xf32> to vector<24x1xf32>
    %cst_63 = arith.constant 9.99999993E-9 : f32
    %209 = vector.broadcast %cst_63 : f32 to vector<24x1xf32>
    %210 = arith.addf %208, %209 : vector<24x1xf32>
    %cst_64 = arith.constant dense<0.000000e+00> : vector<24x32xf32>
    %211 = tpu.matmul %200, %206, %cst_64 {dimension_numbers = #tpu.dot_dimension_numbers<[1], [0], [0], [1], [0, 0, 1, 1], [], []>} : vector<24x16xf32>, vector<16x32xf32>, vector<24x32xf32> -> vector<24x32xf32>
    %212 = vector.broadcast %210 : vector<24x1xf32> to vector<24x32xf32>
    %213 = arith.divf %211, %212 : vector<24x32xf32>
    %214 = arith.addf %213, %203 : vector<24x32xf32>
    %cst_65 = arith.constant 0.000000e+00 : f32
    %215 = vector.broadcast %cst_65 : f32 to vector<24x32xf32>
    %216 = arith.maximumf %214, %215 : vector<24x32xf32>
    %c0_66 = arith.constant 0 : index
    %c0_67 = arith.constant 0 : index
    %217 = vector.load %arg9[%c0_66, %c0_67] : memref<12x32xf32, #tpu.memory_space<vmem>>, vector<12x32xf32>
    %c0_68 = arith.constant 0 : index
    %c0_69 = arith.constant 0 : index
    %218 = vector.load %arg12[%c0_68, %c0_69] : memref<24x12xf32, #tpu.memory_space<vmem>>, vector<24x12xf32>
    %c0_70 = arith.constant 0 : index
    %c0_71 = arith.constant 0 : index
    %219 = vector.load %arg14[%c0_70, %c0_71] : memref<32x32xf32, #tpu.memory_space<vmem>>, vector<32x32xf32>
    %c1_72 = arith.constant 1 : index
    %c0_73 = arith.constant 0 : index
    %220 = vector.load %arg19[%c1_72, %c0_73] : memref<6x32xf32, #tpu.memory_space<vmem>>, vector<1x32xf32>
    %221 = vector.extract_strided_slice %198 {offsets = [0, 32], sizes = [24, 32], strides = [1, 1]} : vector<24x64xf32> to vector<24x32xf32>
    %cst_74 = arith.constant dense<0.000000e+00> : vector<12x32xf32>
    %222 = tpu.matmul %217, %219, %cst_74 {dimension_numbers = #tpu.dot_dimension_numbers<[1], [0], [0], [1], [0, 0, 1, 1], [], []>} : vector<12x32xf32>, vector<32x32xf32>, vector<12x32xf32> -> vector<12x32xf32>
    %223 = vector.broadcast %220 : vector<1x32xf32> to vector<12x32xf32>
    %224 = arith.addf %222, %223 : vector<12x32xf32>
    %cst_75 = arith.constant dense<0.000000e+00> : vector<24xf32>
    %225 = vector.multi_reduction <add>, %218, %cst_75 [1] : vector<24x12xf32> to vector<24xf32>
    %226 = vector.shape_cast %225 : vector<24xf32> to vector<24x1xf32>
    %cst_76 = arith.constant 9.99999993E-9 : f32
    %227 = vector.broadcast %cst_76 : f32 to vector<24x1xf32>
    %228 = arith.addf %226, %227 : vector<24x1xf32>
    %cst_77 = arith.constant dense<0.000000e+00> : vector<24x32xf32>
    %229 = tpu.matmul %218, %224, %cst_77 {dimension_numbers = #tpu.dot_dimension_numbers<[1], [0], [0], [1], [0, 0, 1, 1], [], []>} : vector<24x12xf32>, vector<12x32xf32>, vector<24x32xf32> -> vector<24x32xf32>
    %230 = vector.broadcast %228 : vector<24x1xf32> to vector<24x32xf32>
    %231 = arith.divf %229, %230 : vector<24x32xf32>
    %232 = arith.addf %231, %221 : vector<24x32xf32>
    %cst_78 = arith.constant 0.000000e+00 : f32
    %233 = vector.broadcast %cst_78 : f32 to vector<24x32xf32>
    %234 = arith.maximumf %232, %233 : vector<24x32xf32>
    %c0_79 = arith.constant 0 : index
    %c0_80 = arith.constant 0 : index
    %235 = vector.load %arg16[%c0_79, %c0_80] : memref<64x64xf32, #tpu.memory_space<vmem>>, vector<64x64xf32>
    %cst_81 = arith.constant dense<0.000000e+00> : vector<1x64xf32>
    %236 = tpu.matmul %190, %235, %cst_81 {dimension_numbers = #tpu.dot_dimension_numbers<[1], [0], [0], [1], [0, 0, 1, 1], [], []>} : vector<1x64xf32>, vector<64x64xf32>, vector<1x64xf32> -> vector<1x64xf32>
    %c2 = arith.constant 2 : index
    %c0_82 = arith.constant 0 : index
    %237 = vector.load %arg20[%c2, %c0_82] : memref<5x64xf32, #tpu.memory_space<vmem>>, vector<1x64xf32>
    %238 = arith.addf %236, %237 : vector<1x64xf32>
    %239 = vector.extract_strided_slice %238 {offsets = [0, 0], sizes = [1, 32], strides = [1, 1]} : vector<1x64xf32> to vector<1x32xf32>
    %c0_83 = arith.constant 0 : index
    %c0_84 = arith.constant 0 : index
    %240 = vector.load %arg17[%c0_83, %c0_84] : memref<32x64xf32, #tpu.memory_space<vmem>>, vector<32x64xf32>
    %c3 = arith.constant 3 : index
    %c0_85 = arith.constant 0 : index
    %241 = vector.load %arg20[%c3, %c0_85] : memref<5x64xf32, #tpu.memory_space<vmem>>, vector<1x64xf32>
    %cst_86 = arith.constant dense<0.000000e+00> : vector<24x64xf32>
    %242 = tpu.matmul %216, %240, %cst_86 {dimension_numbers = #tpu.dot_dimension_numbers<[1], [0], [0], [1], [0, 0, 1, 1], [], []>} : vector<24x32xf32>, vector<32x64xf32>, vector<24x64xf32> -> vector<24x64xf32>
    %243 = vector.broadcast %241 : vector<1x64xf32> to vector<24x64xf32>
    %244 = arith.addf %242, %243 : vector<24x64xf32>
    %245 = vector.extract_strided_slice %244 {offsets = [0, 0], sizes = [24, 32], strides = [1, 1]} : vector<24x64xf32> to vector<24x32xf32>
    %cst_87 = arith.constant dense<0.000000e+00> : vector<1x24xf32>
    %246 = tpu.matmul %239, %245, %cst_87 {dimension_numbers = #tpu.dot_dimension_numbers<[1], [1], [0], [0], [0, 0, 1, 0], [], []>} : vector<1x32xf32>, vector<24x32xf32>, vector<1x24xf32> -> vector<1x24xf32>
    %cst_88 = arith.constant dense<0xFF800000> : vector<1xf32>
    %247 = vector.multi_reduction <maximumf>, %246, %cst_88 [1] : vector<1x24xf32> to vector<1xf32>
    %cst_89 = arith.constant 0xFF800000 : f32
    %248 = vector.broadcast %cst_89 : f32 to vector<1xf32>
    %249 = arith.maximumf %248, %247 : vector<1xf32>
    %250 = vector.shape_cast %249 : vector<1xf32> to vector<1x1xf32>
    %251 = vector.broadcast %250 : vector<1x1xf32> to vector<1x24xf32>
    %252 = arith.subf %246, %251 : vector<1x24xf32>
    %253 = math.exp %252 : vector<1x24xf32>
    %cst_90 = arith.constant dense<0.000000e+00> : vector<1xf32>
    %254 = vector.multi_reduction <add>, %253, %cst_90 [1] : vector<1x24xf32> to vector<1xf32>
    %255 = vector.shape_cast %254 : vector<1xf32> to vector<1x1xf32>
    %256 = vector.broadcast %255 : vector<1x1xf32> to vector<1x24xf32>
    %257 = arith.divf %253, %256 : vector<1x24xf32>
    %258 = vector.extract_strided_slice %244 {offsets = [0, 32], sizes = [24, 32], strides = [1, 1]} : vector<24x64xf32> to vector<24x32xf32>
    %cst_91 = arith.constant dense<0.000000e+00> : vector<1x32xf32>
    %259 = tpu.matmul %257, %258, %cst_91 {dimension_numbers = #tpu.dot_dimension_numbers<[1], [0], [0], [1], [0, 0, 1, 1], [], []>} : vector<1x24xf32>, vector<24x32xf32>, vector<1x32xf32> -> vector<1x32xf32>
    %260 = vector.extract_strided_slice %238 {offsets = [0, 32], sizes = [1, 32], strides = [1, 1]} : vector<1x64xf32> to vector<1x32xf32>
    %c0_92 = arith.constant 0 : index
    %c0_93 = arith.constant 0 : index
    %261 = vector.load %arg18[%c0_92, %c0_93] : memref<32x64xf32, #tpu.memory_space<vmem>>, vector<32x64xf32>
    %c4 = arith.constant 4 : index
    %c0_94 = arith.constant 0 : index
    %262 = vector.load %arg20[%c4, %c0_94] : memref<5x64xf32, #tpu.memory_space<vmem>>, vector<1x64xf32>
    %cst_95 = arith.constant dense<0.000000e+00> : vector<24x64xf32>
    %263 = tpu.matmul %234, %261, %cst_95 {dimension_numbers = #tpu.dot_dimension_numbers<[1], [0], [0], [1], [0, 0, 1, 1], [], []>} : vector<24x32xf32>, vector<32x64xf32>, vector<24x64xf32> -> vector<24x64xf32>
    %264 = vector.broadcast %262 : vector<1x64xf32> to vector<24x64xf32>
    %265 = arith.addf %263, %264 : vector<24x64xf32>
    %266 = vector.extract_strided_slice %265 {offsets = [0, 0], sizes = [24, 32], strides = [1, 1]} : vector<24x64xf32> to vector<24x32xf32>
    %cst_96 = arith.constant dense<0.000000e+00> : vector<1x24xf32>
    %267 = tpu.matmul %260, %266, %cst_96 {dimension_numbers = #tpu.dot_dimension_numbers<[1], [1], [0], [0], [0, 0, 1, 0], [], []>} : vector<1x32xf32>, vector<24x32xf32>, vector<1x24xf32> -> vector<1x24xf32>
    %cst_97 = arith.constant dense<0xFF800000> : vector<1xf32>
    %268 = vector.multi_reduction <maximumf>, %267, %cst_97 [1] : vector<1x24xf32> to vector<1xf32>
    %cst_98 = arith.constant 0xFF800000 : f32
    %269 = vector.broadcast %cst_98 : f32 to vector<1xf32>
    %270 = arith.maximumf %269, %268 : vector<1xf32>
    %271 = vector.shape_cast %270 : vector<1xf32> to vector<1x1xf32>
    %272 = vector.broadcast %271 : vector<1x1xf32> to vector<1x24xf32>
    %273 = arith.subf %267, %272 : vector<1x24xf32>
    %274 = math.exp %273 : vector<1x24xf32>
    %cst_99 = arith.constant dense<0.000000e+00> : vector<1xf32>
    %275 = vector.multi_reduction <add>, %274, %cst_99 [1] : vector<1x24xf32> to vector<1xf32>
    %276 = vector.shape_cast %275 : vector<1xf32> to vector<1x1xf32>
    %277 = vector.broadcast %276 : vector<1x1xf32> to vector<1x24xf32>
    %278 = arith.divf %274, %277 : vector<1x24xf32>
    %279 = vector.extract_strided_slice %265 {offsets = [0, 32], sizes = [24, 32], strides = [1, 1]} : vector<24x64xf32> to vector<24x32xf32>
    %cst_100 = arith.constant dense<0.000000e+00> : vector<1x32xf32>
    %280 = tpu.matmul %278, %279, %cst_100 {dimension_numbers = #tpu.dot_dimension_numbers<[1], [0], [0], [1], [0, 0, 1, 1], [], []>} : vector<1x24xf32>, vector<24x32xf32>, vector<1x32xf32> -> vector<1x32xf32>
    %c2_101 = arith.constant 2 : index
    %c0_102 = arith.constant 0 : index
    %281 = vector.load %arg19[%c2_101, %c0_102] : memref<6x32xf32, #tpu.memory_space<vmem>>, vector<1x32xf32>
    %c3_103 = arith.constant 3 : index
    %c0_104 = arith.constant 0 : index
    %282 = vector.load %arg19[%c3_103, %c0_104] : memref<6x32xf32, #tpu.memory_space<vmem>>, vector<1x32xf32>
    %cst_105 = arith.constant dense<0.000000e+00> : vector<1xf32>
    %283 = vector.multi_reduction <add>, %191, %cst_105 [1] : vector<1x32xf32> to vector<1xf32>
    %284 = vector.shape_cast %283 : vector<1xf32> to vector<1x1xf32>
    %cst_106 = arith.constant 3.200000e+01 : f32
    %285 = vector.broadcast %cst_106 : f32 to vector<1x1xf32>
    %286 = arith.divf %284, %285 : vector<1x1xf32>
    %287 = vector.broadcast %286 : vector<1x1xf32> to vector<1x32xf32>
    %288 = arith.subf %191, %287 : vector<1x32xf32>
    %289 = arith.mulf %288, %288 : vector<1x32xf32>
    %cst_107 = arith.constant dense<0.000000e+00> : vector<1xf32>
    %290 = vector.multi_reduction <add>, %289, %cst_107 [1] : vector<1x32xf32> to vector<1xf32>
    %291 = vector.shape_cast %290 : vector<1xf32> to vector<1x1xf32>
    %cst_108 = arith.constant 3.200000e+01 : f32
    %292 = vector.broadcast %cst_108 : f32 to vector<1x1xf32>
    %293 = arith.divf %291, %292 : vector<1x1xf32>
    %294 = vector.broadcast %286 : vector<1x1xf32> to vector<1x32xf32>
    %295 = arith.subf %191, %294 : vector<1x32xf32>
    %cst_109 = arith.constant 9.99999974E-6 : f32
    %296 = vector.broadcast %cst_109 : f32 to vector<1x1xf32>
    %297 = arith.addf %293, %296 : vector<1x1xf32>
    %298 = math.rsqrt %297 : vector<1x1xf32>
    %299 = vector.broadcast %298 : vector<1x1xf32> to vector<1x32xf32>
    %300 = arith.mulf %295, %299 : vector<1x32xf32>
    %301 = arith.mulf %300, %281 : vector<1x32xf32>
    %302 = arith.addf %301, %282 : vector<1x32xf32>
    %c4_110 = arith.constant 4 : index
    %c0_111 = arith.constant 0 : index
    %303 = vector.load %arg19[%c4_110, %c0_111] : memref<6x32xf32, #tpu.memory_space<vmem>>, vector<1x32xf32>
    %c5 = arith.constant 5 : index
    %c0_112 = arith.constant 0 : index
    %304 = vector.load %arg19[%c5, %c0_112] : memref<6x32xf32, #tpu.memory_space<vmem>>, vector<1x32xf32>
    %cst_113 = arith.constant dense<0.000000e+00> : vector<1xf32>
    %305 = vector.multi_reduction <add>, %192, %cst_113 [1] : vector<1x32xf32> to vector<1xf32>
    %306 = vector.shape_cast %305 : vector<1xf32> to vector<1x1xf32>
    %cst_114 = arith.constant 3.200000e+01 : f32
    %307 = vector.broadcast %cst_114 : f32 to vector<1x1xf32>
    %308 = arith.divf %306, %307 : vector<1x1xf32>
    %309 = vector.broadcast %308 : vector<1x1xf32> to vector<1x32xf32>
    %310 = arith.subf %192, %309 : vector<1x32xf32>
    %311 = arith.mulf %310, %310 : vector<1x32xf32>
    %cst_115 = arith.constant dense<0.000000e+00> : vector<1xf32>
    %312 = vector.multi_reduction <add>, %311, %cst_115 [1] : vector<1x32xf32> to vector<1xf32>
    %313 = vector.shape_cast %312 : vector<1xf32> to vector<1x1xf32>
    %cst_116 = arith.constant 3.200000e+01 : f32
    %314 = vector.broadcast %cst_116 : f32 to vector<1x1xf32>
    %315 = arith.divf %313, %314 : vector<1x1xf32>
    %316 = vector.broadcast %308 : vector<1x1xf32> to vector<1x32xf32>
    %317 = arith.subf %192, %316 : vector<1x32xf32>
    %cst_117 = arith.constant 9.99999974E-6 : f32
    %318 = vector.broadcast %cst_117 : f32 to vector<1x1xf32>
    %319 = arith.addf %315, %318 : vector<1x1xf32>
    %320 = math.rsqrt %319 : vector<1x1xf32>
    %321 = vector.broadcast %320 : vector<1x1xf32> to vector<1x32xf32>
    %322 = arith.mulf %317, %321 : vector<1x32xf32>
    %323 = arith.mulf %322, %303 : vector<1x32xf32>
    %324 = arith.addf %323, %304 : vector<1x32xf32>
    %325 = tpu.concatenate %302, %259, %324, %280, %183, %183 in 1 : vector<1x32xf32>, vector<1x32xf32>, vector<1x32xf32>, vector<1x32xf32>, vector<1x32xf32>, vector<1x32xf32> -> vector<1x192xf32>
    %cst_118 = arith.constant 0.000000e+00 : f32
    %326 = vector.broadcast %cst_118 : f32 to vector<1x192xf32>
    %327 = arith.maximumf %325, %326 : vector<1x192xf32>
    %c0_119 = arith.constant 0 : index
    %c0_120 = arith.constant 0 : index
    %328 = vector.load %arg21[%c0_119, %c0_120] : memref<192x128xf32, #tpu.memory_space<vmem>>, vector<192x128xf32>
    %cst_121 = arith.constant dense<0.000000e+00> : vector<1x128xf32>
    %329 = tpu.matmul %327, %328, %cst_121 {dimension_numbers = #tpu.dot_dimension_numbers<[1], [0], [0], [1], [0, 0, 1, 1], [], []>} : vector<1x192xf32>, vector<192x128xf32>, vector<1x128xf32> -> vector<1x128xf32>
    %c0_122 = arith.constant 0 : index
    %c0_123 = arith.constant 0 : index
    %330 = vector.load %arg22[%c0_122, %c0_123] : memref<1x128xf32, #tpu.memory_space<vmem>>, vector<1x128xf32>
    %331 = arith.addf %329, %330 : vector<1x128xf32>
    %c0_124 = arith.constant 0 : index
    %c0_125 = arith.constant 0 : index
    %332 = vector.load %arg23[%c0_124, %c0_125] : memref<2x128xf32, #tpu.memory_space<vmem>>, vector<1x128xf32>
    %c1_126 = arith.constant 1 : index
    %c0_127 = arith.constant 0 : index
    %333 = vector.load %arg23[%c1_126, %c0_127] : memref<2x128xf32, #tpu.memory_space<vmem>>, vector<1x128xf32>
    %c0_128 = arith.constant 0 : index
    %334 = memref.load %arg25[%c0_128] : memref<8xf32, #tpu.memory_space<smem>>
    %335 = vector.broadcast %334 : f32 to vector<1x128xf32>
    %336 = arith.cmpf olt, %332, %335 : vector<1x128xf32>
    %c1_129 = arith.constant 1 : index
    %337 = memref.load %arg25[%c1_129] : memref<8xf32, #tpu.memory_space<smem>>
    %338 = vector.broadcast %337 : f32 to vector<1x128xf32>
    %339 = arith.cmpf olt, %333, %338 : vector<1x128xf32>
    %340 = arith.andi %336, %339 : vector<1x128xi1>
    %cst_130 = arith.constant dense<true> : vector<1x128xi1>
    %341 = arith.xori %340, %cst_130 : vector<1x128xi1>
    %c2_131 = arith.constant 2 : index
    %342 = memref.load %arg25[%c2_131] : memref<8xf32, #tpu.memory_space<smem>>
    %343 = vector.broadcast %342 : f32 to vector<1x128xf32>
    %344 = arith.cmpf ogt, %332, %343 : vector<1x128xf32>
    %c3_132 = arith.constant 3 : index
    %345 = memref.load %arg25[%c3_132] : memref<8xf32, #tpu.memory_space<smem>>
    %346 = vector.broadcast %345 : f32 to vector<1x128xf32>
    %347 = arith.cmpf ogt, %333, %346 : vector<1x128xf32>
    %348 = arith.ori %344, %347 : vector<1x128xi1>
    %349 = arith.andi %341, %348 : vector<1x128xi1>
    %c4_133 = arith.constant 4 : index
    %350 = memref.load %arg25[%c4_133] : memref<8xf32, #tpu.memory_space<smem>>
    %351 = arith.extui %340 : vector<1x128xi1> to vector<1x128xi32>
    %352 = arith.sitofp %351 : vector<1x128xi32> to vector<1x128xf32>
    %353 = vector.broadcast %350 : f32 to vector<1x128xf32>
    %354 = arith.mulf %353, %352 : vector<1x128xf32>
    %355 = arith.subf %331, %354 : vector<1x128xf32>
    %c5_134 = arith.constant 5 : index
    %356 = memref.load %arg25[%c5_134] : memref<8xf32, #tpu.memory_space<smem>>
    %357 = arith.extui %349 : vector<1x128xi1> to vector<1x128xi32>
    %358 = arith.sitofp %357 : vector<1x128xi32> to vector<1x128xf32>
    %359 = vector.broadcast %356 : f32 to vector<1x128xf32>
    %360 = arith.mulf %359, %358 : vector<1x128xf32>
    %361 = arith.addf %355, %360 : vector<1x128xf32>
    %362 = arith.negf %361 : vector<1x128xf32>
    %363 = math.exp %362 : vector<1x128xf32>
    %cst_135 = arith.constant 1.000000e+00 : f32
    %364 = vector.broadcast %cst_135 : f32 to vector<1x128xf32>
    %365 = arith.addf %364, %363 : vector<1x128xf32>
    %366 = arith.divf %364, %365 : vector<1x128xf32>
    %c0_136 = arith.constant 0 : index
    %c0_137 = arith.constant 0 : index
    %367 = vector.load %arg24[%c0_136, %c0_137] : memref<128x128xf32, #tpu.memory_space<vmem>>, vector<128x128xf32>
    %cst_138 = arith.constant dense<0.000000e+00> : vector<1x128xf32>
    %368 = tpu.matmul %366, %367, %cst_138 {dimension_numbers = #tpu.dot_dimension_numbers<[1], [0], [0], [1], [0, 0, 1, 1], [], []>} : vector<1x128xf32>, vector<128x128xf32>, vector<1x128xf32> -> vector<1x128xf32>
    %369 = arith.mulf %368, %366 : vector<1x128xf32>
    %370 = vector.shape_cast %369 : vector<1x128xf32> to vector<1x1x128xf32>
    %cst_139 = arith.constant dense<0.000000e+00> : vector<1xf32>
    %371 = vector.multi_reduction <add>, %370, %cst_139 [1, 2] : vector<1x1x128xf32> to vector<1xf32>
    %372 = vector.shape_cast %371 : vector<1xf32> to vector<1x1x1xf32>
    %373 = vector.extract %372[0, 0, 0] : f32 from vector<1x1x1xf32>
    %374 = vector.broadcast %373 : f32 to vector<1x1xf32>
    %cst_140 = arith.constant 5.000000e-04 : f32
    %375 = vector.broadcast %cst_140 : f32 to vector<1x1xf32>
    %376 = arith.mulf %375, %374 : vector<1x1xf32>
    %377 = tpu.iota {dimensions = array<i32: 1>} : vector<1x128xi32>
    %c127_i32 = arith.constant 127 : i32
    %378 = vector.broadcast %c127_i32 : i32 to vector<1x128xi32>
    %379 = arith.cmpi eq, %377, %378 : vector<1x128xi32>
    %380 = vector.shape_cast %376 : vector<1x1xf32> to vector<1x1xf32>
    %381 = vector.broadcast %380 : vector<1x1xf32> to vector<1x128xf32>
    %382 = arith.select %379, %381, %361 : vector<1x128xi1>, vector<1x128xf32>
    %c0_141 = arith.constant 0 : index
    %c0_142 = arith.constant 0 : index
    %383 = vector.load %arg26[%c0_141, %c0_142] : memref<1x128xf32, #tpu.memory_space<vmem>>, vector<1x128xf32>
    tpu.vector_store %arg26[%c0_141, %c0_142], %382 {strides = array<i32>} : memref<1x128xf32, #tpu.memory_space<vmem>>, vector<1x128xf32>,
    return
  }
}

</mosaic_0001>

<bundles_post_ra>
// kernel: _device_forward.1
= control target key start
LH: loop header
LB: loop body
LE: loop exit
PB: predicated region body
PF: predicated region fallthrough
CT: control target
= control target key end

     0   :  { %s5136_s0 = inlined_call_operand.vmem [shape: f32[4,96], index: 0, kind: input, shape index: {}]   ;;  %s5137_s1 = inlined_call_operand.vmem [shape: f32[64,32], index: 1, kind: input, shape index: {}]   ;;  %s5138_s2 = inlined_call_operand.vmem [shape: f32[1,32], index: 2, kind: input, shape index: {}]   ;;  %s5139_s3 = inlined_call_operand.vmem [shape: f32[32,1], index: 3, kind: input, shape index: {}]   ;;  %s5140_s4 = inlined_call_operand.vmem [shape: f32[96,288], index: 4, kind: input, shape index: {}]   ;;  %s5141_s5 = inlined_call_operand.hbm [shape: f32[96,288], index: 5, kind: input, shape index: {}]   ;;  %s5142_s6 = inlined_call_operand.vmem [shape: f32[2,288], index: 6, kind: input, shape index: {}]   ;;  %s5143_s7 = inlined_call_operand.vmem [shape: f32[64,64], index: 7, kind: input, shape index: {}]   ;;  %s5144_s8 = inlined_call_operand.vmem [shape: f32[16,32], index: 8, kind: input, shape index: {}]   ;;  %s5145_s9 = inlined_call_operand.vmem [shape: f32[12,32], index: 9, kind: input, shape index: {}]   ;;  %s5146_s10 = inlined_call_operand.vmem [shape: f32[24,32], index: 10, kind: input, shape index: {}]   ;;  %s5147_s11 = inlined_call_operand.vmem [shape: f32[24,16], index: 11, kind: input, shape index: {}]   ;;  %s5148_s12 = inlined_call_operand.vmem [shape: f32[24,12], index: 12, kind: input, shape index: {}]   ;;  %s5149_s13 = inlined_call_operand.vmem [shape: f32[32,32], index: 13, kind: input, shape index: {}]   ;;  %s5150_s14 = inlined_call_operand.vmem [shape: f32[32,32], index: 14, kind: input, shape index: {}]   ;;  %s5151_s15 = inlined_call_operand.vmem [shape: f32[32,64], index: 15, kind: input, shape index: {}]   ;;  %s5152_s16 = inlined_call_operand.vmem [shape: f32[64,64], index: 16, kind: input, shape index: {}]   ;;  %s5153_s17 = inlined_call_operand.vmem [shape: f32[32,64], index: 17, kind: input, shape index: {}]   ;;  %s5154_s18 = inlined_call_operand.vmem [shape: f32[32,64], index: 18, kind: input, shape index: {}]   ;;  %s5155_s19 = inlined_call_operand.vmem [shape: f32[6,32], index: 19, kind: input, shape index: {}]   ;;  %s5156_s20 = inlined_call_operand.vmem [shape: f32[5,64], index: 20, kind: input, shape index: {}]   ;;  %s5157_s21 = inlined_call_operand.hbm [shape: f32[192,128], index: 21, kind: input, shape index: {}]   ;;  %s5158_s22 = inlined_call_operand.vmem [shape: f32[1,128], index: 22, kind: input, shape index: {}]   ;;  %s5159_s23 = inlined_call_operand.vmem [shape: f32[2,128], index: 23, kind: input, shape index: {}]   ;;  %s5160_s24 = inlined_call_operand.vmem [shape: f32[128,128], index: 24, kind: input, shape index: {}]   ;;  %s5161_s25 = inlined_call_operand.vmem [shape: f32[8], index: 25, kind: input, shape index: {}]   ;;  %s5162_s26 = inlined_call_operand.hbm [shape: f32[1,128], index: 26, kind: output, shape index: {}]  }
   0x1   :  { %5174 = sst [smem:[#allocation14_spill]] %s5136_s0 }
   0x2   :  { %5175 = sst [smem:[#allocation15_spill]] %s5137_s1 }
   0x3   :  { %5176 = sst [smem:[#allocation16_spill]] %s5138_s2 }
   0x4   :  { %5177 = sst [smem:[#allocation17_spill]] %s5139_s3 }
   0x5   :  { %5178 = sst [smem:[#allocation18_spill]] %s5140_s4 }
   0x6   :  { %5179 = sst [smem:[#allocation19_spill]] %s5141_s5 }
   0x7   :  { %5180 = sst [smem:[#allocation20_spill]] %s5142_s6 }
   0x8   :  { %5181 = sst [smem:[#allocation21_spill]] %s5143_s7 }
   0x9   :  { %5182 = sst [smem:[#allocation22_spill]] %s5144_s8 }
   0xa   :  { %5183 = sst [smem:[#allocation23_spill]] %s5145_s9 }
   0xb   :  { %5184 = sst [smem:[#allocation24_spill]] %s5146_s10 }
   0xc   :  { %31 = vsyncpa [#allocation3], 0 }
   0xd   :  { %32 = vsyncpa [#allocation7], 0 }
   0xe   :  { %33 = vsyncpa [#allocation5], 0 }
   0xf   :  { %34 = vsyncpa [#allocation4], 0  ;;  %s3831_s27 = smov [#allocation2]  }
  0x10   :  { %s50_s3 = sshll.u32 %s3831_s27, 4  ;;  %s51_s3 = int_to_ptr.vmem [resolvable:$true] %s50_s3 }
  0x11   :  { %s3759_s7 = scalar_lea.vmem %s51_s3, 4608  ;;  %p3764_p1 = scmp.lt.s32.totalorder %s51_s3, %s51_s3 }
  0x12   :  { %p3760_p0 = scmp.ne.s32.totalorder %s51_s3, %s3759_s7  ;;  %p3765_p2 = scmp.lt.s32.totalorder %s3759_s7, %s3759_s7 }
  0x14   :  { %p3766_p3 = por %p3765_p2, %p3764_p1 }
  0x16   :  { %p3767_p4 = pnand %p3766_p3, %p3760_p0 }
  0x18   :  { %3770 = shalt.err (!%p3767_p4)
}
  0x19   :  { %s3832_s28 = smov 384   ;;  %s3833_s8 = smov 24  }
  0x1a   :  { %s5185_s0 = sld [smem:[#allocation19_spill]]  ;;  %s3834_s9 = smov [#allocation6]  }
  0x1b   :  { %s92_s30 = sshll.u32 %s3834_s9, 4  ;;  %s93_s30 = int_to_ptr.vmem [resolvable:$true] %s92_s30 }
  0x1c   :  { %s3779_s2 = scalar_lea.vmem %s93_s30, 3072  ;;  %p3784_p6 = scmp.lt.s32.totalorder %s93_s30, %s93_s30 }
  0x1d   :  { %p3780_p5 = scmp.ne.s32.totalorder %s93_s30, %s3779_s2  ;;  %p3785_p7 = scmp.lt.s32.totalorder %s3779_s2, %s3779_s2 }
  0x1f   :  { %p3786_p8 = por %p3785_p7, %p3784_p6 }
  0x20   :  { %56 = dma.hbm_to_vmem [thread:$0]  %s5185_s0, 4608, %s51_s3, [#allocation3], %s3832_s28, %s3832_s28, %s3833_s8  }
  0x21   :  { %p3787_p9 = pnand %p3786_p8, %p3780_p5 }
  0x23   :  { %3790 = shalt.err (!%p3787_p9)
}
  0x24   :  { %s3835_s5 = smov 128   ;;  %s3836_s10 = smov 8  }
  0x25   :  { %98 = dma.hbm_to_vmem [thread:$0]  %s5157_s21, 3072, %s93_s30, [#allocation7], %s3835_s5, %s3835_s5, %s3836_s10  }
  0x26   :  { %s111_s3 = sshll.u32 %s5161_s25, 4  ;;  %s112_s3 = int_to_ptr.vmem [resolvable:$true] %s111_s3 }
  0x27   :  { %s3791_s28 = scalar_lea.vmem %s112_s3, 16  ;;  %p3796_p11 = scmp.lt.s32.totalorder %s112_s3, %s112_s3 }
  0x28   :  { %p3792_p10 = scmp.ne.s32.totalorder %s112_s3, %s3791_s28  ;;  %p3797_p12 = scmp.lt.s32.totalorder %s3791_s28, %s3791_s28 }
  0x2a   :  { %p3798_p13 = por %p3797_p12, %p3796_p11 }
  0x2c   :  { %p3799_p0 = pnand %p3798_p13, %p3792_p10 }
  0x2e   :  { %3802 = shalt.err (!%p3799_p0)
}
  0x2f   :  { %s3837_s8 = smov [#allocation8]  }
  0x30   :  { %114 = dma.vmem_to_smem %s112_s3, 16, %s3837_s8, [#allocation5]  }
  0x31   :  { %3823 = dma.done.wait [#allocation3], 4608  }
  0x32   :  { %3824 = vsyncadd [#allocation3], 4294962688 }
  0x33   :  { %3825 = dma.done.wait [#allocation7], 3072  }
  0x34   :  { %3826 = vsyncadd [#allocation7], 4294964224 }
  0x35   :  { %3827 = dma.done.wait [#allocation5], 16  }
  0x36   :  { %3828 = vsyncadd [#allocation5], 4294967280 }
  0x37   :  { %124 = sfence }
  0x38   :  { %s5186_s25 = sld [smem:[#allocation15_spill]]  ;;  %v5172_v1 = vmov 0.0   ;;  %vm3839_vm0 = vmmov 0   ;;  %vm141_vm1 = vcmask 523264   ;;  %vm364_vm2 = vcmask 785408   ;;  %v4105_v27 = vld [vmem:[#allocation2 + $0x118] sm:$0xff] }
  0x39   :  { %3274 = vmatprep.subr.mxu0 %v5172_v1  ;;  %3290 = vmatprep.mubr.msk.f32.mxu0 %vm3839_vm0, %v5172_v1  ;;  %s5187_s10 = sld [smem:[#allocation17_spill]]  ;;  %v4111_v28 = vld [vmem:[#allocation2 + $0x100] sm:$0xff]  ;;  %v4115_v29 = vld [vmem:[#allocation2 + $0xe8] sm:$0xff]  ;;  %v4119_v30 = vld [vmem:[#allocation2 + $0xd0] sm:$0xff]  ;;  %vm222_vm3 = vcmask 261120   ;;  %s3840_s27 = smov 64  }
  0x3a   :  { %3293 = vmatprep.subr.mxu1 %v5172_v1  ;;  %3301 = vmatprep.mubr.msk.f32.mxu1 %vm3839_vm0, %v5172_v1  ;;  %s5188_s5 = sld [smem:[#allocation14_spill]]  ;;  %v4123_v31 = vld [vmem:[#allocation2 + $0xb8] sm:$0xff]  ;;  %v4127_v32 = vld [vmem:[#allocation2 + $0xa0] sm:$0xff]  ;;  %v4131_v33 = vld [vmem:[#allocation2 + $0x88] sm:$0xff]  ;;  %s3842_s3 = smov 32   ;;  %vm1731_vm5 = vcmask 130048  }
  0x3b   :  { %s5189_s28 = sld [smem:[#allocation18_spill]]  ;;  %v4135_v34 = vld [vmem:[#allocation2 + $0x70] sm:$0xff]  ;;  %v4139_v35 = vld [vmem:[#allocation2 + $0x58] sm:$0xff]  ;;  %v4143_v36 = vld [vmem:[#allocation2 + $0x40] sm:$0xff]  ;;  %s3843_s8 = smov 96   ;;  %vm1940_vm6 = vcmask 97280  }
  0x3c   :  { %v4147_v37 = vld [vmem:[#allocation2 + $0x28] sm:$0xff]  ;;  %v4149_v38 = vld [vmem:[#allocation2 + $0x10] sm:$0xff]  ;;  %s5190_s6 = sld [smem:[#allocation16_spill]]  ;;  %vm1962_vm7 = vcmask 1043456   ;;  %vm2332_vm8 = vcmask 188416   ;;  %vm2353_vm9 = vcmask 195584  }
  0x3d   :  { %s3034_s7 = sld [smem:[#allocation8 + $0x6]]  ;;  %vm2703_vm10 = vcmask 253952   ;;  %s3845_s4 = smov [#allocation9]  }
  0x3e   :  { %v133_v0 = vld [vmem:[%s5186_s25 + $0x38] sm:$0xff]  ;;  %v132_v2 = vld [vmem:[%s5186_s25 + $0x30] sm:$0xff]  ;;  %v131_v3 = vld [vmem:[%s5186_s25 + $0x28] sm:$0xff]  ;;  %s5195_s9 = sld [smem:[#allocation21_spill]]  ;;  %s3021_s29 = sshll.u32 %s3845_s4, 4  ;;  %s3022_s29 = int_to_ptr.vmem [resolvable:$true] %s3021_s29 }
  0x3f   :  { %3275 = vmatpush3.msra.mxu0 %v133_v0  ;;  %v219_v4 = vld [vmem:[%s5187_s10 + $0x18] sm:$0xff]  ;;  %v218_v5 = vld [vmem:[%s5187_s10 + $0x10] sm:$0xff]  ;;  %v130_v6 = vld [vmem:[%s5186_s25 + $0x20] sm:$0xff]  ;;  %s5196_s2 = sld [smem:[#allocation23_spill]]  ;;  %p3808_p2 = scmp.lt.s32.totalorder %s3022_s29, %s3022_s29 }
  0x40   :  { %3276 = vmatprep.subr.mxu0 %v5172_v1  ;;  %3294 = vmatpush3.msra.mxu1 %v219_v4  ;;  %v129_v7 = vld [vmem:[%s5186_s25 + $0x18] sm:$0xff]  ;;  %v128_v8 = vld [vmem:[%s5186_s25 + $0x10] sm:$0xff]  ;;  %v127_v9 = vld [vmem:[%s5186_s25 + $0x8] sm:$0xff]  ;;  %s3093_s1 = sld [smem:[#allocation8 + $0x1]] }
  0x41   :  { %3277 = vmatpush3.msra.mxu0 %v132_v2  ;;  %3295 = vmatprep.subr.mxu1 %v5172_v1  ;;  %v126_v10 = vld [vmem:[%s5186_s25] sm:$0xff]  ;;  %v217_v12 = vld [vmem:[%s5187_s10 + $0x8] sm:$0xff]  ;;  %v345_v14 = vld [vmem:[%s5189_s28 + $0x110] sm:$0xff]  ;;  %s5194_s25 = sld [smem:[#allocation22_spill]] }
  0x42   :  { %3278 = vmatprep.subr.mxu0 %v5172_v1  ;;  %3296 = vmatpush3.msra.mxu1 %v218_v5  ;;  %v4037_v11 = vld [vmem:[%s5188_s5] sm:$0xf]  ;;  %v346_v15 = vld [vmem:[%s5189_s28 + $0x118] sm:$0xff]  ;;  %v340_v17 = vld [vmem:[%s5189_s28 + $0xe8] sm:$0xff] }
  0x43   :  { %3279 = vmatpush3.msra.mxu0 %v131_v3  ;;  %3297 = vmatprep.subr.mxu1 %v5172_v1  ;;  %v216_v13 = vld [vmem:[%s5187_s10] sm:$0xff]  ;;  %v337_v18 = vld [vmem:[%s5189_s28 + $0xd0] sm:$0xff]  ;;  %v334_v19 = vld [vmem:[%s5189_s28 + $0xb8] sm:$0xff] }
  0x44   :  { %3280 = vmatprep.subr.mxu0 %v5172_v1  ;;  %3298 = vmatpush3.msra.mxu1 %v217_v12  ;;  %v343_v16 = vld [vmem:[%s5189_s28 + $0x100] sm:$0xff]  ;;  %v328_v21 = vld [vmem:[%s5189_s28 + $0x88] sm:$0xff]  ;;  %v325_v22 = vld [vmem:[%s5189_s28 + $0x70] sm:$0xff] }
  0x45   :  { %3281 = vmatpush3.msra.mxu0 %v130_v6  ;;  %3299 = vmatprep.subr.mxu1 %v5172_v1  ;;  %v331_v20 = vld [vmem:[%s5189_s28 + $0xa0] sm:$0xff]  ;;  %v322_v23 = vld [vmem:[%s5189_s28 + $0x58] sm:$0xff]  ;;  %v316_v25 = vld [vmem:[%s5189_s28 + $0x28] sm:$0xff] }
  0x46   :  { %3282 = vmatprep.subr.mxu0 %v5172_v1  ;;  %3300 = vmatpush3.msra.mxu1 %v216_v13  ;;  %v319_v24 = vld [vmem:[%s5189_s28 + $0x40] sm:$0xff]  ;;  %v313_v26 = vld [vmem:[%s5189_s28 + $0x10] sm:$0xff]  ;;  %v344_v44 = vld [vmem:[%s5189_s28 + $0x108] sm:$0xff] }
  0x47   :  { %3283 = vmatpush3.msra.mxu0 %v129_v7  ;;  %375 = vmatprep.subr.mxu1 %v345_v14  ;;  %v3032_v39 = vld [vmem:[%s5190_s6] ss:$0 sm:$0xff]  ;;  %v342_v45 = vld [vmem:[%s5189_s28 + $0xf8] sm:$0xff]  ;;  %v341_v46 = vld [vmem:[%s5189_s28 + $0xf0] sm:$0xff]  ;;  %s5191_s6 = sld [smem:[#allocation20_spill]] }
  0x48   :  { %3284 = vmatprep.subr.mxu0 %v5172_v1  ;;  %v339_v47 = vld [vmem:[%s5189_s28 + $0xe0] sm:$0xff]  ;;  %v338_v48 = vld [vmem:[%s5189_s28 + $0xd8] sm:$0xff]  ;;  %v336_v49 = vld [vmem:[%s5189_s28 + $0xc8] sm:$0xff] }
  0x49   :  { %3285 = vmatpush3.msra.mxu0 %v128_v8  ;;  %v335_v50 = vld [vmem:[%s5189_s28 + $0xc0] sm:$0xff]  ;;  %v333_v51 = vld [vmem:[%s5189_s28 + $0xb0] sm:$0xff]  ;;  %v332_v52 = vld [vmem:[%s5189_s28 + $0xa8] sm:$0xff] }
  0x4a   :  { %3286 = vmatprep.subr.mxu0 %v5172_v1  ;;  %v330_v53 = vld [vmem:[%s5189_s28 + $0x98] sm:$0xff]  ;;  %v329_v54 = vld [vmem:[%s5189_s28 + $0x90] sm:$0xff]  ;;  %v327_v55 = vld [vmem:[%s5189_s28 + $0x80] sm:$0xff] }
  0x4b   :  { %3287 = vmatpush3.msra.mxu0 %v127_v9  ;;  %v326_v56 = vld [vmem:[%s5189_s28 + $0x78] sm:$0xff]  ;;  %v324_v57 = vld [vmem:[%s5189_s28 + $0x68] sm:$0xff]  ;;  %v323_v58 = vld [vmem:[%s5189_s28 + $0x60] sm:$0xff] }
  0x4c   :  { %3288 = vmatprep.subr.mxu0 %v5172_v1  ;;  %v321_v59 = vld [vmem:[%s5189_s28 + $0x50] sm:$0xff]  ;;  %v320_v60 = vld [vmem:[%s5189_s28 + $0x48] sm:$0xff]  ;;  %v318_v61 = vld [vmem:[%s5189_s28 + $0x38] sm:$0xff] }
  0x4d   :  { %3289 = vmatpush3.msra.mxu0 %v126_v10  ;;  %v317_v62 = vld [vmem:[%s5189_s28 + $0x30] sm:$0xff]  ;;  %v315_v63 = vld [vmem:[%s5189_s28 + $0x20] sm:$0xff]  ;;  %v314_v0 = vld [vmem:[%s5189_s28 + $0x18] sm:$0xff] }
  0x4e   :  { %3291 = vmatmul.mubr.msk.f32.vlgmr.msra.gmra.mxu0 %vm141_vm1, %v4037_v11  ;;  %3304 = vmatprep.subr.mxu0 %v5172_v1  ;;  %v312_v2 = vld [vmem:[%s5189_s28 + $0x8] sm:$0xff]  ;;  %v311_v3 = vld [vmem:[%s5189_s28] sm:$0xff]  ;;  %v4256_v4 = vld [vmem:[#allocation2 + $0x110] sm:$0xff] }
  0x4f   :  { %3328 = vmatprep.mubr.msk.f32.mxu0 %vm3839_vm0, %v5172_v1  ;;  %3305 = vmatpush3.msra.mxu0 %v346_v15  ;;  %v4258_v5 = vld [vmem:[#allocation2 + $0x108] sm:$0xff]  ;;  %v4260_v6 = vld [vmem:[#allocation2 + $0xf8] sm:$0xff]  ;;  %v4265_v7 = vld [vmem:[#allocation2 + $0xf0] sm:$0xff] }
  0x50   :  { %3306 = vmatprep.subr.mxu0 %v5172_v1  ;;  %v4268_v8 = vld [vmem:[#allocation2 + $0xe0] sm:$0xff]  ;;  %v4272_v9 = vld [vmem:[#allocation2 + $0xd8] sm:$0xff]  ;;  %v4275_v10 = vld [vmem:[#allocation2 + $0xc8] sm:$0xff] }
  0x51   :  { %3307 = vmatpush3.msra.mxu0 %v343_v16  ;;  %v4281_v12 = vld [vmem:[#allocation2 + $0xb0] sm:$0xff]  ;;  %v4284_v13 = vld [vmem:[#allocation2 + $0xa8] sm:$0xff]  ;;  %v4287_v14 = vld [vmem:[#allocation2 + $0x98] sm:$0xff] }
  0x52   :  { %3308 = vmatprep.subr.mxu0 %v5172_v1  ;;  %v4290_v15 = vld [vmem:[#allocation2 + $0x90] sm:$0xff]  ;;  %v4293_v16 = vld [vmem:[#allocation2 + $0x80] sm:$0xff] }
  0x53   :  { %3309 = vmatpush3.msra.mxu0 %v340_v17  ;;  %v4296_v17 = vld [vmem:[#allocation2 + $0x78] sm:$0xff] }
  0x54   :  { %3310 = vmatprep.subr.mxu0 %v5172_v1 }
  0x55   :  { %3311 = vmatpush3.msra.mxu0 %v337_v18  ;;  %v4299_v18 = vld [vmem:[#allocation2 + $0x68] sm:$0xff] }
  0x56   :  { %3312 = vmatprep.subr.mxu0 %v5172_v1 }
  0x57   :  { %3313 = vmatpush3.msra.mxu0 %v334_v19  ;;  %v4302_v19 = vld [vmem:[#allocation2 + $0x60] sm:$0xff] }
  0x58   :  { %3314 = vmatprep.subr.mxu0 %v5172_v1 }
  0x59   :  { %3315 = vmatpush3.msra.mxu0 %v331_v20  ;;  %v4305_v20 = vld [vmem:[#allocation2 + $0x50] sm:$0xff] }
  0x5a   :  { %3316 = vmatprep.subr.mxu0 %v5172_v1 }
  0x5b   :  { %3317 = vmatpush3.msra.mxu0 %v328_v21  ;;  %v4308_v21 = vld [vmem:[#allocation2 + $0x48] sm:$0xff] }
  0x5c   :  { %3318 = vmatprep.subr.mxu0 %v5172_v1 }
  0x5d   :  { %3319 = vmatpush3.msra.mxu0 %v325_v22  ;;  %v4311_v22 = vld [vmem:[#allocation2 + $0x38] sm:$0xff] }
  0x5e   :  { %3320 = vmatprep.subr.mxu0 %v5172_v1 }
  0x5f   :  { %3321 = vmatpush3.msra.mxu0 %v322_v23  ;;  %v4314_v23 = vld [vmem:[#allocation2 + $0x30] sm:$0xff] }
  0x60   :  { %3322 = vmatprep.subr.mxu0 %v5172_v1 }
  0x61   :  { %3323 = vmatpush3.msra.mxu0 %v319_v24  ;;  %v4317_v24 = vld [vmem:[#allocation2 + $0x20] sm:$0xff] }
  0x62   :  { %3324 = vmatprep.subr.mxu0 %v5172_v1 }
  0x63   :  { %3325 = vmatpush3.msra.mxu0 %v316_v25  ;;  %v4320_v25 = vld [vmem:[#allocation2 + $0x18] sm:$0xff] }
  0x64   :  { %3326 = vmatprep.subr.mxu0 %v5172_v1 }
  0x65   :  { %3327 = vmatpush3.msra.mxu0 %v313_v26  ;;  %v4323_v26 = vld [vmem:[#allocation2 + $0x8] sm:$0xff] }
  0x66   :  { %3331 = vmatprep.subr.mxu0 %v5172_v1  ;;  %3329 = vmatmul.mubr.msk.f32.vlgmr.msra.gmra.mxu0 %vm364_vm2, %v4037_v11 }
  0x67   :  { %3332 = vmatpush3.msra.mxu0 %v4105_v27  ;;  %3355 = vmatprep.mubr.msk.f32.mxu0 %vm3839_vm0, %v5172_v1 }
  0x68   :  { %3333 = vmatprep.subr.mxu0 %v5172_v1 }
  0x69   :  { %3334 = vmatpush3.msra.mxu0 %v4111_v28 }
  0x6a   :  { %3335 = vmatprep.subr.mxu0 %v5172_v1 }
  0x6b   :  { %3336 = vmatpush3.msra.mxu0 %v4115_v29 }
  0x6c   :  { %3337 = vmatprep.subr.mxu0 %v5172_v1 }
  0x6d   :  { %3338 = vmatpush3.msra.mxu0 %v4119_v30 }
  0x6e   :  { %3339 = vmatprep.subr.mxu0 %v5172_v1 }
  0x6f   :  { %3340 = vmatpush3.msra.mxu0 %v4123_v31 }
  0x70   :  { %3341 = vmatprep.subr.mxu0 %v5172_v1 }
  0x71   :  { %3342 = vmatpush3.msra.mxu0 %v4127_v32 }
  0x72   :  { %3343 = vmatprep.subr.mxu0 %v5172_v1 }
  0x73   :  { %3344 = vmatpush3.msra.mxu0 %v4131_v33 }
  0x74   :  { %3345 = vmatprep.subr.mxu0 %v5172_v1 }
  0x75   :  { %3346 = vmatpush3.msra.mxu0 %v4135_v34 }
  0x76   :  { %3347 = vmatprep.subr.mxu0 %v5172_v1 }
  0x77   :  { %3348 = vmatpush3.msra.mxu0 %v4139_v35 }
  0x78   :  { %3349 = vmatprep.subr.mxu0 %v5172_v1 }
  0x79   :  { %3350 = vmatpush3.msra.mxu0 %v4143_v36 }
  0x7a   :  { %3351 = vmatprep.subr.mxu0 %v5172_v1 }
  0x7b   :  { %3352 = vmatpush3.msra.mxu0 %v4147_v37 }
  0x7c   :  { %3353 = vmatprep.subr.mxu0 %v5172_v1 }
  0x7d   :  { %3354 = vmatpush3.msra.mxu0 %v4149_v38 }
  0x7e   :  { %3356 = vmatmul.mubr.f32.vlgmr.msra.gmra.mxu0 %v5172_v1  ;;  %3358 = vmatprep.subr.mxu0 %v5172_v1 }
  0x7f   :  { %3359 = vmatpush3.msra.mxu0 %v4105_v27  ;;  %3382 = vmatprep.mubr.msk.f32.mxu0 %vm3839_vm0, %v5172_v1 }
  0x80   :  { %3360 = vmatprep.subr.mxu0 %v5172_v1 }
  0x81   :  { %3361 = vmatpush3.msra.mxu0 %v4111_v28 }
  0x82   :  { %3362 = vmatprep.subr.mxu0 %v5172_v1 }
  0x83   :  { %3363 = vmatpush3.msra.mxu0 %v4115_v29 }
  0x84   :  { %3364 = vmatprep.subr.mxu0 %v5172_v1 }
  0x85   :  { %3365 = vmatpush3.msra.mxu0 %v4119_v30 }
  0x86   :  { %3366 = vmatprep.subr.mxu0 %v5172_v1 }
  0x87   :  { %3367 = vmatpush3.msra.mxu0 %v4123_v31 }
  0x88   :  { %3368 = vmatprep.subr.mxu0 %v5172_v1 }
  0x89   :  { %3369 = vmatpush3.msra.mxu0 %v4127_v32 }
  0x8a   :  { %3370 = vmatprep.subr.mxu0 %v5172_v1 }
  0x8b   :  { %3371 = vmatpush3.msra.mxu0 %v4131_v33 }
  0x8c   :  { %3372 = vmatprep.subr.mxu0 %v5172_v1 }
  0x8d   :  { %3373 = vmatpush3.msra.mxu0 %v4135_v34 }
  0x8e   :  { %3374 = vmatprep.subr.mxu0 %v5172_v1 }
  0x8f   :  { %3375 = vmatpush3.msra.mxu0 %v4139_v35 }
  0x90   :  { %3376 = vmatprep.subr.mxu0 %v5172_v1 }
  0x91   :  { %3377 = vmatpush3.msra.mxu0 %v4143_v36 }
  0x92   :  { %3378 = vmatprep.subr.mxu0 %v5172_v1 }
  0x93   :  { %3379 = vmatpush3.msra.mxu0 %v4147_v37 }
  0x94   :  { %3380 = vmatprep.subr.mxu0 %v5172_v1 }
  0x95   :  { %3381 = vmatpush3.msra.mxu0 %v4149_v38 }
  0x96   :  { %3385 = vmatprep.subr.mxu0 %v5172_v1 }
 0x10e   :  { %v211_v40 = vpop.f32.mrf.mxu0 }
 0x10f   :  { %v212_v41 = vadd.f32 %v3032_v39, %v211_v40  ;;  %v4326_v39 = vld [vmem:[#allocation2] sm:$0xff]  ;;  %v5171_v40 = vlaneseq }
 0x110   :  { %v3292_v42 = vpop.f32.mrf.mxu0 }
 0x111   :  { %v215_v43 = vmax.f32 %v212_v41, 0.0  ;;  %v303_v41 = vshrl.u32 %v5171_v40, 7  ;;  %v347_v42 = vld [vmem:[%s5191_s6] ss:$2 sm:$0x7] }
 0x113   :  { %3302 = vmatmul.mubr.msk.f32.vlgmr.msra.gmra.mxu1 %vm222_vm3, %v215_v43  ;;  %v355_v43 = vsub.s32 1, %v303_v41 }
 0x114   :  { %376 = vmatpush1.msra.mxu1 %v344_v44  ;;  %431 = vmatprep.mubr.f32.mxu1 %v5172_v1 }
 0x115   :  { %377 = vmatprep.subr.mxu1 %v342_v45  ;;  %v356_v44 = vrot.slane %v347_v42, %v355_v43  ;;  %v359_v45 = vsub.s32 2, %v303_v41 }
 0x116   :  { %378 = vmatpush1.msra.mxu1 %v341_v46 }
 0x117   :  { %379 = vmatprep.subr.mxu1 %v339_v47  ;;  %v360_v47 = vrot.slane %v347_v42, %v359_v45 }
 0x118   :  { %380 = vmatpush1.msra.mxu1 %v338_v48 }
 0x119   :  { %381 = vmatprep.subr.mxu1 %v336_v49 }
 0x11a   :  { %382 = vmatpush1.msra.mxu1 %v335_v50 }
 0x11b   :  { %383 = vmatprep.subr.mxu1 %v333_v51 }
 0x11c   :  { %384 = vmatpush1.msra.mxu1 %v332_v52 }
 0x11d   :  { %385 = vmatprep.subr.mxu1 %v330_v53 }
 0x11e   :  { %386 = vmatpush1.msra.mxu1 %v329_v54 }
 0x11f   :  { %387 = vmatprep.subr.mxu1 %v327_v55 }
 0x120   :  { %388 = vmatpush1.msra.mxu1 %v326_v56 }
 0x121   :  { %389 = vmatprep.subr.mxu1 %v324_v57  ;;  %v3040_v57 = vld [vmem:[%s5191_s6 + $0x1] ss:$2 sm:$0x7]  ;;  %s5193_s6 = sld [smem:[#allocation24_spill]] }
 0x122   :  { %390 = vmatpush1.msra.mxu1 %v323_v58  ;;  %v4369_v58 = vrot.slane %v3040_v57, %v355_v43 }
 0x123   :  { %391 = vmatprep.subr.mxu1 %v321_v59 }
 0x124   :  { %392 = vmatpush1.msra.mxu1 %v320_v60  ;;  %v4371_v60 = vrot.slane %v3040_v57, %v359_v45 }
 0x125   :  { %393 = vmatprep.subr.mxu1 %v318_v61 }
 0x126   :  { %394 = vmatpush1.msra.mxu1 %v317_v62  ;;  %v504_v46 = vpop.f32.mrf.mxu0 }
 0x127   :  { %395 = vmatprep.subr.mxu1 %v315_v63  ;;  %v4362_v49 = vadd.f32 %v504_v46, %v360_v47 }
 0x128   :  { %396 = vmatpush1.msra.mxu1 %v314_v0  ;;  %v3330_v48 = vpop.f32.mrf.mxu0  ;;  %v304_v0 = vsub.s32 0, %v303_v41 }
 0x129   :  { %397 = vmatprep.subr.mxu1 %v312_v2 }
 0x12a   :  { %398 = vmatpush1.msra.mxu1 %v311_v3  ;;  %v4377_v2 = vrot.slane %v3040_v57, %v304_v0  ;;  %v352_v3 = vrot.slane %v347_v42, %v304_v0  ;;  %v3841_v42 = vmov 0  }
 0x12b   :  { %3038 = vmatmul.mubr.msk.f32.vlgmr.msra.gmra.mxu1 %vm364_vm2, %v4037_v11  ;;  %573 = vmatprep.subr.mxu1 %v4256_v4  ;;  %v4278_v11 = vld [vmem:[#allocation2 + $0xc0] sm:$0xff] }
 0x12c   :  { %574 = vmatpush1.msra.mxu1 %v4258_v5  ;;  %629 = vmatprep.mubr.f32.mxu1 %v5172_v1 }
 0x12d   :  { %575 = vmatprep.subr.mxu1 %v4260_v6  ;;  %3665 = vset.pattern.permute.xlu0 %v3841_v42 }
 0x12e   :  { %576 = vmatpush1.msra.mxu1 %v4265_v7  ;;  %3664 = vset.pattern.permute.xlu1 %v3841_v42 }
 0x12f   :  { %577 = vmatprep.subr.mxu1 %v4268_v8 }
 0x130   :  { %578 = vmatpush1.msra.mxu1 %v4272_v9 }
 0x131   :  { %579 = vmatprep.subr.mxu1 %v4275_v10 }
 0x132   :  { %580 = vmatpush1.msra.mxu1 %v4278_v11 }
 0x133   :  { %581 = vmatprep.subr.mxu1 %v4281_v12 }
 0x134   :  { %582 = vmatpush1.msra.mxu1 %v4284_v13 }
 0x135   :  { %583 = vmatprep.subr.mxu1 %v4287_v14 }
 0x136   :  { %584 = vmatpush1.msra.mxu1 %v4290_v15 }
 0x137   :  { %585 = vmatprep.subr.mxu1 %v4293_v16 }
 0x138   :  { %586 = vmatpush1.msra.mxu1 %v4296_v17 }
 0x139   :  { %587 = vmatprep.subr.mxu1 %v4299_v18 }
 0x13a   :  { %588 = vmatpush1.msra.mxu1 %v4302_v19 }
 0x13b   :  { %589 = vmatprep.subr.mxu1 %v4305_v20 }
 0x13c   :  { %590 = vmatpush1.msra.mxu1 %v4308_v21 }
 0x13d   :  { %591 = vmatprep.subr.mxu1 %v4311_v22 }
 0x13e   :  { %592 = vmatpush1.msra.mxu1 %v4314_v23  ;;  %v702_v50 = vpop.f32.mrf.mxu0 }
 0x13f   :  { %593 = vmatprep.subr.mxu1 %v4317_v24  ;;  %v703_v63 = vadd.f32 %v702_v50, %v4371_v60 }
 0x140   :  { %594 = vmatpush1.msra.mxu1 %v4320_v25  ;;  %v3357_v51 = vpop.f32.mrf.mxu0 }
 0x141   :  { %595 = vmatprep.subr.mxu1 %v4323_v26 }
 0x142   :  { %596 = vmatpush1.msra.mxu1 %v4326_v39 }
 0x143   :  { %630 = vmatmul.mubr.f32.vlgmr.msra.gmra.mxu1 %v5172_v1  ;;  %787 = vmatprep.subr.mxu1 %v4256_v4 }
 0x144   :  { %788 = vmatpush1.msra.mxu1 %v4258_v5  ;;  %843 = vmatprep.mubr.f32.mxu1 %v5172_v1 }
 0x145   :  { %789 = vmatprep.subr.mxu1 %v4260_v6 }
 0x146   :  { %790 = vmatpush1.msra.mxu1 %v4265_v7 }
 0x147   :  { %791 = vmatprep.subr.mxu1 %v4268_v8 }
 0x148   :  { %792 = vmatpush1.msra.mxu1 %v4272_v9 }
 0x149   :  { %793 = vmatprep.subr.mxu1 %v4275_v10 }
 0x14a   :  { %794 = vmatpush1.msra.mxu1 %v4278_v11 }
 0x14b   :  { %795 = vmatprep.subr.mxu1 %v4281_v12 }
 0x14c   :  { %796 = vmatpush1.msra.mxu1 %v4284_v13 }
 0x14d   :  { %797 = vmatprep.subr.mxu1 %v4287_v14 }
 0x14e   :  { %798 = vmatpush1.msra.mxu1 %v4290_v15 }
 0x14f   :  { %799 = vmatprep.subr.mxu1 %v4293_v16 }
 0x150   :  { %800 = vmatpush1.msra.mxu1 %v4296_v17 }
 0x151   :  { %801 = vmatprep.subr.mxu1 %v4299_v18 }
 0x152   :  { %802 = vmatpush1.msra.mxu1 %v4302_v19 }
 0x153   :  { %803 = vmatprep.subr.mxu1 %v4305_v20 }
 0x154   :  { %804 = vmatpush1.msra.mxu1 %v4308_v21 }
 0x155   :  { %805 = vmatprep.subr.mxu1 %v4311_v22 }
 0x156   :  { %806 = vmatpush1.msra.mxu1 %v4314_v23 }
 0x157   :  { %807 = vmatprep.subr.mxu1 %v4317_v24 }
 0x158   :  { %808 = vmatpush1.msra.mxu1 %v4320_v25 }
 0x159   :  { %809 = vmatprep.subr.mxu1 %v4323_v26 }
 0x15a   :  { %810 = vmatpush1.msra.mxu1 %v4326_v39 }
 0x15b   :  { %1012 = vmatprep.subr.mxu1 %v4256_v4 }
 0x1d3   :  { %v292_v52 = vpop.f32.mrf.mxu1 }
 0x1d5   :  { %v3303_v53 = vpop.f32.mrf.mxu1 }
 0x1eb   :  { %v433_v54 = vpop.f32.mrf.mxu1 }
 0x1ed   :  { %v435_v55 = vpop.f32.mrf.mxu1 }
 0x1ee   :  { %v4364_v56 = vadd.f32 %v435_v55, %v356_v44  ;;  %v4380_v44 = vadd.f32 %v433_v54, %v352_v3  ;;  %v221_v54 = vstv %s3034_s7 }
 0x1ef   :  { %v293_v57 = vadd.f32 %v292_v52, %v221_v54 }
 0x203   :  { %v631_v59 = vpop.f32.mrf.mxu1 }
 0x204   :  { %v632_v43 = vadd.f32 %v631_v59, %v4377_v2  ;;  %v3036_v59 = vmul.f32 -1.442695, %v293_v57 }
 0x205   :  { %v633_v61 = vpop.f32.mrf.mxu1 }
 0x206   :  { %v634_v62 = vadd.f32 %v633_v61, %v4369_v58  ;;  %v706_v45 = vadd.f32 %v632_v43, %v4380_v44 }
 0x208   :  { %722 = vrot.lane.b32.xlu0 %v634_v62, %s3840_s27  ;;  %v3041_v46 = vmul.f32 -1.442695, %v706_v45  ;;  %v713_v42 = vadd.f32 %v634_v62, %v4364_v56 }
 0x20a   :  { %3671 = vpow2.f32 %v3041_v46 }
 0x20c   :  { %724 = vrot.lane.b32.xlu0 %v703_v63, %s3840_s27 }
 0x217   :  { %v3672_v47 = vpop.eup %3671 }
 0x218   :  { %v710_v48 = vadd.f32 1.0, %v3672_v47 }
 0x21a   :  { %3673 = vrcp.f32 %v710_v48 }
 0x21b   :  { %3675 = vpow2.f32 %v3036_v59 }
 0x227   :  { %v3674_v53 = vpop.eup %3673 }
 0x228   :  { %v3676_v61 = vpop.eup %3675 }
 0x229   :  { %v299_v63 = vadd.f32 1.0, %v3676_v61 }
 0x22b   :  { %3677 = vrcp.f32 %v299_v63 }
 0x238   :  { %v3678_v3 = vpop.eup %3677 }
 0x239   :  { %v305_v47 = vrot.slane %v3678_v3, %v304_v0  ;;  %v3042_v0 = vmul.f32 -1.442695, %v713_v42 }
 0x23b   :  { %v306_v48 = vsub.f32 %v305_v47, %v3678_v3  ;;  %v737_v3 = vsub.f32 1.0, %v3674_v53  ;;  %v750_v47 = vmul.f32 0.0, %v3674_v53 }
 0x27a   :  { %v723_v50 = vpop.permute.xlu0 %722 }
 0x27e   :  { %v725_v51 = vpop.permute.xlu0 %724 }
 0x27f   :  { %v726_v55 = vsel %vm141_vm1, %v723_v50, %v725_v51  ;;  %v307_v50 = vand.u32 2147483647, %v306_v48 }
 0x280   :  { %v728_v41 = vmul.f32 %v3674_v53, %v726_v55 }
 0x281   :  { %vm308_vm4 = vcmp.le.f32.partialorder %v307_v50, 0.05 }
 0x282   :  { %730 = vrot.lane.b32.xlu1 %v728_v41, %s3840_s27  ;;  %v3037_v52 = vsel %vm308_vm4, 1.0, %v5172_v1  ;;  %vm2997_vm4 = vcmask 1040384  }
 0x283   :  { %v761_v41 = vsub.f32 1.0, %v3037_v52 }
 0x2f4   :  { %v731_v43 = vpop.permute.xlu1 %730 }
 0x2f5   :  { %v733_v45 = vadd.f32 %v731_v43, %v4364_v56  ;;  %v734_v46 = vadd.f32 %v731_v43, %v4362_v49 }
 0x2f7   :  { %3679 = vtanh.f32 %v733_v45 }
 0x2f8   :  { %3681 = vtanh.f32 %v734_v46 }
 0x2f9   :  { %3683 = vpow2.f32 %v3042_v0 }
 0x304   :  { %v3680_v51 = vpop.eup %3679 }
 0x305   :  { %v3682_v55 = vpop.eup %3681  ;;  %741 = vrot.lane.b32.xlu1 %v3680_v51, %s3842_s3 }
 0x306   :  { %743 = vrot.lane.b32.xlu0 %v3682_v55, %s3842_s3  ;;  %v3684_v54 = vpop.eup %3683 }
 0x307   :  { %v717_v57 = vadd.f32 1.0, %v3684_v54 }
 0x309   :  { %756 = vperm.xlu1 %3664, %v3037_v52   ;;  %3685 = vrcp.f32 %v717_v57 }
 0x30a   :  { %764 = vperm.xlu0 %3665, %v761_v41  }
 0x316   :  { %v3686_v63 = vpop.eup %3685 }
 0x317   :  { %v738_v46 = vsub.f32 1.0, %v3686_v63  ;;  %v751_v51 = vmul.f32 0.0, %v3686_v63 }
 0x377   :  { %v742_v61 = vpop.permute.xlu1 %741 }
 0x378   :  { %v744_v59 = vpop.permute.xlu0 %743  ;;  %v748_v45 = vmul.f32 %v742_v61, %v737_v3 }
 0x379   :  { %v745_v43 = vsel %vm222_vm3, %v742_v61, %v744_v59 }
 0x37a   :  { %v749_v48 = vmul.f32 %v745_v43, %v738_v46  ;;  %v752_v50 = vadd.f32 %v750_v47, %v748_v45 }
 0x37c   :  { %v753_v41 = vadd.f32 %v751_v51, %v749_v48 }
 0x384   :  { %v4392_v55 = vpop.permute.xlu1 %756 }
 0x385   :  { %v4394_v62 = vpop.permute.xlu0 %764  ;;  %v759_v52 = vmul.f32 %v4392_v55, %v752_v50  ;;  %v760_v54 = vmul.f32 %v4392_v55, %v753_v41 }
 0x386   :  { %v767_v42 = vmul.f32 0.0, %v4394_v62 }
 0x388   :  { %v4398_v0 = vadd.f32 %v767_v42, %v759_v52  ;;  %v4403_v53 = vadd.f32 %v767_v42, %v760_v54 }
 0x38a   :  { %772 = vrot.lane.b32.xlu1 %v4398_v0, %s3842_s3  ;;  %v970_v51 = vrot.slane %v4398_v0, 7  ;;  %v971_v0 = vrot.slane %v4403_v53, 7 }
 0x38e   :  { %774 = vrot.lane.b32.xlu1 %v4403_v53, %s3842_s3 }
 0x3fc   :  { %v773_v57 = vpop.permute.xlu1 %772 }
 0x400   :  { %v775_v59 = vpop.permute.xlu1 %774 }
 0x401   :  { %v776_v61 = vsel %vm222_vm3, %v773_v57, %v775_v59 }
 0x402   :  { %3043 = vmatmul.mubr.msk.f32.vlgmr.msra.gmra.mxu1 %vm364_vm2, %v776_v61  ;;  %3383 = vmatmul.mubr.msk.f32.vlgmr.msra.gmra.mxu0 %vm364_vm2, %v776_v61 }
 0x403   :  { %1013 = vmatpush1.msra.mxu1 %v4258_v5  ;;  %3386 = vmatpush3.msra.mxu0 %v4105_v27 }
 0x404   :  { %1014 = vmatprep.subr.mxu1 %v4260_v6  ;;  %3387 = vmatprep.subr.mxu0 %v5172_v1 }
 0x405   :  { %1015 = vmatpush1.msra.mxu1 %v4265_v7  ;;  %3388 = vmatpush3.msra.mxu0 %v4111_v28 }
 0x406   :  { %1016 = vmatprep.subr.mxu1 %v4268_v8  ;;  %3389 = vmatprep.subr.mxu0 %v5172_v1 }
 0x407   :  { %1017 = vmatpush1.msra.mxu1 %v4272_v9  ;;  %3390 = vmatpush3.msra.mxu0 %v4115_v29 }
 0x408   :  { %1018 = vmatprep.subr.mxu1 %v4275_v10  ;;  %3391 = vmatprep.subr.mxu0 %v5172_v1 }
 0x409   :  { %1019 = vmatpush1.msra.mxu1 %v4278_v11  ;;  %3392 = vmatpush3.msra.mxu0 %v4119_v30 }
 0x40a   :  { %1020 = vmatprep.subr.mxu1 %v4281_v12  ;;  %3393 = vmatprep.subr.mxu0 %v5172_v1 }
 0x40b   :  { %1021 = vmatpush1.msra.mxu1 %v4284_v13  ;;  %3394 = vmatpush3.msra.mxu0 %v4123_v31 }
 0x40c   :  { %1022 = vmatprep.subr.mxu1 %v4287_v14  ;;  %3395 = vmatprep.subr.mxu0 %v5172_v1 }
 0x40d   :  { %1023 = vmatpush1.msra.mxu1 %v4290_v15  ;;  %3396 = vmatpush3.msra.mxu0 %v4127_v32 }
 0x40e   :  { %1024 = vmatprep.subr.mxu1 %v4293_v16  ;;  %3397 = vmatprep.subr.mxu0 %v5172_v1 }
 0x40f   :  { %1025 = vmatpush1.msra.mxu1 %v4296_v17  ;;  %3398 = vmatpush3.msra.mxu0 %v4131_v33 }
 0x410   :  { %1026 = vmatprep.subr.mxu1 %v4299_v18  ;;  %3399 = vmatprep.subr.mxu0 %v5172_v1 }
 0x411   :  { %1027 = vmatpush1.msra.mxu1 %v4302_v19  ;;  %3400 = vmatpush3.msra.mxu0 %v4135_v34 }
 0x412   :  { %1028 = vmatprep.subr.mxu1 %v4305_v20  ;;  %3401 = vmatprep.subr.mxu0 %v5172_v1 }
 0x413   :  { %1029 = vmatpush1.msra.mxu1 %v4308_v21  ;;  %3402 = vmatpush3.msra.mxu0 %v4139_v35 }
 0x414   :  { %1030 = vmatprep.subr.mxu1 %v4311_v22  ;;  %3403 = vmatprep.subr.mxu0 %v5172_v1 }
 0x415   :  { %1031 = vmatpush1.msra.mxu1 %v4314_v23  ;;  %3404 = vmatpush3.msra.mxu0 %v4143_v36 }
 0x416   :  { %1032 = vmatprep.subr.mxu1 %v4317_v24  ;;  %3405 = vmatprep.subr.mxu0 %v5172_v1 }
 0x417   :  { %1033 = vmatpush1.msra.mxu1 %v4320_v25  ;;  %3406 = vmatpush3.msra.mxu0 %v4147_v37 }
 0x418   :  { %1034 = vmatprep.subr.mxu1 %v4323_v26  ;;  %3407 = vmatprep.subr.mxu0 %v5172_v1 }
 0x419   :  { %1035 = vmatpush1.msra.mxu1 %v4326_v39  ;;  %1068 = vmatprep.mubr.f32.mxu1 %v5172_v1 }
 0x41a   :  { %3408 = vmatpush3.msra.mxu0 %v4149_v38  ;;  %3409 = vmatprep.mubr.msk.f32.mxu0 %vm3839_vm0, %v5172_v1 }
 0x41b   :  { %1237 = vmatprep.subr.mxu1 %v4256_v4  ;;  %3412 = vmatprep.subr.mxu0 %v5172_v1 }
 0x4c2   :  { %v845_v63 = vpop.f32.mrf.mxu1  ;;  %v916_v3 = vpop.f32.mrf.mxu0 }
 0x4c3   :  { %v917_v43 = vadd.f32 %v916_v3, %v4371_v60  ;;  %v846_v4 = vadd.f32 %v845_v63, %v4377_v2 }
 0x4c4   :  { %v847_v45 = vpop.f32.mrf.mxu1  ;;  %v3384_v46 = vpop.f32.mrf.mxu0 }
 0x4c5   :  { %v941_v47 = vrot.slane %v917_v43, 7  ;;  %v848_v48 = vadd.f32 %v847_v45, %v4369_v58  ;;  %v921_v52 = vrot.slane %v846_v4, 7 }
 0x4c7   :  { %v931_v50 = vrot.slane %v848_v48, 7  ;;  %944 = vrot.lane.b32.xlu1 %v941_v47, %s3840_s27  ;;  %v923_v41 = vadd.f32 %v921_v52, %v4380_v44 }
 0x4c9   :  { %942 = vrot.lane.b32.xlu0 %v931_v50, %s3840_s27  ;;  %v3045_v42 = vmul.f32 -1.442695, %v923_v41 }
 0x4cb   :  { %980 = vrot.lane.b32.xlu1 %v970_v51, %s3842_s3  ;;  %3687 = vpow2.f32 %v3045_v42 }
 0x4d8   :  { %v3688_v54 = vpop.eup %3687 }
 0x4d9   :  { %v927_v57 = vadd.f32 1.0, %v3688_v54  ;;  %v933_v54 = vadd.f32 %v931_v50, %v4364_v56 }
 0x4db   :  { %3689 = vrcp.f32 %v927_v57  ;;  %v3046_v57 = vmul.f32 -1.442695, %v933_v54 }
 0x4e8   :  { %v3690_v3 = vpop.eup %3689 }
 0x539   :  { %v945_v59 = vpop.permute.xlu1 %944 }
 0x53b   :  { %v943_v61 = vpop.permute.xlu0 %942 }
 0x53c   :  { %v946_v43 = vsel %vm141_vm1, %v943_v61, %v945_v59 }
 0x53d   :  { %v948_v45 = vmul.f32 %v3690_v3, %v946_v43  ;;  %v981_v4 = vpop.permute.xlu1 %980 }
 0x53f   :  { %950 = vrot.lane.b32.xlu0 %v948_v45, %s3840_s27  ;;  %v957_v45 = vsub.f32 1.0, %v3690_v3 }
 0x543   :  { %982 = vrot.lane.b32.xlu0 %v971_v0, %s3842_s3 }
 0x5b1   :  { %v951_v63 = vpop.permute.xlu0 %950 }
 0x5b2   :  { %v953_v46 = vadd.f32 %v951_v63, %v4364_v56  ;;  %v954_v47 = vadd.f32 %v951_v63, %v4362_v49 }
 0x5b4   :  { %3691 = vtanh.f32 %v953_v46 }
 0x5b5   :  { %3693 = vtanh.f32 %v954_v47  ;;  %v983_v48 = vpop.permute.xlu0 %982 }
 0x5b6   :  { %v984_v41 = vsel %vm222_vm3, %v981_v4, %v983_v48  ;;  %3695 = vpow2.f32 %v3046_v57  ;;  %v974_v48 = vmul.f32 %v3690_v3, %v970_v51 }
 0x5b7   :  { %v986_v53 = vmul.f32 %v984_v41, %v4394_v62 }
 0x5c1   :  { %v3692_v52 = vpop.eup %3691 }
 0x5c2   :  { %v3694_v42 = vpop.eup %3693  ;;  %961 = vrot.lane.b32.xlu1 %v3692_v52, %s3842_s3 }
 0x5c3   :  { %963 = vrot.lane.b32.xlu0 %v3694_v42, %s3842_s3  ;;  %v3696_v59 = vpop.eup %3695 }
 0x5c4   :  { %v937_v61 = vadd.f32 1.0, %v3696_v59 }
 0x5c6   :  { %988 = vrot.lane.b32.xlu1 %v986_v53, %s3843_s8  ;;  %3697 = vrcp.f32 %v937_v61 }
 0x5d3   :  { %v3698_v43 = vpop.eup %3697 }
 0x5d4   :  { %v958_v47 = vsub.f32 1.0, %v3698_v43  ;;  %v975_v41 = vmul.f32 %v3698_v43, %v971_v0 }
 0x634   :  { %v962_v63 = vpop.permute.xlu1 %961 }
 0x635   :  { %v964_v46 = vpop.permute.xlu0 %963  ;;  %v968_v4 = vmul.f32 %v962_v63, %v957_v45 }
 0x636   :  { %v965_v52 = vsel %vm222_vm3, %v962_v63, %v964_v46 }
 0x637   :  { %v969_v42 = vmul.f32 %v965_v52, %v958_v47  ;;  %v976_v40 = vadd.f32 %v974_v48, %v968_v4 }
 0x638   :  { %v989_v54 = vpop.permute.xlu1 %988 }
 0x639   :  { %v977_v53 = vadd.f32 %v975_v41, %v969_v42  ;;  %v978_v50 = vmul.f32 %v976_v40, %v4392_v55  ;;  %v5192_v40 = vmov 0.0  }
 0x63b   :  { %v979_v57 = vmul.f32 %v977_v53, %v4392_v55  ;;  %v4484_v59 = vadd.f32 %v989_v54, %v978_v50 }
 0x63d   :  { %v4486_v61 = vadd.f32 %v989_v54, %v979_v57  ;;  %v995_v1 = vrot.slane %v4484_v59, 1 }
 0x63f   :  { %v996_v51 = vrot.slane %v4486_v61, 1  ;;  %997 = vrot.lane.b32.xlu0 %v995_v1, %s3842_s3 }
 0x641   :  { %999 = vrot.lane.b32.xlu1 %v996_v51, %s3842_s3 }
 0x6b1   :  { %v998_v3 = vpop.permute.xlu0 %997 }
 0x6b3   :  { %v1000_v0 = vpop.permute.xlu1 %999 }
 0x6b4   :  { %v1001_v43 = vsel %vm222_vm3, %v998_v3, %v1000_v0 }
 0x6b5   :  { %3047 = vmatmul.mubr.msk.f32.vlgmr.msra.gmra.mxu1 %vm364_vm2, %v1001_v43  ;;  %3410 = vmatmul.mubr.msk.f32.vlgmr.msra.gmra.mxu0 %vm364_vm2, %v1001_v43 }
 0x6b6   :  { %1238 = vmatpush1.msra.mxu1 %v4258_v5  ;;  %3413 = vmatpush3.msra.mxu0 %v4105_v27 }
 0x6b7   :  { %1239 = vmatprep.subr.mxu1 %v4260_v6  ;;  %3414 = vmatprep.subr.mxu0 %v5192_v40 }
 0x6b8   :  { %1240 = vmatpush1.msra.mxu1 %v4265_v7  ;;  %3415 = vmatpush3.msra.mxu0 %v4111_v28 }
 0x6b9   :  { %1241 = vmatprep.subr.mxu1 %v4268_v8  ;;  %3416 = vmatprep.subr.mxu0 %v5192_v40 }
 0x6ba   :  { %1242 = vmatpush1.msra.mxu1 %v4272_v9  ;;  %3417 = vmatpush3.msra.mxu0 %v4115_v29 }
 0x6bb   :  { %1243 = vmatprep.subr.mxu1 %v4275_v10  ;;  %3418 = vmatprep.subr.mxu0 %v5192_v40 }
 0x6bc   :  { %1244 = vmatpush1.msra.mxu1 %v4278_v11  ;;  %3419 = vmatpush3.msra.mxu0 %v4119_v30 }
 0x6bd   :  { %1245 = vmatprep.subr.mxu1 %v4281_v12  ;;  %3420 = vmatprep.subr.mxu0 %v5192_v40  ;;  %v1196_v12 = vrot.slane %v4486_v61, 7 }
 0x6be   :  { %1246 = vmatpush1.msra.mxu1 %v4284_v13  ;;  %3421 = vmatpush3.msra.mxu0 %v4123_v31 }
 0x6bf   :  { %1247 = vmatprep.subr.mxu1 %v4287_v14  ;;  %3422 = vmatprep.subr.mxu0 %v5192_v40 }
 0x6c0   :  { %1248 = vmatpush1.msra.mxu1 %v4290_v15  ;;  %3423 = vmatpush3.msra.mxu0 %v4127_v32 }
 0x6c1   :  { %1249 = vmatprep.subr.mxu1 %v4293_v16  ;;  %3424 = vmatprep.subr.mxu0 %v5192_v40 }
 0x6c2   :  { %1250 = vmatpush1.msra.mxu1 %v4296_v17  ;;  %3425 = vmatpush3.msra.mxu0 %v4131_v33 }
 0x6c3   :  { %1251 = vmatprep.subr.mxu1 %v4299_v18  ;;  %3426 = vmatprep.subr.mxu0 %v5192_v40 }
 0x6c4   :  { %1252 = vmatpush1.msra.mxu1 %v4302_v19  ;;  %3427 = vmatpush3.msra.mxu0 %v4135_v34  ;;  %v1195_v34 = vrot.slane %v4484_v59, 7 }
 0x6c5   :  { %1253 = vmatprep.subr.mxu1 %v4305_v20  ;;  %3428 = vmatprep.subr.mxu0 %v5192_v40 }
 0x6c6   :  { %1254 = vmatpush1.msra.mxu1 %v4308_v21  ;;  %3429 = vmatpush3.msra.mxu0 %v4139_v35 }
 0x6c7   :  { %1255 = vmatprep.subr.mxu1 %v4311_v22  ;;  %3430 = vmatprep.subr.mxu0 %v5192_v40 }
 0x6c8   :  { %1256 = vmatpush1.msra.mxu1 %v4314_v23  ;;  %3431 = vmatpush3.msra.mxu0 %v4143_v36 }
 0x6c9   :  { %1257 = vmatprep.subr.mxu1 %v4317_v24  ;;  %3432 = vmatprep.subr.mxu0 %v5192_v40 }
 0x6ca   :  { %1258 = vmatpush1.msra.mxu1 %v4320_v25  ;;  %3433 = vmatpush3.msra.mxu0 %v4147_v37 }
 0x6cb   :  { %1259 = vmatprep.subr.mxu1 %v4323_v26  ;;  %3434 = vmatprep.subr.mxu0 %v5192_v40 }
 0x6cc   :  { %1260 = vmatpush1.msra.mxu1 %v4326_v39  ;;  %1293 = vmatprep.mubr.f32.mxu1 %v5192_v40 }
 0x6cd   :  { %3435 = vmatpush3.msra.mxu0 %v4149_v38  ;;  %3436 = vmatprep.mubr.msk.f32.mxu0 %vm3839_vm0, %v5192_v40 }
 0x6ce   :  { %3458 = vmatprep.subr.mxu0 %v5192_v40  ;;  %3439 = vmatprep.subr.mxu1 %v5192_v40 }
 0x775   :  { %v1070_v1 = vpop.f32.mrf.mxu1  ;;  %v1141_v27 = vpop.f32.mrf.mxu0 }
 0x776   :  { %v1142_v28 = vadd.f32 %v1141_v27, %v4371_v60  ;;  %v1071_v35 = vadd.f32 %v1070_v1, %v4377_v2 }
 0x777   :  { %v1072_v29 = vpop.f32.mrf.mxu1  ;;  %v3411_v30 = vpop.f32.mrf.mxu0 }
 0x778   :  { %v1166_v31 = vrot.slane %v1142_v28, 6  ;;  %v1073_v32 = vadd.f32 %v1072_v29, %v4369_v58  ;;  %v1146_v36 = vrot.slane %v1071_v35, 6  ;;  %v1541_v30 = vld [vmem:[%s5151_s15 + $0x18] sm:$0xff] }
 0x77a   :  { %v1156_v33 = vrot.slane %v1073_v32, 6  ;;  %1169 = vrot.lane.b32.xlu1 %v1166_v31, %s3840_s27  ;;  %v1148_v37 = vadd.f32 %v1146_v36, %v4380_v44  ;;  %v1540_v31 = vld [vmem:[%s5151_s15 + $0x10] sm:$0xff] }
 0x77c   :  { %1167 = vrot.lane.b32.xlu0 %v1156_v33, %s3840_s27  ;;  %v3049_v38 = vmul.f32 -1.442695, %v1148_v37  ;;  %v1158_v22 = vadd.f32 %v1156_v33, %v4364_v56  ;;  %v1538_v37 = vld [vmem:[%s5151_s15] sm:$0xff] }
 0x77e   :  { %1205 = vrot.lane.b32.xlu1 %v1195_v34, %s3842_s3  ;;  %3699 = vpow2.f32 %v3049_v38  ;;  %v3050_v23 = vmul.f32 -1.442695, %v1158_v22 }
 0x78b   :  { %v3700_v5 = vpop.eup %3699 }
 0x78c   :  { %v1152_v6 = vadd.f32 1.0, %v3700_v5  ;;  %v1644_v5 = vld [vmem:[%s5149_s13 + $0x18] sm:$0xff] }
 0x78e   :  { %3701 = vrcp.f32 %v1152_v6  ;;  %v1643_v6 = vld [vmem:[%s5149_s13 + $0x10] sm:$0xff] }
 0x79b   :  { %v3702_v9 = vpop.eup %3701 }
 0x79c   :  { %v1182_v39 = vsub.f32 1.0, %v3702_v9  ;;  %v1199_v47 = vmul.f32 %v3702_v9, %v1195_v34 }
 0x7ec   :  { %v1170_v7 = vpop.permute.xlu1 %1169 }
 0x7ee   :  { %v1168_v8 = vpop.permute.xlu0 %1167 }
 0x7ef   :  { %v1171_v10 = vsel %vm141_vm1, %v1168_v8, %v1170_v7  ;;  %v1536_v7 = vld [vmem:[%s5193_s6 + $0x8] sm:$0xff] }
 0x7f0   :  { %v1173_v11 = vmul.f32 %v3702_v9, %v1171_v10  ;;  %v1206_v17 = vpop.permute.xlu1 %1205  ;;  %v1642_v8 = vld [vmem:[%s5149_s13 + $0x8] sm:$0xff]  ;;  %v1537_v9 = vld [vmem:[%s5193_s6 + $0x10] sm:$0xff]  ;;  %v1641_v10 = vld [vmem:[%s5149_s13] sm:$0xff] }
 0x7f2   :  { %1175 = vrot.lane.b32.xlu0 %v1173_v11, %s3840_s27  ;;  %v1636_v11 = vld [vmem:[%s5194_s25] sm:$0xff] }
 0x7f6   :  { %1207 = vrot.lane.b32.xlu0 %v1196_v12, %s3842_s3 }
 0x864   :  { %v1176_v13 = vpop.permute.xlu0 %1175 }
 0x865   :  { %v1178_v14 = vadd.f32 %v1176_v13, %v4364_v56  ;;  %v1179_v15 = vadd.f32 %v1176_v13, %v4362_v49 }
 0x867   :  { %3703 = vtanh.f32 %v1178_v14 }
 0x868   :  { %3705 = vtanh.f32 %v1179_v15  ;;  %v1208_v16 = vpop.permute.xlu0 %1207 }
 0x869   :  { %v1209_v19 = vsel %vm222_vm3, %v1206_v17, %v1208_v16  ;;  %3707 = vpow2.f32 %v3050_v23 }
 0x86a   :  { %v1211_v21 = vmul.f32 %v1209_v19, %v4394_v62 }
 0x874   :  { %v3704_v18 = vpop.eup %3703 }
 0x875   :  { %v3706_v20 = vpop.eup %3705  ;;  %1186 = vrot.lane.b32.xlu1 %v3704_v18, %s3842_s3 }
 0x876   :  { %1188 = vrot.lane.b32.xlu0 %v3706_v20, %s3842_s3  ;;  %v3708_v24 = vpop.eup %3707 }
 0x877   :  { %v1162_v25 = vadd.f32 1.0, %v3708_v24 }
 0x879   :  { %1213 = vrot.lane.b32.xlu1 %v1211_v21, %s3843_s8  ;;  %3709 = vrcp.f32 %v1162_v25 }
 0x886   :  { %v3710_v26 = vpop.eup %3709 }
 0x887   :  { %v1183_v46 = vsub.f32 1.0, %v3710_v26  ;;  %v1200_v52 = vmul.f32 %v3710_v26, %v1196_v12  ;;  %v1637_v12 = vld [vmem:[%s5194_s25 + $0x8] sm:$0xff] }
 0x8e7   :  { %v1187_v45 = vpop.permute.xlu1 %1186 }
 0x8e8   :  { %v1189_v63 = vpop.permute.xlu0 %1188  ;;  %v1193_v48 = vmul.f32 %v1187_v45, %v1182_v39 }
 0x8e9   :  { %v1190_v4 = vsel %vm222_vm3, %v1187_v45, %v1189_v63  ;;  %v3060_v63 = vld [vmem:[%s5155_s19] ss:$0 sm:$0xff] }
 0x8ea   :  { %v1194_v41 = vmul.f32 %v1190_v4, %v1183_v46  ;;  %v1201_v42 = vadd.f32 %v1199_v47, %v1193_v48 }
 0x8eb   :  { %v1214_v54 = vpop.permute.xlu1 %1213 }
 0x8ec   :  { %v1202_v53 = vadd.f32 %v1200_v52, %v1194_v41  ;;  %v1203_v50 = vmul.f32 %v1201_v42, %v4392_v55 }
 0x8ee   :  { %v1204_v57 = vmul.f32 %v1202_v53, %v4392_v55  ;;  %v4569_v59 = vadd.f32 %v1214_v54, %v1203_v50  ;;  %v1638_v53 = vld [vmem:[%s5147_s11] sm:$0xff]  ;;  %v1639_v50 = vld [vmem:[%s5147_s11 + $0x8] sm:$0xff] }
 0x8f0   :  { %v4571_v61 = vadd.f32 %v1214_v54, %v1204_v57  ;;  %v1220_v51 = vrot.slane %v4569_v59, 2  ;;  %v1420_v38 = vrot.slane %v4569_v59, 7 }
 0x8f2   :  { %v1221_v3 = vrot.slane %v4571_v61, 2  ;;  %1222 = vrot.lane.b32.xlu0 %v1220_v51, %s3842_s3 }
 0x8f4   :  { %1224 = vrot.lane.b32.xlu1 %v1221_v3, %s3842_s3 }
 0x964   :  { %v1223_v0 = vpop.permute.xlu0 %1222 }
 0x966   :  { %v1225_v43 = vpop.permute.xlu1 %1224 }
 0x967   :  { %v1226_v1 = vsel %vm222_vm3, %v1223_v0, %v1225_v43  ;;  %v1732_v43 = vsel %vm1731_vm5, %v1638_v53, 0.0 }
 0x968   :  { %3051 = vmatmul.mubr.msk.f32.vlgmr.msra.gmra.mxu1 %vm364_vm2, %v1226_v1  ;;  %3437 = vmatmul.mubr.msk.f32.vlgmr.msra.gmra.mxu0 %vm364_vm2, %v1226_v1 }
 0x969   :  { %3466 = vmatprep.mubr.msk.f32.mxu0 %vm3839_vm0, %v5192_v40  ;;  %3455 = vmatprep.mubr.msk.f32.mxu1 %vm3839_vm0, %v5192_v40 }
 0x96a   :  { %3459 = vmatpush3.msra.mxu0 %v1541_v30  ;;  %v1451_v30 = vld [vmem:[%s5195_s9 + $0x30] sm:$0xff] }
 0x96b   :  { %3460 = vmatprep.subr.mxu0 %v5192_v40 }
 0x96c   :  { %3461 = vmatpush3.msra.mxu0 %v1540_v31  ;;  %v1449_v31 = vld [vmem:[%s5195_s9 + $0x20] sm:$0xff] }
 0x96d   :  { %3462 = vmatprep.subr.mxu0 %v5192_v40 }
 0xa28   :  { %v1295_v27 = vpop.f32.mrf.mxu1  ;;  %v1366_v28 = vpop.f32.mrf.mxu0 }
 0xa29   :  { %v1367_v29 = vadd.f32 %v1366_v28, %v4371_v60  ;;  %v1539_v60 = vld [vmem:[%s5151_s15 + $0x8] sm:$0xff]  ;;  %v1296_v13 = vadd.f32 %v1295_v27, %v4377_v2  ;;  %v1421_v2 = vrot.slane %v4571_v61, 7  ;;  %v1735_v28 = vsel %vm1731_vm5, %v1639_v50, 0.0  ;;  %v4758_v61 = vld [vmem:[%s5148_s12] sm:$0xff]  ;;  %s3095_s15 = sld [smem:[#allocation8 + $0x3]] }
 0xa2a   :  { %v1297_v32 = vpop.f32.mrf.mxu1  ;;  %v3438_v33 = vpop.f32.mrf.mxu0  ;;  %3463 = vmatpush3.msra.mxu0 %v1539_v60 }
 0xa2b   :  { %v1391_v34 = vrot.slane %v1367_v29, 5  ;;  %v4592_v35 = vadd.f32 %v1297_v32, %v4369_v58  ;;  %v1535_v58 = vld [vmem:[%s5193_s6] sm:$0xff]  ;;  %3464 = vmatprep.subr.mxu0 %v5192_v40  ;;  %v1371_v14 = vrot.slane %v1296_v13, 5  ;;  %v1452_v29 = vld [vmem:[%s5195_s9 + $0x38] sm:$0xff]  ;;  %v1447_v33 = vld [vmem:[%s5195_s9 + $0x10] sm:$0xff] }
 0xa2c   :  { %3465 = vmatpush3.msra.mxu0 %v1538_v37  ;;  %3440 = vmatpush3.msra.mxu1 %v1452_v29  ;;  %v1448_v32 = vld [vmem:[%s5195_s9 + $0x18] sm:$0xff]  ;;  %v1846_v29 = vld [vmem:[%s5196_s2 + $0x8] sm:$0xf] }
 0xa2d   :  { %v1381_v36 = vrot.slane %v4592_v35, 5  ;;  %1394 = vrot.lane.b32.xlu1 %v1391_v34, %s3840_s27  ;;  %3467 = vmatmul.mubr.msk.f32.vlgmr.msra.gmra.mxu0 %vm222_vm3, %v1535_v58  ;;  %v1373_v15 = vadd.f32 %v1371_v14, %v4380_v44  ;;  %v1446_v34 = vld [vmem:[%s5195_s9 + $0x8] sm:$0xff] }
 0xa2e   :  { %3469 = vmatprep.mubr.msk.f32.mxu0 %vm3839_vm0, %v5192_v40  ;;  %3475 = vmatprep.subr.mxu0 %v1644_v5 }
 0xa2f   :  { %1392 = vrot.lane.b32.xlu0 %v1381_v36, %s3840_s27  ;;  %3476 = vmatpush3.msra.mxu0 %v1644_v5  ;;  %v3053_v16 = vmul.f32 -1.442695, %v1373_v15  ;;  %v1383_v60 = vadd.f32 %v1381_v36, %v4364_v56  ;;  %v4742_v36 = vld [vmem:[%s5150_s14 + $0x18] sm:$0xff] }
 0xa30   :  { %3477 = vmatprep.subr.mxu0 %v1643_v6  ;;  %3441 = vmatprep.subr.mxu1 %v5192_v40 }
 0xa31   :  { %1430 = vrot.lane.b32.xlu1 %v1420_v38, %s3842_s3  ;;  %3470 = vmatmul.mubr.msk.f32.gmra.mxu0 %vm222_vm3, %v1536_v7  ;;  %3711 = vpow2.f32 %v3053_v16  ;;  %v3054_v37 = vmul.f32 -1.442695, %v1383_v60 }
 0xa32   :  { %3472 = vmatprep.mubr.msk.f32.mxu0 %vm3839_vm0, %v5192_v40  ;;  %3478 = vmatpush3.msra.mxu0 %v1643_v6 }
 0xa33   :  { %3479 = vmatprep.subr.mxu0 %v1642_v8  ;;  %3442 = vmatpush3.msra.mxu1 %v1451_v30  ;;  %v2071_v30 = vld [vmem:[%s5152_s16 + $0x8] sm:$0xff] }
 0xa34   :  { %3480 = vmatpush3.msra.mxu0 %v1642_v8  ;;  %3443 = vmatprep.subr.mxu1 %v5192_v40  ;;  %v1445_v8 = vld [vmem:[%s5195_s9] sm:$0xff] }
 0xa35   :  { %3473 = vmatmul.mubr.msk.f32.gmra.mxu0 %vm222_vm3, %v1537_v9  ;;  %3481 = vmatprep.subr.mxu0 %v1641_v10 }
 0xa36   :  { %3482 = vmatpush3.msra.mxu0 %v1641_v10  ;;  %3483 = vmatprep.mubr.msk.f32.mxu0 %vm222_vm3, %v1636_v11 }
 0xa37   :  { %3486 = vmatprep.subr.mxu0 %v5192_v40 }
 0xa39   :  { %3484 = vmatmul.mubr.msk.f32.vlgmr.msra.gmra.mxu0 %vm222_vm3, %v1637_v12 }
 0xa3a   :  { %3490 = vmatprep.mubr.msk.f32.mxu0 %vm3839_vm0, %v5192_v40 }
 0xa3e   :  { %v3712_v17 = vpop.eup %3711 }
 0xa3f   :  { %v1377_v18 = vadd.f32 1.0, %v3712_v17 }
 0xa41   :  { %3713 = vrcp.f32 %v1377_v18 }
 0xa4e   :  { %v4653_v21 = vpop.eup %3713 }
 0xa4f   :  { %v1407_v7 = vsub.f32 1.0, %v4653_v21 }
 0xa9f   :  { %v1395_v19 = vpop.permute.xlu1 %1394 }
 0xaa1   :  { %v1393_v20 = vpop.permute.xlu0 %1392 }
 0xaa2   :  { %v1396_v22 = vsel %vm141_vm1, %v1393_v20, %v1395_v19 }
 0xaa3   :  { %v1398_v23 = vmul.f32 %v4653_v21, %v1396_v22  ;;  %v1431_v57 = vpop.permute.xlu1 %1430 }
 0xaa5   :  { %1400 = vrot.lane.b32.xlu0 %v1398_v23, %s3840_s27 }
 0xaa9   :  { %1432 = vrot.lane.b32.xlu0 %v1421_v2, %s3842_s3 }
 0xaed   :  { %v4662_v44 = vpop.f32.mrf.mxu0 }
 0xaef   :  { %v3468_v24 = vpop.f32.mrf.mxu0 }
 0xaf0   :  { %v4770_v24 = vld [vmem:[%s5148_s12 + $0x10] sm:$0xff] }
 0xaf1   :  { %v4664_v25 = vpop.f32.mrf.mxu0 }
 0xaf3   :  { %v3471_v26 = vpop.f32.mrf.mxu0 }
 0xaf5   :  { %v4666_v39 = vpop.f32.mrf.mxu0 }
 0xaf7   :  { %v3474_v45 = vpop.f32.mrf.mxu0 }
 0xaf8   :  { %v1947_v45 = vsel %vm1940_vm6, %v4770_v24, 0.0 }
 0xaf9   :  { %v3485_v46 = vpop.f32.mrf.mxu0 }
 0xafa   :  { %v1728_v47 = vadd.f32 %v3485_v46, %v3060_v63 }
 0xafb   :  { %v1722_v48 = vpop.f32.mrf.mxu0 }
 0xafc   :  { %v1723_v4 = vadd.f32 %v3060_v63, %v1722_v48  ;;  %3487 = vmatpush3.msra.mxu0 %v1728_v47  ;;  %v3056_v63 = vld [vmem:[%s5156_s20 + $0x1] ss:$0 sm:$0xff] }
 0xafd   :  { %3488 = vmatprep.subr.mxu0 %v5192_v40  ;;  %v4782_v47 = vadd.f32 %v3056_v63, %v4662_v44 }
 0xafe   :  { %3489 = vmatpush3.msra.mxu0 %v1723_v4 }
 0xaff   :  { %3523 = vmatprep.subr.mxu0 %v5192_v40  ;;  %3491 = vmatmul.mubr.msk.f32.vlgmr.msra.gmra.mxu0 %vm1731_vm5, %v1638_v53 }
 0xb00   :  { %3493 = vmatprep.mubr.msk.f32.mxu0 %vm3839_vm0, %v5192_v40 }
 0xb03   :  { %3494 = vmatmul.mubr.msk.f32.gmra.mxu0 %vm1731_vm5, %v1639_v50  ;;  %v2076_v50 = vld [vmem:[%s5152_s16 + $0x30] sm:$0xff] }
 0xb04   :  { %3496 = vmatprep.mubr.msk.f32.mxu0 %vm3839_vm0, %v5192_v40 }
 0xb17   :  { %v1401_v52 = vpop.permute.xlu0 %1400 }
 0xb18   :  { %v1403_v41 = vadd.f32 %v1401_v52, %v4364_v56  ;;  %v1404_v42 = vadd.f32 %v1401_v52, %v4362_v49  ;;  %v1640_v49 = vld [vmem:[%s5147_s11 + $0x10] sm:$0xff]  ;;  %v1424_v56 = vmul.f32 %v4653_v21, %v1420_v38  ;;  %v4787_v52 = vadd.f32 %v3056_v63, %v4666_v39  ;;  %v2077_v39 = vld [vmem:[%s5152_s16 + $0x38] sm:$0xff] }
 0xb19   :  { %3497 = vmatmul.mubr.msk.f32.gmra.mxu0 %vm1731_vm5, %v1640_v49  ;;  %v1738_v27 = vsel %vm1731_vm5, %v1640_v49, 0.0  ;;  %v2074_v49 = vld [vmem:[%s5152_s16 + $0x20] sm:$0xff] }
 0xb1a   :  { %3715 = vtanh.f32 %v1403_v41  ;;  %3539 = vmatprep.mubr.msk.f32.mxu0 %vm3839_vm0, %v5192_v40  ;;  %3524 = vmatpush3.msra.mxu0 %v2077_v39 }
 0xb1b   :  { %3717 = vtanh.f32 %v1404_v42  ;;  %v1433_v54 = vpop.permute.xlu0 %1432  ;;  %v4792_v42 = vadd.f32 %v3056_v63, %v4664_v25  ;;  %3525 = vmatprep.subr.mxu0 %v5192_v40  ;;  %v2075_v25 = vld [vmem:[%s5152_s16 + $0x28] sm:$0xff] }
 0xb1c   :  { %v1434_v3 = vsel %vm222_vm3, %v1431_v57, %v1433_v54  ;;  %3719 = vpow2.f32 %v3054_v37  ;;  %3526 = vmatpush3.msra.mxu0 %v2076_v50  ;;  %v2073_v54 = vld [vmem:[%s5152_s16 + $0x18] sm:$0xff]  ;;  %v2072_v57 = vld [vmem:[%s5152_s16 + $0x10] sm:$0xff] }
 0xb1d   :  { %v1436_v1 = vmul.f32 %v1434_v3, %v4394_v62  ;;  %v1450_v62 = vld [vmem:[%s5195_s9 + $0x28] sm:$0xff]  ;;  %3527 = vmatprep.subr.mxu0 %v5192_v40 }
 0xb1e   :  { %3444 = vmatpush3.msra.mxu1 %v1450_v62  ;;  %3528 = vmatpush3.msra.mxu0 %v2075_v25  ;;  %v2070_v62 = vld [vmem:[%s5152_s16] sm:$0xff]  ;;  %s3807_s16 = scalar_lea.vmem %s3022_s29, 32 }
 0xb1f   :  { %3445 = vmatprep.subr.mxu1 %v5192_v40  ;;  %3529 = vmatprep.subr.mxu0 %v5192_v40 }
 0xb20   :  { %3446 = vmatpush3.msra.mxu1 %v1449_v31  ;;  %3530 = vmatpush3.msra.mxu0 %v2074_v49  ;;  %v3074_v49 = vld [vmem:[%s5156_s20 + $0x3] ss:$0 sm:$0xff] }
 0xb21   :  { %3447 = vmatprep.subr.mxu1 %v5192_v40  ;;  %3531 = vmatprep.subr.mxu0 %v5192_v40 }
 0xb22   :  { %3448 = vmatpush3.msra.mxu1 %v1448_v32  ;;  %3532 = vmatpush3.msra.mxu0 %v2073_v54 }
 0xb23   :  { %3449 = vmatprep.subr.mxu1 %v5192_v40  ;;  %3533 = vmatprep.subr.mxu0 %v5192_v40 }
 0xb24   :  { %3450 = vmatpush3.msra.mxu1 %v1447_v33  ;;  %3534 = vmatpush3.msra.mxu0 %v2072_v57 }
 0xb25   :  { %3451 = vmatprep.subr.mxu1 %v5192_v40  ;;  %3535 = vmatprep.subr.mxu0 %v5192_v40 }
 0xb26   :  { %3452 = vmatpush3.msra.mxu1 %v1446_v34  ;;  %3536 = vmatpush3.msra.mxu0 %v2071_v30  ;;  %v1453_v34 = vld [vmem:[%s5156_s20] sm:$0x1] }
 0xb27   :  { %v3716_v51 = vpop.eup %3715  ;;  %3453 = vmatprep.subr.mxu1 %v5192_v40  ;;  %3537 = vmatprep.subr.mxu0 %v5192_v40 }
 0xb28   :  { %v3718_v0 = vpop.eup %3717  ;;  %1411 = vrot.lane.b32.xlu1 %v3716_v51, %s3842_s3  ;;  %3454 = vmatpush3.msra.mxu1 %v1445_v8  ;;  %v3066_v8 = vld [vmem:[%s5155_s19 + $0x1] ss:$0 sm:$0xff] }
 0xb29   :  { %1413 = vrot.lane.b32.xlu0 %v3718_v0, %s3842_s3  ;;  %v3720_v58 = vpop.eup %3719  ;;  %3499 = vmatprep.subr.mxu1 %v4742_v36  ;;  %v1845_v0 = vld [vmem:[%s5196_s2] sm:$0xff] }
 0xb2a   :  { %v1387_v5 = vadd.f32 1.0, %v3720_v58  ;;  %3538 = vmatpush3.msra.mxu0 %v2070_v62  ;;  %v2429_v62 = vld [vmem:[%s5154_s18 + $0x10] sm:$0xff] }
 0xb2b   :  { %3559 = vmatprep.subr.mxu0 %v5192_v40 }
 0xb2c   :  { %1438 = vrot.lane.b32.xlu1 %v1436_v1, %s3843_s8  ;;  %3721 = vrcp.f32 %v1387_v5  ;;  %v1852_v1 = vld [vmem:[%s5150_s14 + $0x10] sm:$0xff] }
 0xb39   :  { %v3722_v6 = vpop.eup %3721 }
 0xb3a   :  { %v1408_v11 = vsub.f32 1.0, %v3722_v6  ;;  %v1425_v13 = vmul.f32 %v3722_v6, %v1421_v2  ;;  %v1941_v2 = vsel %vm1940_vm6, %v4758_v61, 0.0 }
 0xb9a   :  { %v1412_v9 = vpop.permute.xlu1 %1411 }
 0xb9b   :  { %v1414_v10 = vpop.permute.xlu0 %1413  ;;  %v1418_v35 = vmul.f32 %v1412_v9, %v1407_v7 }
 0xb9c   :  { %v1415_v12 = vsel %vm222_vm3, %v1412_v9, %v1414_v10 }
 0xb9d   :  { %v1419_v14 = vmul.f32 %v1415_v12, %v1408_v11  ;;  %v1426_v15 = vadd.f32 %v1424_v56, %v1418_v35  ;;  %v2155_v35 = vld [vmem:[%s5153_s17 + $0x18] sm:$0xff]  ;;  %v2154_v12 = vld [vmem:[%s5153_s17 + $0x10] sm:$0xff] }
 0xb9e   :  { %v1439_v17 = vpop.permute.xlu1 %1438 }
 0xb9f   :  { %v1427_v16 = vadd.f32 %v1425_v13, %v1419_v14  ;;  %v1428_v59 = vmul.f32 %v1426_v15, %v4392_v55  ;;  %v2153_v14 = vld [vmem:[%s5153_s17 + $0x8] sm:$0xff] }
 0xba1   :  { %v1429_v38 = vmul.f32 %v1427_v16, %v4392_v55  ;;  %v1441_v18 = vadd.f32 %v1439_v17, %v1428_v59  ;;  %v4763_v55 = vld [vmem:[%s5148_s12 + $0x8] sm:$0xff]  ;;  %v2152_v16 = vld [vmem:[%s5153_s17] sm:$0xff]  ;;  %s2876_s17 = sld [smem:[#allocation8]] }
 0xba2   :  { %v1944_v26 = vsel %vm1940_vm6, %v4763_v55, 0.0  ;;  %s3094_s12 = sld [smem:[#allocation8 + $0x2]] }
 0xba3   :  { %v4750_v19 = vadd.f32 %v1439_v17, %v1429_v38  ;;  %v1443_v20 = vmax.f32 %v1441_v18, 0.0 }
 0xba5   :  { %v1444_v21 = vmax.f32 %v4750_v19, 0.0  ;;  %v1456_v22 = vrot.slane %v1443_v20, 3 }
 0xba7   :  { %1458 = vrot.lane.b32.xlu0 %v1456_v22, %s3842_s3  ;;  %v1457_v23 = vrot.slane %v1444_v21, 3 }
 0xba9   :  { %1460 = vrot.lane.b32.xlu1 %v1457_v23, %s3842_s3 }
 0xbbf   :  { %v4779_v46 = vpop.f32.mrf.mxu0 }
 0xbc1   :  { %v3492_v48 = vpop.f32.mrf.mxu0 }
 0xbc3   :  { %v4784_v4 = vpop.f32.mrf.mxu0 }
 0xbc5   :  { %v3495_v41 = vpop.f32.mrf.mxu0 }
 0xbc6   :  { %1733 = vadd.xlane.f32.xlu0 %v1732_v43 }
 0xbca   :  { %1739 = vadd.xlane.f32.xlu0 %v1738_v27  ;;  %v1851_v27 = vld [vmem:[%s5150_s14 + $0x8] sm:$0xff] }
 0xbcd   :  { %1736 = vadd.xlane.f32.xlu1 %v1735_v28  ;;  %v1850_v28 = vld [vmem:[%s5150_s14] sm:$0xff]  ;;  %s3098_s14 = sld [smem:[#allocation8 + $0x5]] }
 0xbce   :  { %1942 = vadd.xlane.f32.xlu0 %v1941_v2 }
 0xbd1   :  { %1945 = vadd.xlane.f32.xlu1 %v1944_v26 }
 0xbd2   :  { %1948 = vadd.xlane.f32.xlu0 %v1947_v45 }
 0xbd9   :  { %v4794_v53 = vpop.f32.mrf.mxu0 }
 0xbdb   :  { %v3498_v44 = vpop.f32.mrf.mxu0 }
 0xbe2   :  { %2055 = vrot.lane.b32.xlu1 %v4782_v47, %s3843_s8 }
 0xbe6   :  { %2059 = vrot.lane.b32.xlu1 %v4787_v52, %s3843_s8 }
 0xbe8   :  { %2057 = vrot.lane.b32.xlu0 %v4792_v42, %s3843_s8 }
 0xc19   :  { %v1459_v51 = vpop.permute.xlu0 %1458 }
 0xc1b   :  { %v1461_v3 = vpop.permute.xlu1 %1460 }
 0xc1c   :  { %v1462_v43 = vsel %vm222_vm3, %v1459_v51, %v1461_v3 }
 0xc1d   :  { %3456 = vmatmul.mubr.msk.f32.vlgmr.msra.gmra.mxu1 %vm141_vm1, %v1462_v43  ;;  %v2078_v43 = vld [vmem:[%s5156_s20 + $0x2] sm:$0x1] }
 0xc1e   :  { %3500 = vmatpush3.msra.mxu1 %v4742_v36  ;;  %3507 = vmatprep.mubr.msk.f32.mxu1 %vm222_vm3, %v1845_v0 }
 0xc1f   :  { %3501 = vmatprep.subr.mxu1 %v1852_v1 }
 0xc20   :  { %3502 = vmatpush3.msra.mxu1 %v1852_v1 }
 0xc21   :  { %3503 = vmatprep.subr.mxu1 %v1851_v27 }
 0xc22   :  { %3504 = vmatpush3.msra.mxu1 %v1851_v27 }
 0xc23   :  { %3505 = vmatprep.subr.mxu1 %v1850_v28 }
 0xc24   :  { %3506 = vmatpush3.msra.mxu1 %v1850_v28 }
 0xc25   :  { %3508 = vmatmul.mubr.msk.f32.vlgmr.msra.gmra.mxu1 %vm222_vm3, %v1846_v29  ;;  %3510 = vmatprep.subr.mxu1 %v5192_v40  ;;  %v2430_v29 = vld [vmem:[%s5154_s18 + $0x18] sm:$0xff] }
 0xc26   :  { %3514 = vmatprep.mubr.msk.f32.mxu1 %vm3839_vm0, %v5192_v40 }
 0xc4f   :  { %v1734_v31 = vpop.xlane.xlu0 %1733 }
 0xc50   :  { %v1741_v32 = vadd.f32 1e-08, %v1734_v31 }
 0xc52   :  { %3723 = vrcp.f32 %v1741_v32 }
 0xc53   :  { %v1740_v58 = vpop.xlane.xlu0 %1739 }
 0xc54   :  { %v1743_v7 = vadd.f32 1e-08, %v1740_v58 }
 0xc56   :  { %v1737_v33 = vpop.xlane.xlu1 %1736 }
 0xc57   :  { %v1742_v60 = vadd.f32 1e-08, %v1737_v33  ;;  %v1943_v48 = vpop.xlane.xlu0 %1942 }
 0xc59   :  { %3725 = vrcp.f32 %v1742_v60 }
 0xc5a   :  { %3727 = vrcp.f32 %v1743_v7 }
 0xc5b   :  { %v1949_v50 = vpop.xlane.xlu0 %1948 }
 0xc5c   :  { %v1952_v25 = vadd.f32 1e-08, %v1949_v50 }
 0xc5f   :  { %v3724_v36 = vpop.eup %3723  ;;  %v2058_v58 = vpop.permute.xlu0 %2057 }
 0xc60   :  { %v1834_v13 = vmul.f32 %v3724_v36, %v4779_v46 }
 0xc62   :  { %v1839_v59 = vadd.f32 %v1834_v13, %v4782_v47 }
 0xc64   :  { %v1842_v18 = vmax.f32 %v1839_v59, 0.0 }
 0xc66   :  { %v3726_v15 = vpop.eup %3725 }
 0xc67   :  { %v1836_v17 = vmul.f32 %v3726_v15, %v4784_v4  ;;  %v3728_v38 = vpop.eup %3727  ;;  %v1950_v4 = vadd.f32 1e-08, %v1943_v48 }
 0xc68   :  { %v1838_v21 = vmul.f32 %v3728_v38, %v4794_v53 }
 0xc69   :  { %v1840_v20 = vadd.f32 %v1836_v17, %v4792_v42  ;;  %v1946_v42 = vpop.xlane.xlu1 %1945  ;;  %3729 = vrcp.f32 %v1950_v4 }
 0xc6a   :  { %v1841_v23 = vadd.f32 %v1838_v21, %v4787_v52  ;;  %v1951_v53 = vadd.f32 1e-08, %v1946_v42 }
 0xc6b   :  { %v1843_v22 = vmax.f32 %v1840_v20, 0.0 }
 0xc6c   :  { %3731 = vrcp.f32 %v1951_v53 }
 0xc6d   :  { %3733 = vrcp.f32 %v1952_v25  ;;  %v2056_v31 = vpop.permute.xlu1 %2055 }
 0xc76   :  { %v3730_v0 = vpop.eup %3729 }
 0xc79   :  { %v3732_v30 = vpop.eup %3731 }
 0xc7a   :  { %v3734_v60 = vpop.eup %3733 }
 0xcdd   :  { %v1531_v37 = vpop.f32.mrf.mxu1 }
 0xcde   :  { %v4858_v5 = vadd.f32 %v1531_v37, %v1453_v34  ;;  %v2428_v34 = vld [vmem:[%s5154_s18 + $0x8] sm:$0xff]  ;;  %v2427_v37 = vld [vmem:[%s5154_s18] sm:$0xff]  ;;  %s3803_s18 = scalar_lea.vmem %s3022_s29, 16 }
 0xcdf   :  { %v3457_v6 = vpop.f32.mrf.mxu1  ;;  %p3804_p1 = scmp.ne.s32.totalorder %s3022_s29, %s3803_s18  ;;  %p3809_p3 = scmp.lt.s32.totalorder %s3807_s16, %s3803_s18 }
 0xce0   :  { %3540 = vmatmul.mubr.msk.f32.vlgmr.msra.gmra.mxu0 %vm141_vm1, %v4858_v5 }
 0xce1   :  { %3565 = vmatprep.mubr.msk.f32.mxu0 %vm3839_vm0, %v5192_v40  ;;  %p3810_p4 = por %p3809_p3, %p3808_p2 }
 0xce3   :  { %p3811_p5 = pnand %p3810_p4, %p3804_p1 }
 0xce5   :  { %v3509_v9 = vpop.f32.mrf.mxu1 }
 0xce6   :  { %v1937_v10 = vadd.f32 %v3509_v9, %v3066_v8  ;;  %v2060_v9 = vpop.permute.xlu1 %2059 }
 0xce7   :  { %v1931_v11 = vpop.f32.mrf.mxu1 }
 0xce8   :  { %v1932_v56 = vadd.f32 %v3066_v8, %v1931_v11  ;;  %3511 = vmatpush3.msk.msra.mxu1 %vm1962_vm7, %v1937_v10 }
 0xce9   :  { %3512 = vmatprep.subr.mxu1 %v5192_v40 }
 0xcea   :  { %3513 = vmatpush3.msra.mxu1 %v1932_v56 }
 0xceb   :  { %3515 = vmatmul.mubr.msk.f32.vlgmr.msra.gmra.mxu1 %vm1940_vm6, %v4758_v61  ;;  %3542 = vmatprep.subr.mxu1 %v5192_v40  ;;  %v1844_v61 = vmax.f32 %v1841_v23, 0.0 }
 0xcec   :  { %3543 = vmatpush3.msra.mxu1 %v2155_v35  ;;  %3517 = vmatprep.mubr.msk.f32.mxu1 %vm3839_vm0, %v5192_v40 }
 0xced   :  { %3544 = vmatprep.subr.mxu1 %v5192_v40 }
 0xcee   :  { %3545 = vmatpush3.msra.mxu1 %v2154_v12 }
 0xcef   :  { %3518 = vmatmul.mubr.msk.f32.gmra.mxu1 %vm1940_vm6, %v4763_v55  ;;  %3546 = vmatprep.subr.mxu1 %v5192_v40 }
 0xcf0   :  { %3520 = vmatprep.mubr.msk.f32.mxu1 %vm3839_vm0, %v5192_v40  ;;  %3547 = vmatpush3.msra.mxu1 %v2153_v14 }
 0xcf1   :  { %3548 = vmatprep.subr.mxu1 %v5192_v40 }
 0xcf2   :  { %3549 = vmatpush3.msra.mxu1 %v2152_v16 }
 0xcf3   :  { %3521 = vmatmul.mubr.msk.f32.gmra.mxu1 %vm1940_vm6, %v4770_v24  ;;  %3568 = vmatprep.subr.mxu1 %v5192_v40 }
 0xcf4   :  { %3550 = vmatprep.mubr.msk.f32.mxu1 %vm3839_vm0, %v5192_v40 }
 0xcf7   :  { %3551 = vmatmul.mubr.msk.f32.vlgmr.msra.gmra.mxu1 %vm222_vm3, %v1842_v18 }
 0xcf8   :  { %3553 = vmatprep.mubr.msk.f32.mxu1 %vm3839_vm0, %v5192_v40 }
 0xcfb   :  { %3554 = vmatmul.mubr.msk.f32.gmra.mxu1 %vm222_vm3, %v1843_v22 }
 0xcfc   :  { %3556 = vmatprep.mubr.msk.f32.mxu1 %vm3839_vm0, %v5192_v40 }
 0xcff   :  { %3557 = vmatmul.mubr.msk.f32.gmra.mxu1 %vm222_vm3, %v1844_v61 }
 0xd00   :  { %3574 = vmatprep.mubr.msk.f32.mxu1 %vm3839_vm0, %v5192_v40 }
 0xda0   :  { %v2148_v55 = vpop.f32.mrf.mxu0 }
 0xda1   :  { %v2149_v27 = vadd.f32 %v2148_v55, %v2078_v43 }
 0xda2   :  { %v3541_v2 = vpop.f32.mrf.mxu0 }
 0xdab   :  { %v2032_v24 = vpop.f32.mrf.mxu1 }
 0xdac   :  { %v2047_v28 = vmul.f32 %v3730_v0, %v2032_v24 }
 0xdad   :  { %v3516_v26 = vpop.f32.mrf.mxu1 }
 0xdae   :  { %v2064_v32 = vadd.f32 %v2056_v31, %v2047_v28  ;;  %v3083_v26 = vld [vmem:[%s5156_s20 + $0x4] ss:$0 sm:$0xff]  ;;  %v2704_v28 = vsel %vm2703_vm10, %v4858_v5, 0.0 }
 0xdaf   :  { %v2037_v45 = vpop.f32.mrf.mxu1 }
 0xdb0   :  { %v2049_v33 = vmul.f32 %v3732_v30, %v2037_v45  ;;  %v2067_v6 = vmax.f32 %v2064_v32, 0.0 }
 0xdb1   :  { %v3519_v63 = vpop.f32.mrf.mxu1 }
 0xdb2   :  { %v2065_v7 = vadd.f32 %v2058_v58, %v2049_v33 }
 0xdb3   :  { %v2042_v46 = vpop.f32.mrf.mxu1 }
 0xdb4   :  { %v2051_v8 = vmul.f32 %v3734_v60, %v2042_v46  ;;  %v2068_v10 = vmax.f32 %v2065_v7, 0.0  ;;  %v2721_v60 = vld [vmem:[%s5155_s19 + $0x5] sm:$0x1] }
 0xdb5   :  { %v3522_v47 = vpop.f32.mrf.mxu1 }
 0xdb6   :  { %v2066_v11 = vadd.f32 %v2060_v9, %v2051_v8  ;;  %v2791_v9 = vld [vmem:[#allocation6 + $0x78] sm:$0xff] }
 0xdb7   :  { %v2236_v52 = vpop.f32.mrf.mxu1 }
 0xdb8   :  { %v2237_v1 = vadd.f32 %v3074_v49, %v2236_v52  ;;  %v2069_v56 = vmax.f32 %v2066_v11, 0.0  ;;  %v2789_v11 = vld [vmem:[#allocation6 + $0x68] sm:$0xff] }
 0xdb9   :  { %v3552_v41 = vpop.f32.mrf.mxu1 }
 0xdbb   :  { %v2241_v44 = vpop.f32.mrf.mxu1 }
 0xdbc   :  { %v2242_v3 = vadd.f32 %v3074_v49, %v2241_v44 }
 0xdbd   :  { %v3555_v39 = vpop.f32.mrf.mxu1 }
 0xdbf   :  { %v2246_v54 = vpop.f32.mrf.mxu1 }
 0xdc0   :  { %v4915_v57 = vadd.f32 %v3074_v49, %v2246_v54 }
 0xdc1   :  { %v3558_v51 = vpop.f32.mrf.mxu1 }
 0xdc2   :  { %3560 = vmatpush3.xpose.msk.msra.mxu0 %vm222_vm3, %v4915_v57 }
 0xdc3   :  { %3561 = vmatprep.subr.mxu0 %v5192_v40 }
 0xdc6   :  { %3562 = vmatpush3.xpose.msk.msra.mxu0 %vm222_vm3, %v2242_v3 }
 0xdc7   :  { %3563 = vmatprep.subr.mxu0 %v5192_v40 }
 0xdca   :  { %3564 = vmatpush3.xpose.msk.msra.mxu0 %vm222_vm3, %v2237_v1 }
 0xdcb   :  { %3577 = vmatprep.subr.mxu0 %v5192_v40 }
 0xdcd   :  { %3566 = vmatmul.mubr.msk.f32.vlgmr.msra.gmra.mxu0 %vm222_vm3, %v2149_v27 }
 0xdce   :  { %3578 = vmatpush3.msra.mxu0 %v2430_v29  ;;  %3585 = vmatprep.mubr.msk.f32.mxu0 %vm3839_vm0, %v5192_v40  ;;  %v2720_v29 = vld [vmem:[%s5155_s19 + $0x4] sm:$0x1] }
 0xdcf   :  { %3579 = vmatprep.subr.mxu0 %v5192_v40 }
 0xdd0   :  { %3580 = vmatpush3.msra.mxu0 %v2429_v62 }
 0xdd1   :  { %3581 = vmatprep.subr.mxu0 %v5192_v40 }
 0xdd2   :  { %3582 = vmatpush3.msra.mxu0 %v2428_v34 }
 0xdd3   :  { %3583 = vmatprep.subr.mxu0 %v5192_v40 }
 0xdd4   :  { %3584 = vmatpush3.msra.mxu0 %v2427_v37 }
 0xdd5   :  { %3586 = vmatmul.mubr.msk.f32.vlgmr.msra.gmra.mxu0 %vm222_vm3, %v2067_v6  ;;  %3603 = vmatprep.subr.mxu0 %v5192_v40 }
 0xdd6   :  { %3588 = vmatprep.mubr.msk.f32.mxu0 %vm3839_vm0, %v5192_v40 }
 0xdd9   :  { %3589 = vmatmul.mubr.msk.f32.gmra.mxu0 %vm222_vm3, %v2068_v10  ;;  %v2790_v10 = vld [vmem:[#allocation6 + $0x70] sm:$0xff] }
 0xdda   :  { %3591 = vmatprep.mubr.msk.f32.mxu0 %vm3839_vm0, %v5192_v40 }
 0xddd   :  { %3592 = vmatmul.mubr.msk.f32.gmra.mxu0 %vm222_vm3, %v2069_v56  ;;  %v2788_v56 = vld [vmem:[#allocation6 + $0x60] sm:$0xff] }
 0xdde   :  { %3609 = vmatprep.mubr.msk.f32.mxu0 %vm3839_vm0, %v5192_v40 }
 0xe8d   :  { %v2328_v35 = vpop.f32.mrf.mxu0 }
 0xe8e   :  { %v2333_v36 = vsel %vm2332_vm8, %v2328_v35, -inf }
 0xe8f   :  { %2334 = vmax.xlane.f32.xlu1 %v2333_v36  ;;  %v3567_v12 = vpop.f32.mrf.mxu0  ;;  %v2785_v36 = vld [vmem:[#allocation6 + $0x48] sm:$0xff] }
 0xe90   :  { %v2784_v12 = vld [vmem:[#allocation6 + $0x40] sm:$0xff] }
 0xe95   :  { %v2511_v13 = vpop.f32.mrf.mxu0 }
 0xe96   :  { %v2512_v47 = vadd.f32 %v3083_v26, %v2511_v13  ;;  %v2783_v13 = vld [vmem:[#allocation6 + $0x38] sm:$0xff] }
 0xe97   :  { %v3587_v14 = vpop.f32.mrf.mxu0 }
 0xe98   :  { %v2782_v14 = vld [vmem:[#allocation6 + $0x30] sm:$0xff] }
 0xe99   :  { %v2516_v15 = vpop.f32.mrf.mxu0 }
 0xe9a   :  { %v2517_v46 = vadd.f32 %v3083_v26, %v2516_v15  ;;  %v2781_v15 = vld [vmem:[#allocation6 + $0x28] sm:$0xff] }
 0xe9b   :  { %v3590_v16 = vpop.f32.mrf.mxu0 }
 0xe9d   :  { %v2521_v59 = vpop.f32.mrf.mxu0 }
 0xe9e   :  { %v2522_v63 = vadd.f32 %v3083_v26, %v2521_v59  ;;  %v2799_v26 = vld [vmem:[#allocation6 + $0xb8] sm:$0xff] }
 0xe9f   :  { %v3593_v17 = vpop.f32.mrf.mxu0 }
 0xea0   :  { %2346 = vrot.lane.b32.xlu1 %v2242_v3, %s3843_s8 }
 0xea4   :  { %2344 = vrot.lane.b32.xlu1 %v2237_v1, %s3843_s8 }
 0xf18   :  { %v2335_v38 = vpop.xlane.xlu1 %2334 }
 0xf19   :  { %v2336_v18 = vsub.f32 %v2328_v35, %v2335_v38  ;;  %v2786_v35 = vld [vmem:[#allocation6 + $0x50] sm:$0xff]  ;;  %v2780_v38 = vld [vmem:[#allocation6 + $0x20] sm:$0xff] }
 0xf1b   :  { %v2337_v20 = vmul.f32 1.442695, %v2336_v18  ;;  %v2779_v18 = vld [vmem:[#allocation6 + $0x18] sm:$0xff] }
 0xf1c   :  { %v2347_v61 = vpop.permute.xlu1 %2346 }
 0xf1d   :  { %3735 = vpow2.f32 %v2337_v20 }
 0xf20   :  { %v2345_v2 = vpop.permute.xlu1 %2344 }
 0xf2a   :  { %v3736_v21 = vpop.eup %3735 }
 0xf2b   :  { %v2339_v22 = vsel %vm2332_vm8, %v3736_v21, 0.0 }
 0xf2c   :  { %2340 = vadd.xlane.f32.xlu0 %v2339_v22  ;;  %v2778_v22 = vld [vmem:[#allocation6 + $0x10] sm:$0xff] }
 0xf42   :  { %2348 = vrot.lane.b32.xlu0 %v4915_v57, %s3843_s8 }
 0xf46   :  { %2525 = vrot.lane.b32.xlu0 %v2149_v27, %s3843_s8 }
 0xf4a   :  { %2722 = vrot.lane.b32.xlu0 %v4858_v5, %s3843_s8 }
 0xfb5   :  { %v2341_v23 = vpop.xlane.xlu0 %2340 }
 0xfb6   :  { %3737 = vrcp.f32 %v2341_v23 }
 0xfb9   :  { %v2349_v55 = vpop.permute.xlu0 %2348 }
 0xfba   :  { %3569 = vmatpush3.msra.mxu1 %v2349_v55 }
 0xfbb   :  { %3570 = vmatprep.subr.mxu1 %v5192_v40 }
 0xfbc   :  { %3571 = vmatpush3.msra.mxu1 %v2347_v61  ;;  %v2777_v61 = vld [vmem:[#allocation6 + $0x8] sm:$0xff] }
 0xfbd   :  { %3572 = vmatprep.subr.mxu1 %v5192_v40  ;;  %v2526_v48 = vpop.permute.xlu0 %2525 }
 0xfbe   :  { %3573 = vmatpush3.msra.mxu1 %v2345_v2 }
 0xfbf   :  { %3594 = vmatprep.subr.mxu1 %v5192_v40 }
 0xfc1   :  { %v2723_v44 = vpop.permute.xlu0 %2722 }
 0xfc2   :  { %v2725_v39 = vsel %vm2703_vm10, %v2723_v44, 0.0 }
 0xfc3   :  { %v3738_v24 = vpop.eup %3737 }
 0xfc4   :  { %v2343_v45 = vmul.f32 %v3738_v24, %v3736_v21  ;;  %v2776_v24 = vld [vmem:[#allocation6] sm:$0xff] }
 0xfc6   :  { %3575 = vmatmul.mubr.msk.f32.vlgmr.msra.gmra.mxu1 %vm2353_vm9, %v2343_v45 }
 0xfc7   :  { %3595 = vmatpush3.xpose.msk.msra.mxu1 %vm222_vm3, %v2522_v63  ;;  %3600 = vmatprep.mubr.msk.f32.mxu1 %vm3839_vm0, %v5192_v40 }
 0xfc8   :  { %3596 = vmatprep.subr.mxu1 %v5192_v40 }
 0xfcb   :  { %3597 = vmatpush3.xpose.msk.msra.mxu1 %vm222_vm3, %v2517_v46 }
 0xfcc   :  { %3598 = vmatprep.subr.mxu1 %v5192_v40 }
 0xfcf   :  { %3599 = vmatpush3.xpose.msk.msra.mxu1 %vm222_vm3, %v2512_v47 }
 0xfd0   :  { %2804 = vmatprep.subr.mxu1 %v5192_v40 }
 0xfd2   :  { %3601 = vmatmul.mubr.msk.f32.vlgmr.msra.gmra.mxu1 %vm222_vm3, %v2526_v48  ;;  %v2796_v48 = vld [vmem:[#allocation6 + $0xa0] sm:$0xff] }
 0xfd3   :  { %2805 = vmatpush1.msra.mxu1 %v2791_v9  ;;  %v2919_v9 = vld [vmem:[%s5160_s24 + $0x48] sm:$0xff] }
 0xfd4   :  { %2806 = vmatprep.subr.mxu1 %v5192_v40 }
 0xfd5   :  { %2807 = vmatpush1.msra.mxu1 %v2790_v10  ;;  %v2918_v10 = vld [vmem:[%s5160_s24 + $0x40] sm:$0xff] }
 0xfd6   :  { %2808 = vmatprep.subr.mxu1 %v5192_v40 }
 0xfd7   :  { %2809 = vmatpush1.msra.mxu1 %v2789_v11  ;;  %v2917_v11 = vld [vmem:[%s5160_s24 + $0x38] sm:$0xff] }
 0xfd8   :  { %2810 = vmatprep.subr.mxu1 %v5192_v40 }
 0xfd9   :  { %2811 = vmatpush1.msra.mxu1 %v2788_v56  ;;  %v2916_v56 = vld [vmem:[%s5160_s24 + $0x30] sm:$0xff] }
 0xfda   :  { %2812 = vmatprep.subr.mxu1 %v5192_v40 }
0x1086   :  { %v4980_v4 = vpop.f32.mrf.mxu1 }
0x1088   :  { %v3576_v52 = vpop.f32.mrf.mxu1 }
0x1089   :  { %v2765_v52 = vrot.slane %v4750_v19, 3  ;;  %v2792_v19 = vld [vmem:[#allocation6 + $0x80] sm:$0xff] }
0x1092   :  { %v2604_v41 = vpop.f32.mrf.mxu1 }
0x1093   :  { %v2608_v42 = vsel %vm2332_vm8, %v2604_v41, -inf }
0x1094   :  { %2609 = vmax.xlane.f32.xlu1 %v2608_v42  ;;  %v3602_v53 = vpop.f32.mrf.mxu1  ;;  %v2793_v42 = vld [vmem:[#allocation6 + $0x88] sm:$0xff] }
0x10a5   :  { %2623 = vrot.lane.b32.xlu1 %v2522_v63, %s3843_s8  ;;  %v2798_v63 = vld [vmem:[#allocation6 + $0xb0] sm:$0xff] }
0x10a9   :  { %2619 = vrot.lane.b32.xlu1 %v2512_v47, %s3843_s8  ;;  %v2797_v47 = vld [vmem:[#allocation6 + $0xa8] sm:$0xff] }
0x10cd   :  { %2726 = vadd.xlane.f32.xlu1 %v2725_v39 }
0x111d   :  { %v2610_v50 = vpop.xlane.xlu1 %2609 }
0x111e   :  { %v2611_v25 = vsub.f32 %v2604_v41, %v2610_v50  ;;  %v2795_v41 = vld [vmem:[#allocation6 + $0x98] sm:$0xff] }
0x1120   :  { %v2612_v49 = vmul.f32 1.442695, %v2611_v25 }
0x1121   :  { %v2624_v54 = vpop.permute.xlu1 %2623 }
0x1122   :  { %3739 = vpow2.f32 %v2612_v49  ;;  %3604 = vmatpush3.msra.mxu0 %v2624_v54 }
0x1123   :  { %3605 = vmatprep.subr.mxu0 %v5192_v40 }
0x1125   :  { %v2620_v3 = vpop.permute.xlu1 %2619 }
0x112f   :  { %v3740_v57 = vpop.eup %3739 }
0x1130   :  { %v2614_v51 = vsel %vm2332_vm8, %v3740_v57, 0.0 }
0x1131   :  { %2615 = vadd.xlane.f32.xlu0 %v2614_v51 }
0x1147   :  { %2621 = vrot.lane.b32.xlu0 %v2517_v46, %s3843_s8 }
0x1156   :  { %v2727_v0 = vpop.xlane.xlu1 %2726 }
0x1157   :  { %v2728_v43 = vmul.f32 0.03125, %v2727_v0 }
0x1159   :  { %v4990_v1 = vsub.f32 %v4858_v5, %v2728_v43  ;;  %v2701_v43 = vld [vmem:[%s5155_s19 + $0x2] sm:$0x1] }
0x115b   :  { %v2730_v27 = vmul.f32 %v4990_v1, %v4990_v1 }
0x115d   :  { %2732 = vrot.lane.b32.xlu0 %v2730_v27, %s3843_s8  ;;  %v2702_v27 = vld [vmem:[%s5155_s19 + $0x3] sm:$0x1] }
0x117c   :  { %2705 = vadd.xlane.f32.xlu0 %v2704_v28 }
0x1192   :  { %2743 = vrot.lane.b32.xlu0 %v2720_v29, %s3842_s3 }
0x11ba   :  { %v2616_v30 = vpop.xlane.xlu0 %2615 }
0x11bb   :  { %3741 = vrcp.f32 %v2616_v30 }
0x11be   :  { %v2622_v62 = vpop.permute.xlu0 %2621 }
0x11bf   :  { %3606 = vmatpush3.msra.mxu0 %v2622_v62 }
0x11c0   :  { %3607 = vmatprep.subr.mxu0 %v5192_v40 }
0x11c1   :  { %3608 = vmatpush3.msra.mxu0 %v2620_v3 }
0x11c2   :  { %3612 = vmatprep.subr.mxu0 %v5192_v40 }
0x11c8   :  { %v3742_v31 = vpop.eup %3741 }
0x11c9   :  { %v2618_v32 = vmul.f32 %v3742_v31, %v3740_v57 }
0x11cb   :  { %3610 = vmatmul.mubr.msk.f32.vlgmr.msra.gmra.mxu0 %vm2353_vm9, %v2618_v32 }
0x11cc   :  { %3644 = vmatprep.mubr.msk.f32.mxu0 %vm3839_vm0, %v5192_v40  ;;  %vm3844_vm0 = vmmov 1  }
0x11cf   :  { %v2733_v33 = vpop.permute.xlu0 %2732 }
0x11d0   :  { %v2735_v34 = vsel %vm2703_vm10, %v2733_v33, 0.0 }
0x11d1   :  { %2736 = vadd.xlane.f32.xlu1 %v2735_v34 }
0x11e2   :  { %2748 = vrot.lane.b32.xlu1 %v2721_v60, %s3842_s3  ;;  %v2925_v60 = vld [vmem:[%s5160_s24 + $0x78] sm:$0xff] }
0x11e3   :  { %3613 = vmatpush3.msra.mxu0 %v2925_v60 }
0x11e4   :  { %3614 = vmatprep.subr.mxu0 %v5192_v40 }
0x1205   :  { %v2706_v37 = vpop.xlane.xlu0 %2705 }
0x1206   :  { %v2708_v58 = vmul.f32 0.03125, %v2706_v37  ;;  %v2924_v37 = vld [vmem:[%s5160_s24 + $0x70] sm:$0xff] }
0x1207   :  { %3615 = vmatpush3.msra.mxu0 %v2924_v37 }
0x1208   :  { %v5012_v6 = vsub.f32 %v4858_v5, %v2708_v58  ;;  %v2787_v5 = vld [vmem:[#allocation6 + $0x58] sm:$0xff]  ;;  %3616 = vmatprep.subr.mxu0 %v5192_v40  ;;  %v2923_v58 = vld [vmem:[%s5160_s24 + $0x68] sm:$0xff] }
0x1209   :  { %2813 = vmatpush1.msra.mxu1 %v2787_v5  ;;  %v2744_v21 = vpop.permute.xlu0 %2743  ;;  %3617 = vmatpush3.msra.mxu0 %v2923_v58  ;;  %v2915_v5 = vld [vmem:[%s5160_s24 + $0x28] sm:$0xff] }
0x120a   :  { %v2710_v7 = vmul.f32 %v5012_v6, %v5012_v6  ;;  %2814 = vmatprep.subr.mxu1 %v5192_v40  ;;  %3618 = vmatprep.subr.mxu0 %v5192_v40 }
0x120b   :  { %2815 = vmatpush1.msra.mxu1 %v2786_v35  ;;  %v2914_v35 = vld [vmem:[%s5160_s24 + $0x20] sm:$0xff] }
0x120c   :  { %v2711_v8 = vsel %vm2703_vm10, %v2710_v7, 0.0  ;;  %2816 = vmatprep.subr.mxu1 %v5192_v40  ;;  %v2921_v7 = vld [vmem:[%s5160_s24 + $0x58] sm:$0xff] }
0x120d   :  { %2712 = vadd.xlane.f32.xlu1 %v2711_v8  ;;  %2817 = vmatpush1.msra.mxu1 %v2785_v36  ;;  %v2920_v8 = vld [vmem:[%s5160_s24 + $0x50] sm:$0xff]  ;;  %v2913_v36 = vld [vmem:[%s5160_s24 + $0x18] sm:$0xff] }
0x120e   :  { %2818 = vmatprep.subr.mxu1 %v5192_v40 }
0x120f   :  { %2819 = vmatpush1.msra.mxu1 %v2784_v12  ;;  %v2912_v12 = vld [vmem:[%s5160_s24 + $0x10] sm:$0xff] }
0x1210   :  { %2820 = vmatprep.subr.mxu1 %v5192_v40 }
0x1211   :  { %2821 = vmatpush1.msra.mxu1 %v2783_v13  ;;  %v2911_v13 = vld [vmem:[%s5160_s24 + $0x8] sm:$0xff] }
0x1212   :  { %2822 = vmatprep.subr.mxu1 %v5192_v40 }
0x1213   :  { %2823 = vmatpush1.msra.mxu1 %v2782_v14  ;;  %v2910_v14 = vld [vmem:[%s5160_s24] sm:$0xff] }
0x1214   :  { %2824 = vmatprep.subr.mxu1 %v5192_v40 }
0x1215   :  { %2825 = vmatpush1.msra.mxu1 %v2781_v15  ;;  %v2874_v15 = vld [vmem:[%s5159_s23] sm:$0x1] }
0x1216   :  { %2826 = vmatprep.subr.mxu1 %v5192_v40 }
0x1217   :  { %2827 = vmatpush1.msra.mxu1 %v2780_v38  ;;  %v2885_v38 = vstv %s3094_s12 }
0x1218   :  { %2828 = vmatprep.subr.mxu1 %v5192_v40  ;;  %vm2886_vm14 = vcmp.gt.f32.partialorder %v2874_v15, %v2885_v38 }
0x1219   :  { %2829 = vmatpush1.msra.mxu1 %v2779_v18  ;;  %v2888_v18 = vstv %s3095_s15 }
0x121a   :  { %2830 = vmatprep.subr.mxu1 %v5192_v40 }
0x121b   :  { %2831 = vmatpush1.msra.mxu1 %v2778_v22  ;;  %v2800_v22 = vld [vmem:[%s5158_s22] sm:$0x1] }
0x121c   :  { %2832 = vmatprep.subr.mxu1 %v5192_v40 }
0x121d   :  { %2833 = vmatpush1.msra.mxu1 %v2777_v61  ;;  %v2901_v61 = vstv %s3098_s14 }
0x121e   :  { %2834 = vmatprep.subr.mxu1 %v5192_v40 }
0x121f   :  { %2835 = vmatpush1.msra.mxu1 %v2776_v24 }
0x1220   :  { %2852 = vmatprep.subr.mxu1 %v5192_v40 }
0x1221   :  { %2853 = vmatpush2.msra.mxu1 %v2799_v26 }
0x1222   :  { %2854 = vmatprep.subr.mxu1 %v5192_v40 }
0x1223   :  { %2855 = vmatpush2.msra.mxu1 %v2798_v63 }
0x1224   :  { %2856 = vmatprep.subr.mxu1 %v5192_v40 }
0x1225   :  { %2857 = vmatpush2.msra.mxu1 %v2797_v47 }
0x1226   :  { %2858 = vmatprep.subr.mxu1 %v5192_v40 }
0x1227   :  { %2859 = vmatpush2.msra.mxu1 %v2796_v48 }
0x1228   :  { %2860 = vmatprep.subr.mxu1 %v5192_v40 }
0x1229   :  { %2861 = vmatpush2.msra.mxu1 %v2795_v41 }
0x122a   :  { %2862 = vmatprep.subr.mxu1 %v5192_v40 }
0x125a   :  { %v2737_v16 = vpop.xlane.xlu1 %2736 }
0x125b   :  { %v2738_v59 = vmul.f32 0.03125, %v2737_v16  ;;  %v2875_v16 = vld [vmem:[%s5159_s23 + $0x1] sm:$0x1] }
0x125c   :  { %vm2889_vm15 = vcmp.gt.f32.partialorder %v2875_v16, %v2888_v18 }
0x125d   :  { %v2739_v17 = vadd.f32 1e-05, %v2738_v59  ;;  %v2877_v59 = vstv %s2876_s17 }
0x125e   :  { %v2749_v55 = vpop.permute.xlu1 %2748  ;;  %vm2878_vm11 = vcmp.lt.f32.partialorder %v2874_v15, %v2877_v59 }
0x125f   :  { %3743 = vrsqrt.f32 %v2739_v17  ;;  %v2880_v17 = vstv %s3093_s1 }
0x1260   :  { %vm2881_vm12 = vcmp.lt.f32.partialorder %v2875_v16, %v2880_v17 }
0x1261   :  { %vm2882_vm13 = vmand %vm2878_vm11, %vm2881_vm12 }
0x126c   :  { %v3744_v20 = vpop.eup %3743 }
0x126d   :  { %v2741_v23 = vmul.f32 %v3744_v20, %v4990_v1  ;;  %v3097_v20 = vsel %vm2882_vm13, 1.0, %v5192_v40 }
0x126f   :  { %v2746_v2 = vmul.f32 %v2744_v21, %v2741_v23 }
0x1271   :  { %v2751_v45 = vadd.f32 %v2749_v55, %v2746_v2 }
0x1273   :  { %v3666_v46 = vpack.i.bf16 %v2751_v45, %v4980_v4  ;;  %v2794_v4 = vld [vmem:[#allocation6 + $0x90] sm:$0xff] }
0x1274   :  { %2863 = vmatpush2.msra.mxu1 %v2794_v4 }
0x1275   :  { %3667 = vrot.lane.b32.xlu0 %v3666_v46, %s3842_s3  ;;  %2864 = vmatprep.subr.mxu1 %v5192_v40 }
0x1276   :  { %2865 = vmatpush2.msra.mxu1 %v2793_v42 }
0x1277   :  { %2866 = vmatprep.subr.mxu1 %v5192_v40 }
0x1278   :  { %2867 = vmatpush2.msra.mxu1 %v2792_v19 }
0x1279   :  { %2766 = vrot.lane.b32.xlu0 %v2765_v52, %s3843_s8 }
0x128b   :  { %v2697_v53 = vpop.f32.mrf.mxu0 }
0x128c   :  { %2761 = vrot.lane.b32.xlu0 %v2697_v53, %s3843_s8 }
0x128d   :  { %v3611_v44 = vpop.f32.mrf.mxu0 }
0x1296   :  { %v2713_v39 = vpop.xlane.xlu1 %2712 }
0x1297   :  { %v2714_v50 = vmul.f32 0.03125, %v2713_v39 }
0x1299   :  { %v2715_v25 = vadd.f32 1e-05, %v2714_v50 }
0x129b   :  { %3745 = vrsqrt.f32 %v2715_v25 }
0x12a8   :  { %v3746_v3 = vpop.eup %3745 }
0x12a9   :  { %v2717_v0 = vmul.f32 %v3746_v3, %v5012_v6  ;;  %v2922_v6 = vld [vmem:[%s5160_s24 + $0x60] sm:$0xff]  ;;  %s3096_s24 = sld [smem:[#allocation8 + $0x4]] }
0x12aa   :  { %3619 = vmatpush3.msra.mxu0 %v2922_v6 }
0x12ab   :  { %v2718_v1 = vmul.f32 %v2717_v0, %v2701_v43  ;;  %3620 = vmatprep.subr.mxu0 %v5192_v40 }
0x12ac   :  { %3621 = vmatpush3.msra.mxu0 %v2921_v7 }
0x12ad   :  { %v2719_v29 = vadd.f32 %v2718_v1, %v2702_v27  ;;  %3622 = vmatprep.subr.mxu0 %v5192_v40 }
0x12ae   :  { %3623 = vmatpush3.msra.mxu0 %v2920_v8 }
0x12af   :  { %3624 = vmatprep.subr.mxu0 %v5192_v40  ;;  %v2895_v21 = vstv %s3096_s24 }
0x12b0   :  { %3625 = vmatpush3.msra.mxu0 %v2919_v9  ;;  %v2896_v55 = vmul.f32 %v3097_v20, %v2895_v21 }
0x12b1   :  { %3626 = vmatprep.subr.mxu0 %v5192_v40 }
0x12b2   :  { %3627 = vmatpush3.msra.mxu0 %v2918_v10 }
0x12b3   :  { %3628 = vmatprep.subr.mxu0 %v5192_v40 }
0x12b4   :  { %3629 = vmatpush3.msra.mxu0 %v2917_v11 }
0x12b5   :  { %3630 = vmatprep.subr.mxu0 %v5192_v40 }
0x12b6   :  { %3631 = vmatpush3.msra.mxu0 %v2916_v56 }
0x12b7   :  { %3632 = vmatprep.subr.mxu0 %v5192_v40 }
0x12b8   :  { %3633 = vmatpush3.msra.mxu0 %v2915_v5 }
0x12b9   :  { %3634 = vmatprep.subr.mxu0 %v5192_v40 }
0x12ba   :  { %3635 = vmatpush3.msra.mxu0 %v2914_v35 }
0x12bb   :  { %3636 = vmatprep.subr.mxu0 %v5192_v40 }
0x12bc   :  { %3637 = vmatpush3.msra.mxu0 %v2913_v36 }
0x12bd   :  { %3638 = vmatprep.subr.mxu0 %v5192_v40 }
0x12be   :  { %3639 = vmatpush3.msra.mxu0 %v2912_v12 }
0x12bf   :  { %3640 = vmatprep.subr.mxu0 %v5192_v40 }
0x12c0   :  { %3641 = vmatpush3.msra.mxu0 %v2911_v13 }
0x12c1   :  { %3642 = vmatprep.subr.mxu0 %v5192_v40 }
0x12c2   :  { %3643 = vmatpush3.msra.mxu0 %v2910_v14 }
0x12e7   :  { %v3668_v49 = vpop.permute.xlu0 %3667 }
0x12e8   :  { %v3669_v28 = vunpack.i.l.bf16 %v3668_v49  ;;  %v3670_v30 = vunpack.i.h.bf16 %v3668_v49 }
0x12ea   :  { %v2770_v62 = vsel %vm222_vm3, %v2719_v29, %v3669_v28 }
0x12eb   :  { %v2767_v54 = vpop.permute.xlu0 %2766  ;;  %v2771_v31 = vsel %vm141_vm1, %v2770_v62, %v3670_v30 }
0x12ec   :  { %v2773_v57 = vsel %vm222_vm3, %v2767_v54, %v2765_v52 }
0x12ed   :  { %v2775_v51 = vmax.f32 %v2773_v57, 0.0  ;;  %v5197_v57 = vlaneseq }
0x12ef   :  { %3092 = vmatprep.mubr.msk.f32.mxu1 %vm141_vm1, %v2775_v51  ;;  %vm2883_vm1 = vmxor %vm2882_vm13, %vm3844_vm0  ;;  %v3011_v51 = vand.u32 127, %v5197_v57 }
0x12f1   :  { %vm3012_vm5 = vcmp.eq.s32.totalorder %v3011_v51, 127 }
0x12fe   :  { %v2762_v32 = vpop.permute.xlu0 %2761 }
0x12ff   :  { %v2772_v33 = vsel %vm364_vm2, %v2771_v31, %v2762_v32  ;;  %vm2890_vm2 = vmor %vm2886_vm14, %vm2889_vm15 }
0x1300   :  { %v2774_v34 = vmax.f32 %v2772_v33, 0.0  ;;  %vm2891_vm3 = vmand %vm2883_vm1, %vm2890_vm2 }
0x1301   :  { %v3099_v23 = vsel %vm2891_vm3, 1.0, %v5192_v40 }
0x1302   :  { %2869 = vmatmul.mubr.f32.vlgmr.msra.gmra.mxu1 %v2774_v34  ;;  %v2902_v26 = vmul.f32 %v3099_v23, %v2901_v61 }
0x13c2   :  { %v2870_v2 = vpop.f32.mrf.mxu1 }
0x13c3   :  { %v2871_v24 = vadd.f32 %v2870_v2, %v2800_v22 }
0x13c4   :  { %v2872_v45 = vpop.f32.mrf.mxu1 }
0x13c5   :  { %v2897_v63 = vsub.f32 %v2871_v24, %v2896_v55 }
0x13c7   :  { %v2903_v46 = vadd.f32 %v2902_v26, %v2897_v63 }
0x13c9   :  { %v3100_v47 = vmul.f32 -1.442695, %v2903_v46 }
0x13cb   :  { %3747 = vpow2.f32 %v3100_v47 }
0x13d8   :  { %v3748_v48 = vpop.eup %3747 }
0x13d9   :  { %v2907_v52 = vadd.f32 1.0, %v3748_v48 }
0x13db   :  { %3749 = vrcp.f32 %v2907_v52 }
0x13e8   :  { %v3750_v41 = vpop.eup %3749 }
0x13e9   :  { %3645 = vmatmul.mubr.f32.vlgmr.msra.gmra.mxu0 %v3750_v41 }
0x14a9   :  { %v2992_v4 = vpop.f32.mrf.mxu0 }
0x14aa   :  { %v2996_v42 = vmul.f32 %v3750_v41, %v2992_v4 }
0x14ab   :  { %v3646_v19 = vpop.f32.mrf.mxu0 }
0x14ac   :  { %v2998_v40 = vsel %vm2997_vm4, %v2996_v42, 0.0 }
0x14ad   :  { %2999 = vadd.xlane.f32.xlu0 %v2998_v40 }
0x1536   :  { %v3000_v53 = vpop.xlane.xlu0 %2999 }
0x1537   :  { %v3001_v44 = vrot.slane %v3000_v53, 4 }
0x1539   :  { %v3002_v39 = vadd.f32 %v3001_v44, %v3000_v53 }
0x153b   :  { %v3003_v50 = vrot.slane %v3002_v39, 2 }
0x153d   :  { %v3004_v25 = vadd.f32 %v3003_v50, %v3002_v39 }
0x153f   :  { %v3005_v49 = vrot.slane %v3004_v25, 1 }
0x1541   :  { %v3006_v54 = vadd.f32 %v3005_v49, %v3004_v25 }
0x1543   :  { %3647 = vpush %v3006_v54 }
0x1574   :  { %s3648_s22 = spop %3647 }
0x1575   :  { %v3008_v3 = vstv %s3648_s22 }
0x1576   :  { %v3009_v0 = vmul.f32 0.0005, %v3008_v3 }
0x1578   :  { %v3013_v43 = vsel %vm3012_vm5, %v3009_v0, %v2903_v46 }
0x1579   :  { %3014 = vst [vmem:[#allocation9] sm:$0x1] %v3013_v43 }
0x157a   :  { %3814 = shalt.err (!%p3811_p5)
}
0x157b   :  { %3024 = dma.vmem_to_hbm [thread:$0]  %s3022_s29, 16, %s5162_s26, [#allocation4]  }
0x157c   :  { %3829 = dma.done.wait [#allocation4], 16  }
0x157d   :  { %3830 = vsyncadd [#allocation4], 4294967280 }
0x157e   :  { %3028 = vsyncpa [#allocation3], 1 }
0x157f   :  { %3029 = vsyncpa [#allocation7], 1 }
0x1580   :  { %3030 = vsyncpa [#allocation4], 1 }
0x1581   :  { %3031 = vsyncpa [#allocation5], 1 }

</bundles_post_ra>
